<compile_context>
chip_gen: v5e
topology: v5e:2x2
jax: 0.10.0
libtpu: 0.0.40
codegen_flags: <defaults>
</compile_context>

<pallas_src>
import functools

import jax
import jax.numpy as jnp
from jax import lax
from jax.experimental import pallas as pl
from jax.experimental.pallas import tpu as pltpu


def _round_up(n, m):
    return ((n + m - 1) // m) * m


# -----------------------------------------------------------------------------
# Pallas kernel
# -----------------------------------------------------------------------------
def rnnae_kernel(x_ref,        # (T, Bc, D)      f32, time-major input chunk
                 wih_e_ref,    # (D, 4Hp)        bf16 encoder W_ih^T (gate-padded)
                 whh_e_ref,    # (Hp, 4Hp)       bf16 encoder W_hh^T
                 b_e_ref,      # (1, 4Hp)        f32  encoder b_ih + b_hh
                 wcat_d_ref,   # (Dp + Hp, 4Hp)  bf16 decoder [W_ih^T ; W_hh^T]
                 b_d_ref,      # (1, 4Hp)        f32  decoder b_ih + b_hh
                 wfc_ref,      # (Hp, Dp)        bf16 fc weight^T
                 bfc_ref,      # (1, Dp)         f32  fc bias
                 out_ref,      # (Bc, T, Dp)     f32, batch-first output chunk
                 xproj_ref,    # scratch (T, Bc, 4Hp) f32
                 yscr_ref):    # scratch (T, Bc, Dp)  f32
    T, Bc, D = x_ref.shape
    G = b_e_ref.shape[-1]          # 4 * Hp
    Hp = G // 4
    Dp = bfc_ref.shape[-1]
    mm_dtype = whh_e_ref.dtype     # matmul operand dtype (bf16 by default)
    f32 = jnp.float32

    # ---- load weights once; hoist bias broadcasts out of the serial loops ----
    wih_e = wih_e_ref[...]
    whh_e = whh_e_ref[...]
    wcat_d = wcat_d_ref[...]
    wfc = wfc_ref[...]
    b_e = b_e_ref[...]
    b_d = jnp.broadcast_to(b_d_ref[...], (Bc, G))
    bfc = jnp.broadcast_to(bfc_ref[...], (Bc, Dp))

    # ---- hoisted encoder input projection: ONE MXU matmul for all timesteps ----
    x2d = x_ref[...].reshape(T * Bc, D).astype(mm_dtype)
    proj = jnp.dot(x2d, wih_e, preferred_element_type=f32) + b_e      # (T*Bc, G)
    xproj_ref[...] = proj.reshape(T, Bc, G)

    def gate_math(gates, c):
        # PyTorch gate order: i, f, g, o.  All slices are 128-lane aligned (Hp % 128 == 0).
        i = jax.nn.sigmoid(gates[:, 0 * Hp:1 * Hp])
        f = jax.nn.sigmoid(gates[:, 1 * Hp:2 * Hp])
        g = jnp.tanh(gates[:, 2 * Hp:3 * Hp])
        o = jax.nn.sigmoid(gates[:, 3 * Hp:4 * Hp])
        c_new = f * c + i * g
        h_new = o * jnp.tanh(c_new)
        return h_new, c_new

    unroll = True if T <= 64 else False

    # ------------------------------ encoder ------------------------------
    def enc_step(t, carry):
        h, c = carry
        gates = xproj_ref[t] + jnp.dot(h.astype(mm_dtype), whh_e,
                                       preferred_element_type=f32)
        return gate_math(gates, c)

    h0 = jnp.zeros((Bc, Hp), f32)
    c0 = jnp.zeros((Bc, Hp), f32)
    h_enc, c_enc = lax.fori_loop(0, T, enc_step, (h0, c0), unroll=unroll)

    # ----------------------- decoder (autoregressive) --------------------
    def dec_step(t, carry):
        h, c, xin = carry
        z = jnp.concatenate([xin, h], axis=1).astype(mm_dtype)        # (Bc, Dp+Hp)
        gates = jnp.dot(z, wcat_d, preferred_element_type=f32) + b_d  # one fused matmul
        h, c = gate_math(gates, c)
        y = jnp.dot(h.astype(mm_dtype), wfc, preferred_element_type=f32) + bfc
        yscr_ref[t] = y                                               # lane-dense store
        return h, c, y

    xin0 = jnp.zeros((Bc, Dp), f32)
    lax.fori_loop(0, T, dec_step, (h_enc, c_enc, xin0), unroll=unroll)

    # ---- emit batch-first output (avoids a wrapper-side transpose of out) ----
    for b in range(Bc):                        # Bc is small & static
        out_ref[b] = yscr_ref[:, b, :]         # (T, Dp) aligned copy


# -----------------------------------------------------------------------------
# Parameter preparation: transpose / gate-pad / fuse / cast (done once, in wrapper)
# -----------------------------------------------------------------------------
def prepare_params(p, mm_dtype=jnp.bfloat16):
    f32 = jnp.float32
    H = p["w_hh_enc"].shape[1]
    D = p["w_ih_enc"].shape[1]
    Hp = _round_up(H, 128)
    Dp = _round_up(D, 128)
    G = 4 * Hp

    def pad_gate_cols(w_t):
        # w_t: (K, 4H) -> (K, 4Hp); PyTorch gate block k*H:(k+1)*H lands at k*Hp (rest zero)
        K = w_t.shape[0]
        out = jnp.zeros((K, G), f32)
        for g in range(4):
            out = out.at[:, g * Hp:g * Hp + H].set(w_t[:, g * H:(g + 1) * H])
        return out

    def pad_rows(w, k_to):
        k = w.shape[0]
        if k_to == k:
            return w
        return jnp.concatenate([w, jnp.zeros((k_to - k, w.shape[1]), w.dtype)], axis=0)

    # Encoder LSTM
    wih_e = pad_gate_cols(p["w_ih_enc"].T.astype(f32))                      # (D, G)
    whh_e = pad_rows(pad_gate_cols(p["w_hh_enc"].T.astype(f32)), Hp)        # (Hp, G)
    b_e = pad_gate_cols((p["b_ih_enc"] + p["b_hh_enc"])[None, :].astype(f32))

    # Decoder LSTM: stack input & hidden weights for the fused per-step matmul
    wih_d = pad_rows(pad_gate_cols(p["w_ih_dec"].T.astype(f32)), Dp)        # (Dp, G)
    whh_d = pad_rows(pad_gate_cols(p["w_hh_dec"].T.astype(f32)), Hp)        # (Hp, G)
    wcat_d = jnp.concatenate([wih_d, whh_d], axis=0)                         # (Dp+Hp, G)
    b_d = pad_gate_cols((p["b_ih_dec"] + p["b_hh_dec"])[None, :].astype(f32))

    # FC readout (Linear(H -> D)), padded to lane-dense (Hp, Dp)
    wfc = jnp.zeros((Hp, Dp), f32).at[:H, :D].set(p["w_fc"].T.astype(f32))
    bfc = jnp.zeros((1, Dp), f32).at[:, :D].set(p["b_fc"][None, :].astype(f32))

    return dict(
        wih_e=wih_e.astype(mm_dtype), whh_e=whh_e.astype(mm_dtype), b_e=b_e,
        wcat_d=wcat_d.astype(mm_dtype), b_d=b_d,
        wfc=wfc.astype(mm_dtype), bfc=bfc,
        meta=dict(D=D, H=H, Dp=Dp, Hp=Hp),
    )


# -----------------------------------------------------------------------------
# Wrapper
# -----------------------------------------------------------------------------
def rnnae_forward(x, params, *, mm_dtype=jnp.bfloat16, num_batch_chunks=1):
    """x: (B, T, D) batch_first, like the PyTorch module. Returns (B, T, D) f32.

    num_batch_chunks: set to 2 on v7x to shard the (independent) batch recurrences
    across its two TensorCores; leave at 1 on v5e/v6e (single TensorCore).
    """
    B, T, D = x.shape
    prep = prepare_params(params, mm_dtype)
    Dp, Hp = prep["meta"]["Dp"], prep["meta"]["Hp"]
    G = 4 * Hp

    # Pad batch to a multiple of 8 sublanes (and of the chunk count).
    Bp = _round_up(max(B, 8 * num_batch_chunks), 8 * num_batch_chunks)
    Bc = Bp // num_batch_chunks
    x_p = jnp.zeros((Bp, T, D), jnp.float32).at[:B].set(x.astype(jnp.float32))
    # Tiny time-major reorder (last/lane dim unchanged); lets the kernel's hoisted
    # projection fill a time-indexed scratch with one reshape + one bulk store.
    x_tm = jnp.transpose(x_p, (1, 0, 2))                     # (T, Bp, D) f32

    out_full = pl.pallas_call(
        rnnae_kernel,
        out_shape=jax.ShapeDtypeStruct((Bp, T, Dp), jnp.float32),
        grid=(num_batch_chunks,),
        in_specs=[
            pl.BlockSpec((T, Bc, D), lambda i: (0, i, 0)),               # x chunk
            pl.BlockSpec(prep["wih_e"].shape, lambda i: (0, 0)),
            pl.BlockSpec(prep["whh_e"].shape, lambda i: (0, 0)),
            pl.BlockSpec(prep["b_e"].shape, lambda i: (0, 0)),
            pl.BlockSpec(prep["wcat_d"].shape, lambda i: (0, 0)),
            pl.BlockSpec(prep["b_d"].shape, lambda i: (0, 0)),
            pl.BlockSpec(prep["wfc"].shape, lambda i: (0, 0)),
            pl.BlockSpec(prep["bfc"].shape, lambda i: (0, 0)),
        ],
        out_specs=pl.BlockSpec((Bc, T, Dp), lambda i: (i, 0, 0)),
        scratch_shapes=[
            pltpu.VMEM((T, Bc, G), jnp.float32),     # hoisted x-projection
            pltpu.VMEM((T, Bc, Dp), jnp.float32),    # decoder outputs (time-major)
        ],
        compiler_params=pltpu.CompilerParams(
            dimension_semantics=("parallel",),       # batch chunks are independent
            vmem_limit_bytes=32 * 1024 * 1024,       # explicit budget (<= v7x 64 MiB phys)
        ),
    )(x_tm, prep["wih_e"], prep["whh_e"], prep["b_e"],
      prep["wcat_d"], prep["b_d"], prep["wfc"], prep["bfc"])

    return out_full[:B, :, :D]


# -----------------------------------------------------------------------------
# Deterministic parameter init (PyTorch nn.LSTM / nn.Linear layouts; U(-k, k))
# -----------------------------------------------------------------------------
def init_params(key, input_dim, hidden_dim):
    D, H = input_dim, hidden_dim
    k = 1.0 / (H ** 0.5)
    keys = jax.random.split(key, 10)

    def u(rk, shape):
        return jax.random.uniform(rk, shape, jnp.float32, -k, k)

    return dict(
        w_ih_enc=u(keys[0], (4 * H, D)),
        w_hh_enc=u(keys[1], (4 * H, H)),
        b_ih_enc=u(keys[2], (4 * H,)),
        b_hh_enc=u(keys[3], (4 * H,)),
        w_ih_dec=u(keys[4], (4 * H, D)),
        w_hh_dec=u(keys[5], (4 * H, H)),
        b_ih_dec=u(keys[6], (4 * H,)),
        b_hh_dec=u(keys[7], (4 * H,)),
        w_fc=u(keys[8], (D, H)),
        b_fc=u(keys[9], (D,)),
    )


# -----------------------------------------------------------------------------
# Pure-JAX reference mirroring the kernel math (same padding + bf16 operand casts)
# -----------------------------------------------------------------------------
def rnnae_ref(x, params, *, mm_dtype=jnp.bfloat16):
    f32 = jnp.float32
    B, T, D = x.shape
    prep = prepare_params(params, mm_dtype)
    Hp, Dp = prep["meta"]["Hp"], prep["meta"]["Dp"]

    wih_e, whh_e, b_e = prep["wih_e"], prep["whh_e"], prep["b_e"]
    wcat_d, b_d = prep["wcat_d"], prep["b_d"]
    wfc, bfc = prep["wfc"], prep["bfc"]

    def gate_math(gates, c):
        i = jax.nn.sigmoid(gates[:, 0 * Hp:1 * Hp])
        f = jax.nn.sigmoid(gates[:, 1 * Hp:2 * Hp])
        g = jnp.tanh(gates[:, 2 * Hp:3 * Hp])
        o = jax.nn.sigmoid(gates[:, 3 * Hp:4 * Hp])
        c = f * c + i * g
        h = o * jnp.tanh(c)
        return h, c

    h = jnp.zeros((B, Hp), f32)
    c = jnp.zeros((B, Hp), f32)
    for t in range(T):
        xt = x[:, t, :].astype(mm_dtype)
        gates = (jnp.dot(xt, wih_e, preferred_element_type=f32) + b_e
                 + jnp.dot(h.astype(mm_dtype), whh_e, preferred_element_type=f32))
        h, c = gate_math(gates, c)

    xin = jnp.zeros((B, Dp), f32)
    outs = []
    for _ in range(T):
        z = jnp.concatenate([xin, h], axis=1).astype(mm_dtype)
        gates = jnp.dot(z, wcat_d, preferred_element_type=f32) + b_d
        h, c = gate_math(gates, c)
        y = jnp.dot(h.astype(mm_dtype), wfc, preferred_element_type=f32) + bfc
        outs.append(y[:, None, :])
        xin = y
    return jnp.concatenate(outs, axis=1)[:, :, :D]


if __name__ == "__main__":
    B, T, D, H = 2, 8, 4, 32   # batch, seq_len, input_dim, hidden_dim

    key = jax.random.PRNGKey(0)
    k_param, k_x = jax.random.split(key)
    params = init_params(k_param, D, H)
    x = jax.random.normal(k_x, (B, T, D), jnp.float32)

    fwd = jax.jit(functools.partial(rnnae_forward,
                                    mm_dtype=jnp.bfloat16,
                                    num_batch_chunks=1))  # set 2 on v7x (2 TensorCores)
    recon = fwd(x, params)
    recon = jax.block_until_ready(recon)

    ref = rnnae_ref(x, params, mm_dtype=jnp.bfloat16)
    assert recon.shape == (B, T, D)
    assert jnp.allclose(recon, ref, atol=1e-3, rtol=1e-3), (
        "mismatch vs reference, max abs diff = "
        + str(float(jnp.max(jnp.abs(recon - ref)))))

    print("KERNEL_OK")
</pallas_src>

<mosaic_0001>
module attributes {stable_mosaic.version = 11 : i64} {
  func.func @rnnae_kernel(%arg0: i32, %arg1: memref<8x8x4xf32, #tpu.memory_space<vmem>>, %arg2: memref<4x512xbf16, #tpu.memory_space<vmem>>, %arg3: memref<128x512xbf16, #tpu.memory_space<vmem>>, %arg4: memref<1x512xf32, #tpu.memory_space<vmem>>, %arg5: memref<256x512xbf16, #tpu.memory_space<vmem>>, %arg6: memref<1x512xf32, #tpu.memory_space<vmem>>, %arg7: memref<128x128xbf16, #tpu.memory_space<vmem>>, %arg8: memref<1x128xf32, #tpu.memory_space<vmem>>, %arg9: memref<8x8x128xf32, #tpu.memory_space<vmem>>, %arg10: memref<8x8x512xf32, #tpu.memory_space<vmem>>, %arg11: memref<8x8x128xf32, #tpu.memory_space<vmem>>) attributes {dimension_semantics = [#tpu.dimension_semantics<parallel>], iteration_bounds = array<i64: 1>, scalar_prefetch = 0 : i64, scratch_operands = 2 : i64, tpu.core_type = #tpu.core_type<tc>, window_params = [{transform_indices = @transform_0, window_bounds = array<i64: 8, 8, 4>}, {pipeline_mode = #tpu.pipeline_mode<synchronous>, transform_indices = @transform_1, window_bounds = array<i64: 4, 512>}, {pipeline_mode = #tpu.pipeline_mode<synchronous>, transform_indices = @transform_2, window_bounds = array<i64: 128, 512>}, {pipeline_mode = #tpu.pipeline_mode<synchronous>, transform_indices = @transform_3, window_bounds = array<i64: 1, 512>}, {pipeline_mode = #tpu.pipeline_mode<synchronous>, transform_indices = @transform_4, window_bounds = array<i64: 256, 512>}, {pipeline_mode = #tpu.pipeline_mode<synchronous>, transform_indices = @transform_5, window_bounds = array<i64: 1, 512>}, {pipeline_mode = #tpu.pipeline_mode<synchronous>, transform_indices = @transform_6, window_bounds = array<i64: 128, 128>}, {pipeline_mode = #tpu.pipeline_mode<synchronous>, transform_indices = @transform_7, window_bounds = array<i64: 1, 128>}, {transform_indices = @transform_8, window_bounds = array<i64: 8, 8, 128>}]} {
    %c0 = arith.constant 0 : index
    %c0_0 = arith.constant 0 : index
    %0 = vector.load %arg2[%c0, %c0_0] : memref<4x512xbf16, #tpu.memory_space<vmem>>, vector<4x512xbf16>
    %c0_1 = arith.constant 0 : index
    %c0_2 = arith.constant 0 : index
    %1 = vector.load %arg3[%c0_1, %c0_2] : memref<128x512xbf16, #tpu.memory_space<vmem>>, vector<128x512xbf16>
    %c0_3 = arith.constant 0 : index
    %c0_4 = arith.constant 0 : index
    %2 = vector.load %arg5[%c0_3, %c0_4] : memref<256x512xbf16, #tpu.memory_space<vmem>>, vector<256x512xbf16>
    %c0_5 = arith.constant 0 : index
    %c0_6 = arith.constant 0 : index
    %3 = vector.load %arg7[%c0_5, %c0_6] : memref<128x128xbf16, #tpu.memory_space<vmem>>, vector<128x128xbf16>
    %c0_7 = arith.constant 0 : index
    %c0_8 = arith.constant 0 : index
    %4 = vector.load %arg4[%c0_7, %c0_8] : memref<1x512xf32, #tpu.memory_space<vmem>>, vector<1x512xf32>
    %c0_9 = arith.constant 0 : index
    %c0_10 = arith.constant 0 : index
    %5 = vector.load %arg6[%c0_9, %c0_10] : memref<1x512xf32, #tpu.memory_space<vmem>>, vector<1x512xf32>
    %6 = vector.shape_cast %5 : vector<1x512xf32> to vector<1x512xf32>
    %7 = vector.broadcast %6 : vector<1x512xf32> to vector<8x512xf32>
    %c0_11 = arith.constant 0 : index
    %c0_12 = arith.constant 0 : index
    %8 = vector.load %arg8[%c0_11, %c0_12] : memref<1x128xf32, #tpu.memory_space<vmem>>, vector<1x128xf32>
    %9 = vector.shape_cast %8 : vector<1x128xf32> to vector<1x128xf32>
    %10 = vector.broadcast %9 : vector<1x128xf32> to vector<8x128xf32>
    %c0_13 = arith.constant 0 : index
    %c0_14 = arith.constant 0 : index
    %c0_15 = arith.constant 0 : index
    %11 = vector.load %arg1[%c0_13, %c0_14, %c0_15] : memref<8x8x4xf32, #tpu.memory_space<vmem>>, vector<8x8x4xf32>
    %12 = vector.shape_cast %11 : vector<8x8x4xf32> to vector<64x4xf32>
    %13 = arith.truncf %12 : vector<64x4xf32> to vector<64x4xbf16>
    %cst = arith.constant dense<0.000000e+00> : vector<64x512xf32>
    %14 = tpu.matmul %13, %0, %cst {dimension_numbers = #tpu.dot_dimension_numbers<[1], [0], [0], [1], [0, 0, 1, 1], [], []>} : vector<64x4xbf16>, vector<4x512xbf16>, vector<64x512xf32> -> vector<64x512xf32>
    %15 = vector.broadcast %4 : vector<1x512xf32> to vector<64x512xf32>
    %16 = arith.addf %14, %15 : vector<64x512xf32>
    %17 = vector.shape_cast %16 : vector<64x512xf32> to vector<8x8x512xf32>
    %c0_16 = arith.constant 0 : index
    %c0_17 = arith.constant 0 : index
    %c0_18 = arith.constant 0 : index
    %18 = vector.load %arg10[%c0_16, %c0_17, %c0_18] : memref<8x8x512xf32, #tpu.memory_space<vmem>>, vector<8x8x512xf32>
    tpu.vector_store %arg10[%c0_16, %c0_17, %c0_18], %17 {strides = array<i32>} : memref<8x8x512xf32, #tpu.memory_space<vmem>>, vector<8x8x512xf32>,
    %cst_19 = arith.constant 0.000000e+00 : f32
    %19 = vector.broadcast %cst_19 : f32 to vector<8x128xf32>
    %cst_20 = arith.constant 0.000000e+00 : f32
    %20 = vector.broadcast %cst_20 : f32 to vector<8x128xf32>
    %c0_i32 = arith.constant 0 : i32
    %21 = arith.index_cast %c0_i32 : i32 to index
    %c0_21 = arith.constant 0 : index
    %c0_22 = arith.constant 0 : index
    %22 = vector.load %arg10[%21, %c0_21, %c0_22] : memref<8x8x512xf32, #tpu.memory_space<vmem>>, vector<1x8x512xf32>
    %23 = vector.shape_cast %22 : vector<1x8x512xf32> to vector<8x512xf32>
    %24 = arith.truncf %19 : vector<8x128xf32> to vector<8x128xbf16>
    %cst_23 = arith.constant dense<0.000000e+00> : vector<8x512xf32>
    %25 = tpu.matmul %24, %1, %cst_23 {dimension_numbers = #tpu.dot_dimension_numbers<[1], [0], [0], [1], [0, 0, 1, 1], [], []>} : vector<8x128xbf16>, vector<128x512xbf16>, vector<8x512xf32> -> vector<8x512xf32>
    %26 = arith.addf %23, %25 : vector<8x512xf32>
    %27 = vector.extract_strided_slice %26 {offsets = [0, 0], sizes = [8, 128], strides = [1, 1]} : vector<8x512xf32> to vector<8x128xf32>
    %28 = arith.negf %27 : vector<8x128xf32>
    %29 = math.exp %28 : vector<8x128xf32>
    %cst_24 = arith.constant 1.000000e+00 : f32
    %30 = vector.broadcast %cst_24 : f32 to vector<8x128xf32>
    %31 = arith.addf %30, %29 : vector<8x128xf32>
    %32 = arith.divf %30, %31 : vector<8x128xf32>
    %33 = vector.extract_strided_slice %26 {offsets = [0, 128], sizes = [8, 128], strides = [1, 1]} : vector<8x512xf32> to vector<8x128xf32>
    %34 = arith.negf %33 : vector<8x128xf32>
    %35 = math.exp %34 : vector<8x128xf32>
    %cst_25 = arith.constant 1.000000e+00 : f32
    %36 = vector.broadcast %cst_25 : f32 to vector<8x128xf32>
    %37 = arith.addf %36, %35 : vector<8x128xf32>
    %38 = arith.divf %36, %37 : vector<8x128xf32>
    %39 = vector.extract_strided_slice %26 {offsets = [0, 256], sizes = [8, 128], strides = [1, 1]} : vector<8x512xf32> to vector<8x128xf32>
    %40 = math.tanh %39 : vector<8x128xf32>
    %41 = vector.extract_strided_slice %26 {offsets = [0, 384], sizes = [8, 128], strides = [1, 1]} : vector<8x512xf32> to vector<8x128xf32>
    %42 = arith.negf %41 : vector<8x128xf32>
    %43 = math.exp %42 : vector<8x128xf32>
    %cst_26 = arith.constant 1.000000e+00 : f32
    %44 = vector.broadcast %cst_26 : f32 to vector<8x128xf32>
    %45 = arith.addf %44, %43 : vector<8x128xf32>
    %46 = arith.divf %44, %45 : vector<8x128xf32>
    %47 = arith.mulf %38, %20 : vector<8x128xf32>
    %48 = arith.mulf %32, %40 : vector<8x128xf32>
    %49 = arith.addf %47, %48 : vector<8x128xf32>
    %50 = math.tanh %49 : vector<8x128xf32>
    %51 = arith.mulf %46, %50 : vector<8x128xf32>
    %c1_i32 = arith.constant 1 : i32
    %52 = arith.index_cast %c1_i32 : i32 to index
    %c0_27 = arith.constant 0 : index
    %c0_28 = arith.constant 0 : index
    %53 = vector.load %arg10[%52, %c0_27, %c0_28] : memref<8x8x512xf32, #tpu.memory_space<vmem>>, vector<1x8x512xf32>
    %54 = vector.shape_cast %53 : vector<1x8x512xf32> to vector<8x512xf32>
    %55 = arith.truncf %51 : vector<8x128xf32> to vector<8x128xbf16>
    %cst_29 = arith.constant dense<0.000000e+00> : vector<8x512xf32>
    %56 = tpu.matmul %55, %1, %cst_29 {dimension_numbers = #tpu.dot_dimension_numbers<[1], [0], [0], [1], [0, 0, 1, 1], [], []>} : vector<8x128xbf16>, vector<128x512xbf16>, vector<8x512xf32> -> vector<8x512xf32>
    %57 = arith.addf %54, %56 : vector<8x512xf32>
    %58 = vector.extract_strided_slice %57 {offsets = [0, 0], sizes = [8, 128], strides = [1, 1]} : vector<8x512xf32> to vector<8x128xf32>
    %59 = arith.negf %58 : vector<8x128xf32>
    %60 = math.exp %59 : vector<8x128xf32>
    %cst_30 = arith.constant 1.000000e+00 : f32
    %61 = vector.broadcast %cst_30 : f32 to vector<8x128xf32>
    %62 = arith.addf %61, %60 : vector<8x128xf32>
    %63 = arith.divf %61, %62 : vector<8x128xf32>
    %64 = vector.extract_strided_slice %57 {offsets = [0, 128], sizes = [8, 128], strides = [1, 1]} : vector<8x512xf32> to vector<8x128xf32>
    %65 = arith.negf %64 : vector<8x128xf32>
    %66 = math.exp %65 : vector<8x128xf32>
    %cst_31 = arith.constant 1.000000e+00 : f32
    %67 = vector.broadcast %cst_31 : f32 to vector<8x128xf32>
    %68 = arith.addf %67, %66 : vector<8x128xf32>
    %69 = arith.divf %67, %68 : vector<8x128xf32>
    %70 = vector.extract_strided_slice %57 {offsets = [0, 256], sizes = [8, 128], strides = [1, 1]} : vector<8x512xf32> to vector<8x128xf32>
    %71 = math.tanh %70 : vector<8x128xf32>
    %72 = vector.extract_strided_slice %57 {offsets = [0, 384], sizes = [8, 128], strides = [1, 1]} : vector<8x512xf32> to vector<8x128xf32>
    %73 = arith.negf %72 : vector<8x128xf32>
    %74 = math.exp %73 : vector<8x128xf32>
    %cst_32 = arith.constant 1.000000e+00 : f32
    %75 = vector.broadcast %cst_32 : f32 to vector<8x128xf32>
    %76 = arith.addf %75, %74 : vector<8x128xf32>
    %77 = arith.divf %75, %76 : vector<8x128xf32>
    %78 = arith.mulf %69, %49 : vector<8x128xf32>
    %79 = arith.mulf %63, %71 : vector<8x128xf32>
    %80 = arith.addf %78, %79 : vector<8x128xf32>
    %81 = math.tanh %80 : vector<8x128xf32>
    %82 = arith.mulf %77, %81 : vector<8x128xf32>
    %c2_i32 = arith.constant 2 : i32
    %83 = arith.index_cast %c2_i32 : i32 to index
    %c0_33 = arith.constant 0 : index
    %c0_34 = arith.constant 0 : index
    %84 = vector.load %arg10[%83, %c0_33, %c0_34] : memref<8x8x512xf32, #tpu.memory_space<vmem>>, vector<1x8x512xf32>
    %85 = vector.shape_cast %84 : vector<1x8x512xf32> to vector<8x512xf32>
    %86 = arith.truncf %82 : vector<8x128xf32> to vector<8x128xbf16>
    %cst_35 = arith.constant dense<0.000000e+00> : vector<8x512xf32>
    %87 = tpu.matmul %86, %1, %cst_35 {dimension_numbers = #tpu.dot_dimension_numbers<[1], [0], [0], [1], [0, 0, 1, 1], [], []>} : vector<8x128xbf16>, vector<128x512xbf16>, vector<8x512xf32> -> vector<8x512xf32>
    %88 = arith.addf %85, %87 : vector<8x512xf32>
    %89 = vector.extract_strided_slice %88 {offsets = [0, 0], sizes = [8, 128], strides = [1, 1]} : vector<8x512xf32> to vector<8x128xf32>
    %90 = arith.negf %89 : vector<8x128xf32>
    %91 = math.exp %90 : vector<8x128xf32>
    %cst_36 = arith.constant 1.000000e+00 : f32
    %92 = vector.broadcast %cst_36 : f32 to vector<8x128xf32>
    %93 = arith.addf %92, %91 : vector<8x128xf32>
    %94 = arith.divf %92, %93 : vector<8x128xf32>
    %95 = vector.extract_strided_slice %88 {offsets = [0, 128], sizes = [8, 128], strides = [1, 1]} : vector<8x512xf32> to vector<8x128xf32>
    %96 = arith.negf %95 : vector<8x128xf32>
    %97 = math.exp %96 : vector<8x128xf32>
    %cst_37 = arith.constant 1.000000e+00 : f32
    %98 = vector.broadcast %cst_37 : f32 to vector<8x128xf32>
    %99 = arith.addf %98, %97 : vector<8x128xf32>
    %100 = arith.divf %98, %99 : vector<8x128xf32>
    %101 = vector.extract_strided_slice %88 {offsets = [0, 256], sizes = [8, 128], strides = [1, 1]} : vector<8x512xf32> to vector<8x128xf32>
    %102 = math.tanh %101 : vector<8x128xf32>
    %103 = vector.extract_strided_slice %88 {offsets = [0, 384], sizes = [8, 128], strides = [1, 1]} : vector<8x512xf32> to vector<8x128xf32>
    %104 = arith.negf %103 : vector<8x128xf32>
    %105 = math.exp %104 : vector<8x128xf32>
    %cst_38 = arith.constant 1.000000e+00 : f32
    %106 = vector.broadcast %cst_38 : f32 to vector<8x128xf32>
    %107 = arith.addf %106, %105 : vector<8x128xf32>
    %108 = arith.divf %106, %107 : vector<8x128xf32>
    %109 = arith.mulf %100, %80 : vector<8x128xf32>
    %110 = arith.mulf %94, %102 : vector<8x128xf32>
    %111 = arith.addf %109, %110 : vector<8x128xf32>
    %112 = math.tanh %111 : vector<8x128xf32>
    %113 = arith.mulf %108, %112 : vector<8x128xf32>
    %c3_i32 = arith.constant 3 : i32
    %114 = arith.index_cast %c3_i32 : i32 to index
    %c0_39 = arith.constant 0 : index
    %c0_40 = arith.constant 0 : index
    %115 = vector.load %arg10[%114, %c0_39, %c0_40] : memref<8x8x512xf32, #tpu.memory_space<vmem>>, vector<1x8x512xf32>
    %116 = vector.shape_cast %115 : vector<1x8x512xf32> to vector<8x512xf32>
    %117 = arith.truncf %113 : vector<8x128xf32> to vector<8x128xbf16>
    %cst_41 = arith.constant dense<0.000000e+00> : vector<8x512xf32>
    %118 = tpu.matmul %117, %1, %cst_41 {dimension_numbers = #tpu.dot_dimension_numbers<[1], [0], [0], [1], [0, 0, 1, 1], [], []>} : vector<8x128xbf16>, vector<128x512xbf16>, vector<8x512xf32> -> vector<8x512xf32>
    %119 = arith.addf %116, %118 : vector<8x512xf32>
    %120 = vector.extract_strided_slice %119 {offsets = [0, 0], sizes = [8, 128], strides = [1, 1]} : vector<8x512xf32> to vector<8x128xf32>
    %121 = arith.negf %120 : vector<8x128xf32>
    %122 = math.exp %121 : vector<8x128xf32>
    %cst_42 = arith.constant 1.000000e+00 : f32
    %123 = vector.broadcast %cst_42 : f32 to vector<8x128xf32>
    %124 = arith.addf %123, %122 : vector<8x128xf32>
    %125 = arith.divf %123, %124 : vector<8x128xf32>
    %126 = vector.extract_strided_slice %119 {offsets = [0, 128], sizes = [8, 128], strides = [1, 1]} : vector<8x512xf32> to vector<8x128xf32>
    %127 = arith.negf %126 : vector<8x128xf32>
    %128 = math.exp %127 : vector<8x128xf32>
    %cst_43 = arith.constant 1.000000e+00 : f32
    %129 = vector.broadcast %cst_43 : f32 to vector<8x128xf32>
    %130 = arith.addf %129, %128 : vector<8x128xf32>
    %131 = arith.divf %129, %130 : vector<8x128xf32>
    %132 = vector.extract_strided_slice %119 {offsets = [0, 256], sizes = [8, 128], strides = [1, 1]} : vector<8x512xf32> to vector<8x128xf32>
    %133 = math.tanh %132 : vector<8x128xf32>
    %134 = vector.extract_strided_slice %119 {offsets = [0, 384], sizes = [8, 128], strides = [1, 1]} : vector<8x512xf32> to vector<8x128xf32>
    %135 = arith.negf %134 : vector<8x128xf32>
    %136 = math.exp %135 : vector<8x128xf32>
    %cst_44 = arith.constant 1.000000e+00 : f32
    %137 = vector.broadcast %cst_44 : f32 to vector<8x128xf32>
    %138 = arith.addf %137, %136 : vector<8x128xf32>
    %139 = arith.divf %137, %138 : vector<8x128xf32>
    %140 = arith.mulf %131, %111 : vector<8x128xf32>
    %141 = arith.mulf %125, %133 : vector<8x128xf32>
    %142 = arith.addf %140, %141 : vector<8x128xf32>
    %143 = math.tanh %142 : vector<8x128xf32>
    %144 = arith.mulf %139, %143 : vector<8x128xf32>
    %c4_i32 = arith.constant 4 : i32
    %145 = arith.index_cast %c4_i32 : i32 to index
    %c0_45 = arith.constant 0 : index
    %c0_46 = arith.constant 0 : index
    %146 = vector.load %arg10[%145, %c0_45, %c0_46] : memref<8x8x512xf32, #tpu.memory_space<vmem>>, vector<1x8x512xf32>
    %147 = vector.shape_cast %146 : vector<1x8x512xf32> to vector<8x512xf32>
    %148 = arith.truncf %144 : vector<8x128xf32> to vector<8x128xbf16>
    %cst_47 = arith.constant dense<0.000000e+00> : vector<8x512xf32>
    %149 = tpu.matmul %148, %1, %cst_47 {dimension_numbers = #tpu.dot_dimension_numbers<[1], [0], [0], [1], [0, 0, 1, 1], [], []>} : vector<8x128xbf16>, vector<128x512xbf16>, vector<8x512xf32> -> vector<8x512xf32>
    %150 = arith.addf %147, %149 : vector<8x512xf32>
    %151 = vector.extract_strided_slice %150 {offsets = [0, 0], sizes = [8, 128], strides = [1, 1]} : vector<8x512xf32> to vector<8x128xf32>
    %152 = arith.negf %151 : vector<8x128xf32>
    %153 = math.exp %152 : vector<8x128xf32>
    %cst_48 = arith.constant 1.000000e+00 : f32
    %154 = vector.broadcast %cst_48 : f32 to vector<8x128xf32>
    %155 = arith.addf %154, %153 : vector<8x128xf32>
    %156 = arith.divf %154, %155 : vector<8x128xf32>
    %157 = vector.extract_strided_slice %150 {offsets = [0, 128], sizes = [8, 128], strides = [1, 1]} : vector<8x512xf32> to vector<8x128xf32>
    %158 = arith.negf %157 : vector<8x128xf32>
    %159 = math.exp %158 : vector<8x128xf32>
    %cst_49 = arith.constant 1.000000e+00 : f32
    %160 = vector.broadcast %cst_49 : f32 to vector<8x128xf32>
    %161 = arith.addf %160, %159 : vector<8x128xf32>
    %162 = arith.divf %160, %161 : vector<8x128xf32>
    %163 = vector.extract_strided_slice %150 {offsets = [0, 256], sizes = [8, 128], strides = [1, 1]} : vector<8x512xf32> to vector<8x128xf32>
    %164 = math.tanh %163 : vector<8x128xf32>
    %165 = vector.extract_strided_slice %150 {offsets = [0, 384], sizes = [8, 128], strides = [1, 1]} : vector<8x512xf32> to vector<8x128xf32>
    %166 = arith.negf %165 : vector<8x128xf32>
    %167 = math.exp %166 : vector<8x128xf32>
    %cst_50 = arith.constant 1.000000e+00 : f32
    %168 = vector.broadcast %cst_50 : f32 to vector<8x128xf32>
    %169 = arith.addf %168, %167 : vector<8x128xf32>
    %170 = arith.divf %168, %169 : vector<8x128xf32>
    %171 = arith.mulf %162, %142 : vector<8x128xf32>
    %172 = arith.mulf %156, %164 : vector<8x128xf32>
    %173 = arith.addf %171, %172 : vector<8x128xf32>
    %174 = math.tanh %173 : vector<8x128xf32>
    %175 = arith.mulf %170, %174 : vector<8x128xf32>
    %c5_i32 = arith.constant 5 : i32
    %176 = arith.index_cast %c5_i32 : i32 to index
    %c0_51 = arith.constant 0 : index
    %c0_52 = arith.constant 0 : index
    %177 = vector.load %arg10[%176, %c0_51, %c0_52] : memref<8x8x512xf32, #tpu.memory_space<vmem>>, vector<1x8x512xf32>
    %178 = vector.shape_cast %177 : vector<1x8x512xf32> to vector<8x512xf32>
    %179 = arith.truncf %175 : vector<8x128xf32> to vector<8x128xbf16>
    %cst_53 = arith.constant dense<0.000000e+00> : vector<8x512xf32>
    %180 = tpu.matmul %179, %1, %cst_53 {dimension_numbers = #tpu.dot_dimension_numbers<[1], [0], [0], [1], [0, 0, 1, 1], [], []>} : vector<8x128xbf16>, vector<128x512xbf16>, vector<8x512xf32> -> vector<8x512xf32>
    %181 = arith.addf %178, %180 : vector<8x512xf32>
    %182 = vector.extract_strided_slice %181 {offsets = [0, 0], sizes = [8, 128], strides = [1, 1]} : vector<8x512xf32> to vector<8x128xf32>
    %183 = arith.negf %182 : vector<8x128xf32>
    %184 = math.exp %183 : vector<8x128xf32>
    %cst_54 = arith.constant 1.000000e+00 : f32
    %185 = vector.broadcast %cst_54 : f32 to vector<8x128xf32>
    %186 = arith.addf %185, %184 : vector<8x128xf32>
    %187 = arith.divf %185, %186 : vector<8x128xf32>
    %188 = vector.extract_strided_slice %181 {offsets = [0, 128], sizes = [8, 128], strides = [1, 1]} : vector<8x512xf32> to vector<8x128xf32>
    %189 = arith.negf %188 : vector<8x128xf32>
    %190 = math.exp %189 : vector<8x128xf32>
    %cst_55 = arith.constant 1.000000e+00 : f32
    %191 = vector.broadcast %cst_55 : f32 to vector<8x128xf32>
    %192 = arith.addf %191, %190 : vector<8x128xf32>
    %193 = arith.divf %191, %192 : vector<8x128xf32>
    %194 = vector.extract_strided_slice %181 {offsets = [0, 256], sizes = [8, 128], strides = [1, 1]} : vector<8x512xf32> to vector<8x128xf32>
    %195 = math.tanh %194 : vector<8x128xf32>
    %196 = vector.extract_strided_slice %181 {offsets = [0, 384], sizes = [8, 128], strides = [1, 1]} : vector<8x512xf32> to vector<8x128xf32>
    %197 = arith.negf %196 : vector<8x128xf32>
    %198 = math.exp %197 : vector<8x128xf32>
    %cst_56 = arith.constant 1.000000e+00 : f32
    %199 = vector.broadcast %cst_56 : f32 to vector<8x128xf32>
    %200 = arith.addf %199, %198 : vector<8x128xf32>
    %201 = arith.divf %199, %200 : vector<8x128xf32>
    %202 = arith.mulf %193, %173 : vector<8x128xf32>
    %203 = arith.mulf %187, %195 : vector<8x128xf32>
    %204 = arith.addf %202, %203 : vector<8x128xf32>
    %205 = math.tanh %204 : vector<8x128xf32>
    %206 = arith.mulf %201, %205 : vector<8x128xf32>
    %c6_i32 = arith.constant 6 : i32
    %207 = arith.index_cast %c6_i32 : i32 to index
    %c0_57 = arith.constant 0 : index
    %c0_58 = arith.constant 0 : index
    %208 = vector.load %arg10[%207, %c0_57, %c0_58] : memref<8x8x512xf32, #tpu.memory_space<vmem>>, vector<1x8x512xf32>
    %209 = vector.shape_cast %208 : vector<1x8x512xf32> to vector<8x512xf32>
    %210 = arith.truncf %206 : vector<8x128xf32> to vector<8x128xbf16>
    %cst_59 = arith.constant dense<0.000000e+00> : vector<8x512xf32>
    %211 = tpu.matmul %210, %1, %cst_59 {dimension_numbers = #tpu.dot_dimension_numbers<[1], [0], [0], [1], [0, 0, 1, 1], [], []>} : vector<8x128xbf16>, vector<128x512xbf16>, vector<8x512xf32> -> vector<8x512xf32>
    %212 = arith.addf %209, %211 : vector<8x512xf32>
    %213 = vector.extract_strided_slice %212 {offsets = [0, 0], sizes = [8, 128], strides = [1, 1]} : vector<8x512xf32> to vector<8x128xf32>
    %214 = arith.negf %213 : vector<8x128xf32>
    %215 = math.exp %214 : vector<8x128xf32>
    %cst_60 = arith.constant 1.000000e+00 : f32
    %216 = vector.broadcast %cst_60 : f32 to vector<8x128xf32>
    %217 = arith.addf %216, %215 : vector<8x128xf32>
    %218 = arith.divf %216, %217 : vector<8x128xf32>
    %219 = vector.extract_strided_slice %212 {offsets = [0, 128], sizes = [8, 128], strides = [1, 1]} : vector<8x512xf32> to vector<8x128xf32>
    %220 = arith.negf %219 : vector<8x128xf32>
    %221 = math.exp %220 : vector<8x128xf32>
    %cst_61 = arith.constant 1.000000e+00 : f32
    %222 = vector.broadcast %cst_61 : f32 to vector<8x128xf32>
    %223 = arith.addf %222, %221 : vector<8x128xf32>
    %224 = arith.divf %222, %223 : vector<8x128xf32>
    %225 = vector.extract_strided_slice %212 {offsets = [0, 256], sizes = [8, 128], strides = [1, 1]} : vector<8x512xf32> to vector<8x128xf32>
    %226 = math.tanh %225 : vector<8x128xf32>
    %227 = vector.extract_strided_slice %212 {offsets = [0, 384], sizes = [8, 128], strides = [1, 1]} : vector<8x512xf32> to vector<8x128xf32>
    %228 = arith.negf %227 : vector<8x128xf32>
    %229 = math.exp %228 : vector<8x128xf32>
    %cst_62 = arith.constant 1.000000e+00 : f32
    %230 = vector.broadcast %cst_62 : f32 to vector<8x128xf32>
    %231 = arith.addf %230, %229 : vector<8x128xf32>
    %232 = arith.divf %230, %231 : vector<8x128xf32>
    %233 = arith.mulf %224, %204 : vector<8x128xf32>
    %234 = arith.mulf %218, %226 : vector<8x128xf32>
    %235 = arith.addf %233, %234 : vector<8x128xf32>
    %236 = math.tanh %235 : vector<8x128xf32>
    %237 = arith.mulf %232, %236 : vector<8x128xf32>
    %c7_i32 = arith.constant 7 : i32
    %238 = arith.index_cast %c7_i32 : i32 to index
    %c0_63 = arith.constant 0 : index
    %c0_64 = arith.constant 0 : index
    %239 = vector.load %arg10[%238, %c0_63, %c0_64] : memref<8x8x512xf32, #tpu.memory_space<vmem>>, vector<1x8x512xf32>
    %240 = vector.shape_cast %239 : vector<1x8x512xf32> to vector<8x512xf32>
    %241 = arith.truncf %237 : vector<8x128xf32> to vector<8x128xbf16>
    %cst_65 = arith.constant dense<0.000000e+00> : vector<8x512xf32>
    %242 = tpu.matmul %241, %1, %cst_65 {dimension_numbers = #tpu.dot_dimension_numbers<[1], [0], [0], [1], [0, 0, 1, 1], [], []>} : vector<8x128xbf16>, vector<128x512xbf16>, vector<8x512xf32> -> vector<8x512xf32>
    %243 = arith.addf %240, %242 : vector<8x512xf32>
    %244 = vector.extract_strided_slice %243 {offsets = [0, 0], sizes = [8, 128], strides = [1, 1]} : vector<8x512xf32> to vector<8x128xf32>
    %245 = arith.negf %244 : vector<8x128xf32>
    %246 = math.exp %245 : vector<8x128xf32>
    %cst_66 = arith.constant 1.000000e+00 : f32
    %247 = vector.broadcast %cst_66 : f32 to vector<8x128xf32>
    %248 = arith.addf %247, %246 : vector<8x128xf32>
    %249 = arith.divf %247, %248 : vector<8x128xf32>
    %250 = vector.extract_strided_slice %243 {offsets = [0, 128], sizes = [8, 128], strides = [1, 1]} : vector<8x512xf32> to vector<8x128xf32>
    %251 = arith.negf %250 : vector<8x128xf32>
    %252 = math.exp %251 : vector<8x128xf32>
    %cst_67 = arith.constant 1.000000e+00 : f32
    %253 = vector.broadcast %cst_67 : f32 to vector<8x128xf32>
    %254 = arith.addf %253, %252 : vector<8x128xf32>
    %255 = arith.divf %253, %254 : vector<8x128xf32>
    %256 = vector.extract_strided_slice %243 {offsets = [0, 256], sizes = [8, 128], strides = [1, 1]} : vector<8x512xf32> to vector<8x128xf32>
    %257 = math.tanh %256 : vector<8x128xf32>
    %258 = vector.extract_strided_slice %243 {offsets = [0, 384], sizes = [8, 128], strides = [1, 1]} : vector<8x512xf32> to vector<8x128xf32>
    %259 = arith.negf %258 : vector<8x128xf32>
    %260 = math.exp %259 : vector<8x128xf32>
    %cst_68 = arith.constant 1.000000e+00 : f32
    %261 = vector.broadcast %cst_68 : f32 to vector<8x128xf32>
    %262 = arith.addf %261, %260 : vector<8x128xf32>
    %263 = arith.divf %261, %262 : vector<8x128xf32>
    %264 = arith.mulf %255, %235 : vector<8x128xf32>
    %265 = arith.mulf %249, %257 : vector<8x128xf32>
    %266 = arith.addf %264, %265 : vector<8x128xf32>
    %267 = math.tanh %266 : vector<8x128xf32>
    %268 = arith.mulf %263, %267 : vector<8x128xf32>
    %c8_i32 = arith.constant 8 : i32
    %cst_69 = arith.constant 0.000000e+00 : f32
    %269 = vector.broadcast %cst_69 : f32 to vector<8x128xf32>
    %c0_i32_70 = arith.constant 0 : i32
    %270 = tpu.concatenate %269, %268 in 1 : vector<8x128xf32>, vector<8x128xf32> -> vector<8x256xf32>
    %271 = arith.truncf %270 : vector<8x256xf32> to vector<8x256xbf16>
    %cst_71 = arith.constant dense<0.000000e+00> : vector<8x512xf32>
    %272 = tpu.matmul %271, %2, %cst_71 {dimension_numbers = #tpu.dot_dimension_numbers<[1], [0], [0], [1], [0, 0, 1, 1], [], []>} : vector<8x256xbf16>, vector<256x512xbf16>, vector<8x512xf32> -> vector<8x512xf32>
    %273 = arith.addf %272, %7 : vector<8x512xf32>
    %274 = vector.extract_strided_slice %273 {offsets = [0, 0], sizes = [8, 128], strides = [1, 1]} : vector<8x512xf32> to vector<8x128xf32>
    %275 = arith.negf %274 : vector<8x128xf32>
    %276 = math.exp %275 : vector<8x128xf32>
    %cst_72 = arith.constant 1.000000e+00 : f32
    %277 = vector.broadcast %cst_72 : f32 to vector<8x128xf32>
    %278 = arith.addf %277, %276 : vector<8x128xf32>
    %279 = arith.divf %277, %278 : vector<8x128xf32>
    %280 = vector.extract_strided_slice %273 {offsets = [0, 128], sizes = [8, 128], strides = [1, 1]} : vector<8x512xf32> to vector<8x128xf32>
    %281 = arith.negf %280 : vector<8x128xf32>
    %282 = math.exp %281 : vector<8x128xf32>
    %cst_73 = arith.constant 1.000000e+00 : f32
    %283 = vector.broadcast %cst_73 : f32 to vector<8x128xf32>
    %284 = arith.addf %283, %282 : vector<8x128xf32>
    %285 = arith.divf %283, %284 : vector<8x128xf32>
    %286 = vector.extract_strided_slice %273 {offsets = [0, 256], sizes = [8, 128], strides = [1, 1]} : vector<8x512xf32> to vector<8x128xf32>
    %287 = math.tanh %286 : vector<8x128xf32>
    %288 = vector.extract_strided_slice %273 {offsets = [0, 384], sizes = [8, 128], strides = [1, 1]} : vector<8x512xf32> to vector<8x128xf32>
    %289 = arith.negf %288 : vector<8x128xf32>
    %290 = math.exp %289 : vector<8x128xf32>
    %cst_74 = arith.constant 1.000000e+00 : f32
    %291 = vector.broadcast %cst_74 : f32 to vector<8x128xf32>
    %292 = arith.addf %291, %290 : vector<8x128xf32>
    %293 = arith.divf %291, %292 : vector<8x128xf32>
    %294 = arith.mulf %285, %266 : vector<8x128xf32>
    %295 = arith.mulf %279, %287 : vector<8x128xf32>
    %296 = arith.addf %294, %295 : vector<8x128xf32>
    %297 = math.tanh %296 : vector<8x128xf32>
    %298 = arith.mulf %293, %297 : vector<8x128xf32>
    %299 = arith.truncf %298 : vector<8x128xf32> to vector<8x128xbf16>
    %cst_75 = arith.constant dense<0.000000e+00> : vector<8x128xf32>
    %300 = tpu.matmul %299, %3, %cst_75 {dimension_numbers = #tpu.dot_dimension_numbers<[1], [0], [0], [1], [0, 0, 1, 1], [], []>} : vector<8x128xbf16>, vector<128x128xbf16>, vector<8x128xf32> -> vector<8x128xf32>
    %301 = arith.addf %300, %10 : vector<8x128xf32>
    %302 = arith.index_cast %c0_i32_70 : i32 to index
    %c0_76 = arith.constant 0 : index
    %c0_77 = arith.constant 0 : index
    %303 = vector.load %arg11[%302, %c0_76, %c0_77] : memref<8x8x128xf32, #tpu.memory_space<vmem>>, vector<1x8x128xf32>
    %304 = vector.shape_cast %303 : vector<1x8x128xf32> to vector<8x128xf32>
    %305 = vector.shape_cast %301 : vector<8x128xf32> to vector<1x8x128xf32>
    tpu.vector_store %arg11[%302, %c0_76, %c0_77], %305 {strides = array<i32>} : memref<8x8x128xf32, #tpu.memory_space<vmem>>, vector<1x8x128xf32>,
    %c1_i32_78 = arith.constant 1 : i32
    %306 = tpu.concatenate %301, %298 in 1 : vector<8x128xf32>, vector<8x128xf32> -> vector<8x256xf32>
    %307 = arith.truncf %306 : vector<8x256xf32> to vector<8x256xbf16>
    %cst_79 = arith.constant dense<0.000000e+00> : vector<8x512xf32>
    %308 = tpu.matmul %307, %2, %cst_79 {dimension_numbers = #tpu.dot_dimension_numbers<[1], [0], [0], [1], [0, 0, 1, 1], [], []>} : vector<8x256xbf16>, vector<256x512xbf16>, vector<8x512xf32> -> vector<8x512xf32>
    %309 = arith.addf %308, %7 : vector<8x512xf32>
    %310 = vector.extract_strided_slice %309 {offsets = [0, 0], sizes = [8, 128], strides = [1, 1]} : vector<8x512xf32> to vector<8x128xf32>
    %311 = arith.negf %310 : vector<8x128xf32>
    %312 = math.exp %311 : vector<8x128xf32>
    %cst_80 = arith.constant 1.000000e+00 : f32
    %313 = vector.broadcast %cst_80 : f32 to vector<8x128xf32>
    %314 = arith.addf %313, %312 : vector<8x128xf32>
    %315 = arith.divf %313, %314 : vector<8x128xf32>
    %316 = vector.extract_strided_slice %309 {offsets = [0, 128], sizes = [8, 128], strides = [1, 1]} : vector<8x512xf32> to vector<8x128xf32>
    %317 = arith.negf %316 : vector<8x128xf32>
    %318 = math.exp %317 : vector<8x128xf32>
    %cst_81 = arith.constant 1.000000e+00 : f32
    %319 = vector.broadcast %cst_81 : f32 to vector<8x128xf32>
    %320 = arith.addf %319, %318 : vector<8x128xf32>
    %321 = arith.divf %319, %320 : vector<8x128xf32>
    %322 = vector.extract_strided_slice %309 {offsets = [0, 256], sizes = [8, 128], strides = [1, 1]} : vector<8x512xf32> to vector<8x128xf32>
    %323 = math.tanh %322 : vector<8x128xf32>
    %324 = vector.extract_strided_slice %309 {offsets = [0, 384], sizes = [8, 128], strides = [1, 1]} : vector<8x512xf32> to vector<8x128xf32>
    %325 = arith.negf %324 : vector<8x128xf32>
    %326 = math.exp %325 : vector<8x128xf32>
    %cst_82 = arith.constant 1.000000e+00 : f32
    %327 = vector.broadcast %cst_82 : f32 to vector<8x128xf32>
    %328 = arith.addf %327, %326 : vector<8x128xf32>
    %329 = arith.divf %327, %328 : vector<8x128xf32>
    %330 = arith.mulf %321, %296 : vector<8x128xf32>
    %331 = arith.mulf %315, %323 : vector<8x128xf32>
    %332 = arith.addf %330, %331 : vector<8x128xf32>
    %333 = math.tanh %332 : vector<8x128xf32>
    %334 = arith.mulf %329, %333 : vector<8x128xf32>
    %335 = arith.truncf %334 : vector<8x128xf32> to vector<8x128xbf16>
    %cst_83 = arith.constant dense<0.000000e+00> : vector<8x128xf32>
    %336 = tpu.matmul %335, %3, %cst_83 {dimension_numbers = #tpu.dot_dimension_numbers<[1], [0], [0], [1], [0, 0, 1, 1], [], []>} : vector<8x128xbf16>, vector<128x128xbf16>, vector<8x128xf32> -> vector<8x128xf32>
    %337 = arith.addf %336, %10 : vector<8x128xf32>
    %338 = arith.index_cast %c1_i32_78 : i32 to index
    %c0_84 = arith.constant 0 : index
    %c0_85 = arith.constant 0 : index
    %339 = vector.load %arg11[%338, %c0_84, %c0_85] : memref<8x8x128xf32, #tpu.memory_space<vmem>>, vector<1x8x128xf32>
    %340 = vector.shape_cast %339 : vector<1x8x128xf32> to vector<8x128xf32>
    %341 = vector.shape_cast %337 : vector<8x128xf32> to vector<1x8x128xf32>
    tpu.vector_store %arg11[%338, %c0_84, %c0_85], %341 {strides = array<i32>} : memref<8x8x128xf32, #tpu.memory_space<vmem>>, vector<1x8x128xf32>,
    %c2_i32_86 = arith.constant 2 : i32
    %342 = tpu.concatenate %337, %334 in 1 : vector<8x128xf32>, vector<8x128xf32> -> vector<8x256xf32>
    %343 = arith.truncf %342 : vector<8x256xf32> to vector<8x256xbf16>
    %cst_87 = arith.constant dense<0.000000e+00> : vector<8x512xf32>
    %344 = tpu.matmul %343, %2, %cst_87 {dimension_numbers = #tpu.dot_dimension_numbers<[1], [0], [0], [1], [0, 0, 1, 1], [], []>} : vector<8x256xbf16>, vector<256x512xbf16>, vector<8x512xf32> -> vector<8x512xf32>
    %345 = arith.addf %344, %7 : vector<8x512xf32>
    %346 = vector.extract_strided_slice %345 {offsets = [0, 0], sizes = [8, 128], strides = [1, 1]} : vector<8x512xf32> to vector<8x128xf32>
    %347 = arith.negf %346 : vector<8x128xf32>
    %348 = math.exp %347 : vector<8x128xf32>
    %cst_88 = arith.constant 1.000000e+00 : f32
    %349 = vector.broadcast %cst_88 : f32 to vector<8x128xf32>
    %350 = arith.addf %349, %348 : vector<8x128xf32>
    %351 = arith.divf %349, %350 : vector<8x128xf32>
    %352 = vector.extract_strided_slice %345 {offsets = [0, 128], sizes = [8, 128], strides = [1, 1]} : vector<8x512xf32> to vector<8x128xf32>
    %353 = arith.negf %352 : vector<8x128xf32>
    %354 = math.exp %353 : vector<8x128xf32>
    %cst_89 = arith.constant 1.000000e+00 : f32
    %355 = vector.broadcast %cst_89 : f32 to vector<8x128xf32>
    %356 = arith.addf %355, %354 : vector<8x128xf32>
    %357 = arith.divf %355, %356 : vector<8x128xf32>
    %358 = vector.extract_strided_slice %345 {offsets = [0, 256], sizes = [8, 128], strides = [1, 1]} : vector<8x512xf32> to vector<8x128xf32>
    %359 = math.tanh %358 : vector<8x128xf32>
    %360 = vector.extract_strided_slice %345 {offsets = [0, 384], sizes = [8, 128], strides = [1, 1]} : vector<8x512xf32> to vector<8x128xf32>
    %361 = arith.negf %360 : vector<8x128xf32>
    %362 = math.exp %361 : vector<8x128xf32>
    %cst_90 = arith.constant 1.000000e+00 : f32
    %363 = vector.broadcast %cst_90 : f32 to vector<8x128xf32>
    %364 = arith.addf %363, %362 : vector<8x128xf32>
    %365 = arith.divf %363, %364 : vector<8x128xf32>
    %366 = arith.mulf %357, %332 : vector<8x128xf32>
    %367 = arith.mulf %351, %359 : vector<8x128xf32>
    %368 = arith.addf %366, %367 : vector<8x128xf32>
    %369 = math.tanh %368 : vector<8x128xf32>
    %370 = arith.mulf %365, %369 : vector<8x128xf32>
    %371 = arith.truncf %370 : vector<8x128xf32> to vector<8x128xbf16>
    %cst_91 = arith.constant dense<0.000000e+00> : vector<8x128xf32>
    %372 = tpu.matmul %371, %3, %cst_91 {dimension_numbers = #tpu.dot_dimension_numbers<[1], [0], [0], [1], [0, 0, 1, 1], [], []>} : vector<8x128xbf16>, vector<128x128xbf16>, vector<8x128xf32> -> vector<8x128xf32>
    %373 = arith.addf %372, %10 : vector<8x128xf32>
    %374 = arith.index_cast %c2_i32_86 : i32 to index
    %c0_92 = arith.constant 0 : index
    %c0_93 = arith.constant 0 : index
    %375 = vector.load %arg11[%374, %c0_92, %c0_93] : memref<8x8x128xf32, #tpu.memory_space<vmem>>, vector<1x8x128xf32>
    %376 = vector.shape_cast %375 : vector<1x8x128xf32> to vector<8x128xf32>
    %377 = vector.shape_cast %373 : vector<8x128xf32> to vector<1x8x128xf32>
    tpu.vector_store %arg11[%374, %c0_92, %c0_93], %377 {strides = array<i32>} : memref<8x8x128xf32, #tpu.memory_space<vmem>>, vector<1x8x128xf32>,
    %c3_i32_94 = arith.constant 3 : i32
    %378 = tpu.concatenate %373, %370 in 1 : vector<8x128xf32>, vector<8x128xf32> -> vector<8x256xf32>
    %379 = arith.truncf %378 : vector<8x256xf32> to vector<8x256xbf16>
    %cst_95 = arith.constant dense<0.000000e+00> : vector<8x512xf32>
    %380 = tpu.matmul %379, %2, %cst_95 {dimension_numbers = #tpu.dot_dimension_numbers<[1], [0], [0], [1], [0, 0, 1, 1], [], []>} : vector<8x256xbf16>, vector<256x512xbf16>, vector<8x512xf32> -> vector<8x512xf32>
    %381 = arith.addf %380, %7 : vector<8x512xf32>
    %382 = vector.extract_strided_slice %381 {offsets = [0, 0], sizes = [8, 128], strides = [1, 1]} : vector<8x512xf32> to vector<8x128xf32>
    %383 = arith.negf %382 : vector<8x128xf32>
    %384 = math.exp %383 : vector<8x128xf32>
    %cst_96 = arith.constant 1.000000e+00 : f32
    %385 = vector.broadcast %cst_96 : f32 to vector<8x128xf32>
    %386 = arith.addf %385, %384 : vector<8x128xf32>
    %387 = arith.divf %385, %386 : vector<8x128xf32>
    %388 = vector.extract_strided_slice %381 {offsets = [0, 128], sizes = [8, 128], strides = [1, 1]} : vector<8x512xf32> to vector<8x128xf32>
    %389 = arith.negf %388 : vector<8x128xf32>
    %390 = math.exp %389 : vector<8x128xf32>
    %cst_97 = arith.constant 1.000000e+00 : f32
    %391 = vector.broadcast %cst_97 : f32 to vector<8x128xf32>
    %392 = arith.addf %391, %390 : vector<8x128xf32>
    %393 = arith.divf %391, %392 : vector<8x128xf32>
    %394 = vector.extract_strided_slice %381 {offsets = [0, 256], sizes = [8, 128], strides = [1, 1]} : vector<8x512xf32> to vector<8x128xf32>
    %395 = math.tanh %394 : vector<8x128xf32>
    %396 = vector.extract_strided_slice %381 {offsets = [0, 384], sizes = [8, 128], strides = [1, 1]} : vector<8x512xf32> to vector<8x128xf32>
    %397 = arith.negf %396 : vector<8x128xf32>
    %398 = math.exp %397 : vector<8x128xf32>
    %cst_98 = arith.constant 1.000000e+00 : f32
    %399 = vector.broadcast %cst_98 : f32 to vector<8x128xf32>
    %400 = arith.addf %399, %398 : vector<8x128xf32>
    %401 = arith.divf %399, %400 : vector<8x128xf32>
    %402 = arith.mulf %393, %368 : vector<8x128xf32>
    %403 = arith.mulf %387, %395 : vector<8x128xf32>
    %404 = arith.addf %402, %403 : vector<8x128xf32>
    %405 = math.tanh %404 : vector<8x128xf32>
    %406 = arith.mulf %401, %405 : vector<8x128xf32>
    %407 = arith.truncf %406 : vector<8x128xf32> to vector<8x128xbf16>
    %cst_99 = arith.constant dense<0.000000e+00> : vector<8x128xf32>
    %408 = tpu.matmul %407, %3, %cst_99 {dimension_numbers = #tpu.dot_dimension_numbers<[1], [0], [0], [1], [0, 0, 1, 1], [], []>} : vector<8x128xbf16>, vector<128x128xbf16>, vector<8x128xf32> -> vector<8x128xf32>
    %409 = arith.addf %408, %10 : vector<8x128xf32>
    %410 = arith.index_cast %c3_i32_94 : i32 to index
    %c0_100 = arith.constant 0 : index
    %c0_101 = arith.constant 0 : index
    %411 = vector.load %arg11[%410, %c0_100, %c0_101] : memref<8x8x128xf32, #tpu.memory_space<vmem>>, vector<1x8x128xf32>
    %412 = vector.shape_cast %411 : vector<1x8x128xf32> to vector<8x128xf32>
    %413 = vector.shape_cast %409 : vector<8x128xf32> to vector<1x8x128xf32>
    tpu.vector_store %arg11[%410, %c0_100, %c0_101], %413 {strides = array<i32>} : memref<8x8x128xf32, #tpu.memory_space<vmem>>, vector<1x8x128xf32>,
    %c4_i32_102 = arith.constant 4 : i32
    %414 = tpu.concatenate %409, %406 in 1 : vector<8x128xf32>, vector<8x128xf32> -> vector<8x256xf32>
    %415 = arith.truncf %414 : vector<8x256xf32> to vector<8x256xbf16>
    %cst_103 = arith.constant dense<0.000000e+00> : vector<8x512xf32>
    %416 = tpu.matmul %415, %2, %cst_103 {dimension_numbers = #tpu.dot_dimension_numbers<[1], [0], [0], [1], [0, 0, 1, 1], [], []>} : vector<8x256xbf16>, vector<256x512xbf16>, vector<8x512xf32> -> vector<8x512xf32>
    %417 = arith.addf %416, %7 : vector<8x512xf32>
    %418 = vector.extract_strided_slice %417 {offsets = [0, 0], sizes = [8, 128], strides = [1, 1]} : vector<8x512xf32> to vector<8x128xf32>
    %419 = arith.negf %418 : vector<8x128xf32>
    %420 = math.exp %419 : vector<8x128xf32>
    %cst_104 = arith.constant 1.000000e+00 : f32
    %421 = vector.broadcast %cst_104 : f32 to vector<8x128xf32>
    %422 = arith.addf %421, %420 : vector<8x128xf32>
    %423 = arith.divf %421, %422 : vector<8x128xf32>
    %424 = vector.extract_strided_slice %417 {offsets = [0, 128], sizes = [8, 128], strides = [1, 1]} : vector<8x512xf32> to vector<8x128xf32>
    %425 = arith.negf %424 : vector<8x128xf32>
    %426 = math.exp %425 : vector<8x128xf32>
    %cst_105 = arith.constant 1.000000e+00 : f32
    %427 = vector.broadcast %cst_105 : f32 to vector<8x128xf32>
    %428 = arith.addf %427, %426 : vector<8x128xf32>
    %429 = arith.divf %427, %428 : vector<8x128xf32>
    %430 = vector.extract_strided_slice %417 {offsets = [0, 256], sizes = [8, 128], strides = [1, 1]} : vector<8x512xf32> to vector<8x128xf32>
    %431 = math.tanh %430 : vector<8x128xf32>
    %432 = vector.extract_strided_slice %417 {offsets = [0, 384], sizes = [8, 128], strides = [1, 1]} : vector<8x512xf32> to vector<8x128xf32>
    %433 = arith.negf %432 : vector<8x128xf32>
    %434 = math.exp %433 : vector<8x128xf32>
    %cst_106 = arith.constant 1.000000e+00 : f32
    %435 = vector.broadcast %cst_106 : f32 to vector<8x128xf32>
    %436 = arith.addf %435, %434 : vector<8x128xf32>
    %437 = arith.divf %435, %436 : vector<8x128xf32>
    %438 = arith.mulf %429, %404 : vector<8x128xf32>
    %439 = arith.mulf %423, %431 : vector<8x128xf32>
    %440 = arith.addf %438, %439 : vector<8x128xf32>
    %441 = math.tanh %440 : vector<8x128xf32>
    %442 = arith.mulf %437, %441 : vector<8x128xf32>
    %443 = arith.truncf %442 : vector<8x128xf32> to vector<8x128xbf16>
    %cst_107 = arith.constant dense<0.000000e+00> : vector<8x128xf32>
    %444 = tpu.matmul %443, %3, %cst_107 {dimension_numbers = #tpu.dot_dimension_numbers<[1], [0], [0], [1], [0, 0, 1, 1], [], []>} : vector<8x128xbf16>, vector<128x128xbf16>, vector<8x128xf32> -> vector<8x128xf32>
    %445 = arith.addf %444, %10 : vector<8x128xf32>
    %446 = arith.index_cast %c4_i32_102 : i32 to index
    %c0_108 = arith.constant 0 : index
    %c0_109 = arith.constant 0 : index
    %447 = vector.load %arg11[%446, %c0_108, %c0_109] : memref<8x8x128xf32, #tpu.memory_space<vmem>>, vector<1x8x128xf32>
    %448 = vector.shape_cast %447 : vector<1x8x128xf32> to vector<8x128xf32>
    %449 = vector.shape_cast %445 : vector<8x128xf32> to vector<1x8x128xf32>
    tpu.vector_store %arg11[%446, %c0_108, %c0_109], %449 {strides = array<i32>} : memref<8x8x128xf32, #tpu.memory_space<vmem>>, vector<1x8x128xf32>,
    %c5_i32_110 = arith.constant 5 : i32
    %450 = tpu.concatenate %445, %442 in 1 : vector<8x128xf32>, vector<8x128xf32> -> vector<8x256xf32>
    %451 = arith.truncf %450 : vector<8x256xf32> to vector<8x256xbf16>
    %cst_111 = arith.constant dense<0.000000e+00> : vector<8x512xf32>
    %452 = tpu.matmul %451, %2, %cst_111 {dimension_numbers = #tpu.dot_dimension_numbers<[1], [0], [0], [1], [0, 0, 1, 1], [], []>} : vector<8x256xbf16>, vector<256x512xbf16>, vector<8x512xf32> -> vector<8x512xf32>
    %453 = arith.addf %452, %7 : vector<8x512xf32>
    %454 = vector.extract_strided_slice %453 {offsets = [0, 0], sizes = [8, 128], strides = [1, 1]} : vector<8x512xf32> to vector<8x128xf32>
    %455 = arith.negf %454 : vector<8x128xf32>
    %456 = math.exp %455 : vector<8x128xf32>
    %cst_112 = arith.constant 1.000000e+00 : f32
    %457 = vector.broadcast %cst_112 : f32 to vector<8x128xf32>
    %458 = arith.addf %457, %456 : vector<8x128xf32>
    %459 = arith.divf %457, %458 : vector<8x128xf32>
    %460 = vector.extract_strided_slice %453 {offsets = [0, 128], sizes = [8, 128], strides = [1, 1]} : vector<8x512xf32> to vector<8x128xf32>
    %461 = arith.negf %460 : vector<8x128xf32>
    %462 = math.exp %461 : vector<8x128xf32>
    %cst_113 = arith.constant 1.000000e+00 : f32
    %463 = vector.broadcast %cst_113 : f32 to vector<8x128xf32>
    %464 = arith.addf %463, %462 : vector<8x128xf32>
    %465 = arith.divf %463, %464 : vector<8x128xf32>
    %466 = vector.extract_strided_slice %453 {offsets = [0, 256], sizes = [8, 128], strides = [1, 1]} : vector<8x512xf32> to vector<8x128xf32>
    %467 = math.tanh %466 : vector<8x128xf32>
    %468 = vector.extract_strided_slice %453 {offsets = [0, 384], sizes = [8, 128], strides = [1, 1]} : vector<8x512xf32> to vector<8x128xf32>
    %469 = arith.negf %468 : vector<8x128xf32>
    %470 = math.exp %469 : vector<8x128xf32>
    %cst_114 = arith.constant 1.000000e+00 : f32
    %471 = vector.broadcast %cst_114 : f32 to vector<8x128xf32>
    %472 = arith.addf %471, %470 : vector<8x128xf32>
    %473 = arith.divf %471, %472 : vector<8x128xf32>
    %474 = arith.mulf %465, %440 : vector<8x128xf32>
    %475 = arith.mulf %459, %467 : vector<8x128xf32>
    %476 = arith.addf %474, %475 : vector<8x128xf32>
    %477 = math.tanh %476 : vector<8x128xf32>
    %478 = arith.mulf %473, %477 : vector<8x128xf32>
    %479 = arith.truncf %478 : vector<8x128xf32> to vector<8x128xbf16>
    %cst_115 = arith.constant dense<0.000000e+00> : vector<8x128xf32>
    %480 = tpu.matmul %479, %3, %cst_115 {dimension_numbers = #tpu.dot_dimension_numbers<[1], [0], [0], [1], [0, 0, 1, 1], [], []>} : vector<8x128xbf16>, vector<128x128xbf16>, vector<8x128xf32> -> vector<8x128xf32>
    %481 = arith.addf %480, %10 : vector<8x128xf32>
    %482 = arith.index_cast %c5_i32_110 : i32 to index
    %c0_116 = arith.constant 0 : index
    %c0_117 = arith.constant 0 : index
    %483 = vector.load %arg11[%482, %c0_116, %c0_117] : memref<8x8x128xf32, #tpu.memory_space<vmem>>, vector<1x8x128xf32>
    %484 = vector.shape_cast %483 : vector<1x8x128xf32> to vector<8x128xf32>
    %485 = vector.shape_cast %481 : vector<8x128xf32> to vector<1x8x128xf32>
    tpu.vector_store %arg11[%482, %c0_116, %c0_117], %485 {strides = array<i32>} : memref<8x8x128xf32, #tpu.memory_space<vmem>>, vector<1x8x128xf32>,
    %c6_i32_118 = arith.constant 6 : i32
    %486 = tpu.concatenate %481, %478 in 1 : vector<8x128xf32>, vector<8x128xf32> -> vector<8x256xf32>
    %487 = arith.truncf %486 : vector<8x256xf32> to vector<8x256xbf16>
    %cst_119 = arith.constant dense<0.000000e+00> : vector<8x512xf32>
    %488 = tpu.matmul %487, %2, %cst_119 {dimension_numbers = #tpu.dot_dimension_numbers<[1], [0], [0], [1], [0, 0, 1, 1], [], []>} : vector<8x256xbf16>, vector<256x512xbf16>, vector<8x512xf32> -> vector<8x512xf32>
    %489 = arith.addf %488, %7 : vector<8x512xf32>
    %490 = vector.extract_strided_slice %489 {offsets = [0, 0], sizes = [8, 128], strides = [1, 1]} : vector<8x512xf32> to vector<8x128xf32>
    %491 = arith.negf %490 : vector<8x128xf32>
    %492 = math.exp %491 : vector<8x128xf32>
    %cst_120 = arith.constant 1.000000e+00 : f32
    %493 = vector.broadcast %cst_120 : f32 to vector<8x128xf32>
    %494 = arith.addf %493, %492 : vector<8x128xf32>
    %495 = arith.divf %493, %494 : vector<8x128xf32>
    %496 = vector.extract_strided_slice %489 {offsets = [0, 128], sizes = [8, 128], strides = [1, 1]} : vector<8x512xf32> to vector<8x128xf32>
    %497 = arith.negf %496 : vector<8x128xf32>
    %498 = math.exp %497 : vector<8x128xf32>
    %cst_121 = arith.constant 1.000000e+00 : f32
    %499 = vector.broadcast %cst_121 : f32 to vector<8x128xf32>
    %500 = arith.addf %499, %498 : vector<8x128xf32>
    %501 = arith.divf %499, %500 : vector<8x128xf32>
    %502 = vector.extract_strided_slice %489 {offsets = [0, 256], sizes = [8, 128], strides = [1, 1]} : vector<8x512xf32> to vector<8x128xf32>
    %503 = math.tanh %502 : vector<8x128xf32>
    %504 = vector.extract_strided_slice %489 {offsets = [0, 384], sizes = [8, 128], strides = [1, 1]} : vector<8x512xf32> to vector<8x128xf32>
    %505 = arith.negf %504 : vector<8x128xf32>
    %506 = math.exp %505 : vector<8x128xf32>
    %cst_122 = arith.constant 1.000000e+00 : f32
    %507 = vector.broadcast %cst_122 : f32 to vector<8x128xf32>
    %508 = arith.addf %507, %506 : vector<8x128xf32>
    %509 = arith.divf %507, %508 : vector<8x128xf32>
    %510 = arith.mulf %501, %476 : vector<8x128xf32>
    %511 = arith.mulf %495, %503 : vector<8x128xf32>
    %512 = arith.addf %510, %511 : vector<8x128xf32>
    %513 = math.tanh %512 : vector<8x128xf32>
    %514 = arith.mulf %509, %513 : vector<8x128xf32>
    %515 = arith.truncf %514 : vector<8x128xf32> to vector<8x128xbf16>
    %cst_123 = arith.constant dense<0.000000e+00> : vector<8x128xf32>
    %516 = tpu.matmul %515, %3, %cst_123 {dimension_numbers = #tpu.dot_dimension_numbers<[1], [0], [0], [1], [0, 0, 1, 1], [], []>} : vector<8x128xbf16>, vector<128x128xbf16>, vector<8x128xf32> -> vector<8x128xf32>
    %517 = arith.addf %516, %10 : vector<8x128xf32>
    %518 = arith.index_cast %c6_i32_118 : i32 to index
    %c0_124 = arith.constant 0 : index
    %c0_125 = arith.constant 0 : index
    %519 = vector.load %arg11[%518, %c0_124, %c0_125] : memref<8x8x128xf32, #tpu.memory_space<vmem>>, vector<1x8x128xf32>
    %520 = vector.shape_cast %519 : vector<1x8x128xf32> to vector<8x128xf32>
    %521 = vector.shape_cast %517 : vector<8x128xf32> to vector<1x8x128xf32>
    tpu.vector_store %arg11[%518, %c0_124, %c0_125], %521 {strides = array<i32>} : memref<8x8x128xf32, #tpu.memory_space<vmem>>, vector<1x8x128xf32>,
    %c7_i32_126 = arith.constant 7 : i32
    %522 = tpu.concatenate %517, %514 in 1 : vector<8x128xf32>, vector<8x128xf32> -> vector<8x256xf32>
    %523 = arith.truncf %522 : vector<8x256xf32> to vector<8x256xbf16>
    %cst_127 = arith.constant dense<0.000000e+00> : vector<8x512xf32>
    %524 = tpu.matmul %523, %2, %cst_127 {dimension_numbers = #tpu.dot_dimension_numbers<[1], [0], [0], [1], [0, 0, 1, 1], [], []>} : vector<8x256xbf16>, vector<256x512xbf16>, vector<8x512xf32> -> vector<8x512xf32>
    %525 = arith.addf %524, %7 : vector<8x512xf32>
    %526 = vector.extract_strided_slice %525 {offsets = [0, 0], sizes = [8, 128], strides = [1, 1]} : vector<8x512xf32> to vector<8x128xf32>
    %527 = arith.negf %526 : vector<8x128xf32>
    %528 = math.exp %527 : vector<8x128xf32>
    %cst_128 = arith.constant 1.000000e+00 : f32
    %529 = vector.broadcast %cst_128 : f32 to vector<8x128xf32>
    %530 = arith.addf %529, %528 : vector<8x128xf32>
    %531 = arith.divf %529, %530 : vector<8x128xf32>
    %532 = vector.extract_strided_slice %525 {offsets = [0, 128], sizes = [8, 128], strides = [1, 1]} : vector<8x512xf32> to vector<8x128xf32>
    %533 = arith.negf %532 : vector<8x128xf32>
    %534 = math.exp %533 : vector<8x128xf32>
    %cst_129 = arith.constant 1.000000e+00 : f32
    %535 = vector.broadcast %cst_129 : f32 to vector<8x128xf32>
    %536 = arith.addf %535, %534 : vector<8x128xf32>
    %537 = arith.divf %535, %536 : vector<8x128xf32>
    %538 = vector.extract_strided_slice %525 {offsets = [0, 256], sizes = [8, 128], strides = [1, 1]} : vector<8x512xf32> to vector<8x128xf32>
    %539 = math.tanh %538 : vector<8x128xf32>
    %540 = vector.extract_strided_slice %525 {offsets = [0, 384], sizes = [8, 128], strides = [1, 1]} : vector<8x512xf32> to vector<8x128xf32>
    %541 = arith.negf %540 : vector<8x128xf32>
    %542 = math.exp %541 : vector<8x128xf32>
    %cst_130 = arith.constant 1.000000e+00 : f32
    %543 = vector.broadcast %cst_130 : f32 to vector<8x128xf32>
    %544 = arith.addf %543, %542 : vector<8x128xf32>
    %545 = arith.divf %543, %544 : vector<8x128xf32>
    %546 = arith.mulf %537, %512 : vector<8x128xf32>
    %547 = arith.mulf %531, %539 : vector<8x128xf32>
    %548 = arith.addf %546, %547 : vector<8x128xf32>
    %549 = math.tanh %548 : vector<8x128xf32>
    %550 = arith.mulf %545, %549 : vector<8x128xf32>
    %551 = arith.truncf %550 : vector<8x128xf32> to vector<8x128xbf16>
    %cst_131 = arith.constant dense<0.000000e+00> : vector<8x128xf32>
    %552 = tpu.matmul %551, %3, %cst_131 {dimension_numbers = #tpu.dot_dimension_numbers<[1], [0], [0], [1], [0, 0, 1, 1], [], []>} : vector<8x128xbf16>, vector<128x128xbf16>, vector<8x128xf32> -> vector<8x128xf32>
    %553 = arith.addf %552, %10 : vector<8x128xf32>
    %554 = arith.index_cast %c7_i32_126 : i32 to index
    %c0_132 = arith.constant 0 : index
    %c0_133 = arith.constant 0 : index
    %555 = vector.load %arg11[%554, %c0_132, %c0_133] : memref<8x8x128xf32, #tpu.memory_space<vmem>>, vector<1x8x128xf32>
    %556 = vector.shape_cast %555 : vector<1x8x128xf32> to vector<8x128xf32>
    %557 = vector.shape_cast %553 : vector<8x128xf32> to vector<1x8x128xf32>
    tpu.vector_store %arg11[%554, %c0_132, %c0_133], %557 {strides = array<i32>} : memref<8x8x128xf32, #tpu.memory_space<vmem>>, vector<1x8x128xf32>,
    %c8_i32_134 = arith.constant 8 : i32
    %c0_135 = arith.constant 0 : index
    %c0_136 = arith.constant 0 : index
    %c0_137 = arith.constant 0 : index
    %558 = vector.load %arg11[%c0_135, %c0_136, %c0_137] : memref<8x8x128xf32, #tpu.memory_space<vmem>>, vector<8x1x128xf32>
    %559 = vector.shape_cast %558 : vector<8x1x128xf32> to vector<8x128xf32>
    %c0_138 = arith.constant 0 : index
    %c0_139 = arith.constant 0 : index
    %c0_140 = arith.constant 0 : index
    %560 = vector.load %arg9[%c0_138, %c0_139, %c0_140] : memref<8x8x128xf32, #tpu.memory_space<vmem>>, vector<1x8x128xf32>
    %561 = vector.shape_cast %560 : vector<1x8x128xf32> to vector<8x128xf32>
    %562 = vector.shape_cast %559 : vector<8x128xf32> to vector<1x8x128xf32>
    tpu.vector_store %arg9[%c0_138, %c0_139, %c0_140], %562 {strides = array<i32>} : memref<8x8x128xf32, #tpu.memory_space<vmem>>, vector<1x8x128xf32>,
    %c0_141 = arith.constant 0 : index
    %c1 = arith.constant 1 : index
    %c0_142 = arith.constant 0 : index
    %563 = vector.load %arg11[%c0_141, %c1, %c0_142] : memref<8x8x128xf32, #tpu.memory_space<vmem>>, vector<8x1x128xf32>
    %564 = vector.shape_cast %563 : vector<8x1x128xf32> to vector<8x128xf32>
    %c1_143 = arith.constant 1 : index
    %c0_144 = arith.constant 0 : index
    %c0_145 = arith.constant 0 : index
    %565 = vector.load %arg9[%c1_143, %c0_144, %c0_145] : memref<8x8x128xf32, #tpu.memory_space<vmem>>, vector<1x8x128xf32>
    %566 = vector.shape_cast %565 : vector<1x8x128xf32> to vector<8x128xf32>
    %567 = vector.shape_cast %564 : vector<8x128xf32> to vector<1x8x128xf32>
    tpu.vector_store %arg9[%c1_143, %c0_144, %c0_145], %567 {strides = array<i32>} : memref<8x8x128xf32, #tpu.memory_space<vmem>>, vector<1x8x128xf32>,
    %c0_146 = arith.constant 0 : index
    %c2 = arith.constant 2 : index
    %c0_147 = arith.constant 0 : index
    %568 = vector.load %arg11[%c0_146, %c2, %c0_147] : memref<8x8x128xf32, #tpu.memory_space<vmem>>, vector<8x1x128xf32>
    %569 = vector.shape_cast %568 : vector<8x1x128xf32> to vector<8x128xf32>
    %c2_148 = arith.constant 2 : index
    %c0_149 = arith.constant 0 : index
    %c0_150 = arith.constant 0 : index
    %570 = vector.load %arg9[%c2_148, %c0_149, %c0_150] : memref<8x8x128xf32, #tpu.memory_space<vmem>>, vector<1x8x128xf32>
    %571 = vector.shape_cast %570 : vector<1x8x128xf32> to vector<8x128xf32>
    %572 = vector.shape_cast %569 : vector<8x128xf32> to vector<1x8x128xf32>
    tpu.vector_store %arg9[%c2_148, %c0_149, %c0_150], %572 {strides = array<i32>} : memref<8x8x128xf32, #tpu.memory_space<vmem>>, vector<1x8x128xf32>,
    %c0_151 = arith.constant 0 : index
    %c3 = arith.constant 3 : index
    %c0_152 = arith.constant 0 : index
    %573 = vector.load %arg11[%c0_151, %c3, %c0_152] : memref<8x8x128xf32, #tpu.memory_space<vmem>>, vector<8x1x128xf32>
    %574 = vector.shape_cast %573 : vector<8x1x128xf32> to vector<8x128xf32>
    %c3_153 = arith.constant 3 : index
    %c0_154 = arith.constant 0 : index
    %c0_155 = arith.constant 0 : index
    %575 = vector.load %arg9[%c3_153, %c0_154, %c0_155] : memref<8x8x128xf32, #tpu.memory_space<vmem>>, vector<1x8x128xf32>
    %576 = vector.shape_cast %575 : vector<1x8x128xf32> to vector<8x128xf32>
    %577 = vector.shape_cast %574 : vector<8x128xf32> to vector<1x8x128xf32>
    tpu.vector_store %arg9[%c3_153, %c0_154, %c0_155], %577 {strides = array<i32>} : memref<8x8x128xf32, #tpu.memory_space<vmem>>, vector<1x8x128xf32>,
    %c0_156 = arith.constant 0 : index
    %c4 = arith.constant 4 : index
    %c0_157 = arith.constant 0 : index
    %578 = vector.load %arg11[%c0_156, %c4, %c0_157] : memref<8x8x128xf32, #tpu.memory_space<vmem>>, vector<8x1x128xf32>
    %579 = vector.shape_cast %578 : vector<8x1x128xf32> to vector<8x128xf32>
    %c4_158 = arith.constant 4 : index
    %c0_159 = arith.constant 0 : index
    %c0_160 = arith.constant 0 : index
    %580 = vector.load %arg9[%c4_158, %c0_159, %c0_160] : memref<8x8x128xf32, #tpu.memory_space<vmem>>, vector<1x8x128xf32>
    %581 = vector.shape_cast %580 : vector<1x8x128xf32> to vector<8x128xf32>
    %582 = vector.shape_cast %579 : vector<8x128xf32> to vector<1x8x128xf32>
    tpu.vector_store %arg9[%c4_158, %c0_159, %c0_160], %582 {strides = array<i32>} : memref<8x8x128xf32, #tpu.memory_space<vmem>>, vector<1x8x128xf32>,
    %c0_161 = arith.constant 0 : index
    %c5 = arith.constant 5 : index
    %c0_162 = arith.constant 0 : index
    %583 = vector.load %arg11[%c0_161, %c5, %c0_162] : memref<8x8x128xf32, #tpu.memory_space<vmem>>, vector<8x1x128xf32>
    %584 = vector.shape_cast %583 : vector<8x1x128xf32> to vector<8x128xf32>
    %c5_163 = arith.constant 5 : index
    %c0_164 = arith.constant 0 : index
    %c0_165 = arith.constant 0 : index
    %585 = vector.load %arg9[%c5_163, %c0_164, %c0_165] : memref<8x8x128xf32, #tpu.memory_space<vmem>>, vector<1x8x128xf32>
    %586 = vector.shape_cast %585 : vector<1x8x128xf32> to vector<8x128xf32>
    %587 = vector.shape_cast %584 : vector<8x128xf32> to vector<1x8x128xf32>
    tpu.vector_store %arg9[%c5_163, %c0_164, %c0_165], %587 {strides = array<i32>} : memref<8x8x128xf32, #tpu.memory_space<vmem>>, vector<1x8x128xf32>,
    %c0_166 = arith.constant 0 : index
    %c6 = arith.constant 6 : index
    %c0_167 = arith.constant 0 : index
    %588 = vector.load %arg11[%c0_166, %c6, %c0_167] : memref<8x8x128xf32, #tpu.memory_space<vmem>>, vector<8x1x128xf32>
    %589 = vector.shape_cast %588 : vector<8x1x128xf32> to vector<8x128xf32>
    %c6_168 = arith.constant 6 : index
    %c0_169 = arith.constant 0 : index
    %c0_170 = arith.constant 0 : index
    %590 = vector.load %arg9[%c6_168, %c0_169, %c0_170] : memref<8x8x128xf32, #tpu.memory_space<vmem>>, vector<1x8x128xf32>
    %591 = vector.shape_cast %590 : vector<1x8x128xf32> to vector<8x128xf32>
    %592 = vector.shape_cast %589 : vector<8x128xf32> to vector<1x8x128xf32>
    tpu.vector_store %arg9[%c6_168, %c0_169, %c0_170], %592 {strides = array<i32>} : memref<8x8x128xf32, #tpu.memory_space<vmem>>, vector<1x8x128xf32>,
    %c0_171 = arith.constant 0 : index
    %c7 = arith.constant 7 : index
    %c0_172 = arith.constant 0 : index
    %593 = vector.load %arg11[%c0_171, %c7, %c0_172] : memref<8x8x128xf32, #tpu.memory_space<vmem>>, vector<8x1x128xf32>
    %594 = vector.shape_cast %593 : vector<8x1x128xf32> to vector<8x128xf32>
    %c7_173 = arith.constant 7 : index
    %c0_174 = arith.constant 0 : index
    %c0_175 = arith.constant 0 : index
    %595 = vector.load %arg9[%c7_173, %c0_174, %c0_175] : memref<8x8x128xf32, #tpu.memory_space<vmem>>, vector<1x8x128xf32>
    %596 = vector.shape_cast %595 : vector<1x8x128xf32> to vector<8x128xf32>
    %597 = vector.shape_cast %594 : vector<8x128xf32> to vector<1x8x128xf32>
    tpu.vector_store %arg9[%c7_173, %c0_174, %c0_175], %597 {strides = array<i32>} : memref<8x8x128xf32, #tpu.memory_space<vmem>>, vector<1x8x128xf32>,
    return
  }
  func.func @transform_0(%arg0: i32) -> (i32, i32, i32) {
    %c0_i32 = arith.constant 0 : i32
    %c0_i32_0 = arith.constant 0 : i32
    %c0_i32_1 = arith.constant 0 : i32
    return %c0_i32, %arg0, %c0_i32_0 : i32, i32, i32
  }
  func.func @transform_1(%arg0: i32) -> (i32, i32) {
    %c0_i32 = arith.constant 0 : i32
    %c0_i32_0 = arith.constant 0 : i32
    %c0_i32_1 = arith.constant 0 : i32
    return %c0_i32, %c0_i32_0 : i32, i32
  }
  func.func @transform_2(%arg0: i32) -> (i32, i32) {
    %c0_i32 = arith.constant 0 : i32
    %c0_i32_0 = arith.constant 0 : i32
    %c0_i32_1 = arith.constant 0 : i32
    return %c0_i32, %c0_i32_0 : i32, i32
  }
  func.func @transform_3(%arg0: i32) -> (i32, i32) {
    %c0_i32 = arith.constant 0 : i32
    %c0_i32_0 = arith.constant 0 : i32
    %c0_i32_1 = arith.constant 0 : i32
    return %c0_i32, %c0_i32_0 : i32, i32
  }
  func.func @transform_4(%arg0: i32) -> (i32, i32) {
    %c0_i32 = arith.constant 0 : i32
    %c0_i32_0 = arith.constant 0 : i32
    %c0_i32_1 = arith.constant 0 : i32
    return %c0_i32, %c0_i32_0 : i32, i32
  }
  func.func @transform_5(%arg0: i32) -> (i32, i32) {
    %c0_i32 = arith.constant 0 : i32
    %c0_i32_0 = arith.constant 0 : i32
    %c0_i32_1 = arith.constant 0 : i32
    return %c0_i32, %c0_i32_0 : i32, i32
  }
  func.func @transform_6(%arg0: i32) -> (i32, i32) {
    %c0_i32 = arith.constant 0 : i32
    %c0_i32_0 = arith.constant 0 : i32
    %c0_i32_1 = arith.constant 0 : i32
    return %c0_i32, %c0_i32_0 : i32, i32
  }
  func.func @transform_7(%arg0: i32) -> (i32, i32) {
    %c0_i32 = arith.constant 0 : i32
    %c0_i32_0 = arith.constant 0 : i32
    %c0_i32_1 = arith.constant 0 : i32
    return %c0_i32, %c0_i32_0 : i32, i32
  }
  func.func @transform_8(%arg0: i32) -> (i32, i32, i32) {
    %c0_i32 = arith.constant 0 : i32
    %c0_i32_0 = arith.constant 0 : i32
    %c0_i32_1 = arith.constant 0 : i32
    return %arg0, %c0_i32, %c0_i32_0 : i32, i32, i32
  }
}

</mosaic_0001>

<bundles_post_ra>
// kernel: rnnae_forward.1
= control target key start
LH: loop header
LB: loop body
LE: loop exit
PB: predicated region body
PF: predicated region fallthrough
CT: control target
= control target key end

     0   :  { %vm198_vm0 = vcmask 1041408   ;;  %vm185_vm1 = vcmask 31744   ;;  %s6714_s1 = inlined_call_operand.vmem [shape: bf16[4,512], index: 1, kind: input, shape index: {}]   ;;  %s6715_s0 = inlined_call_operand.vmem [shape: f32[8,8,4], index: 0, kind: input, shape index: {}]   ;;  %s6716_s2 = inlined_call_operand.vmem [shape: bf16[128,512], index: 2, kind: input, shape index: {}]   ;;  %s6717_s3 = inlined_call_operand.vmem [shape: f32[1,512], index: 3, kind: input, shape index: {}]   ;;  %s6718_s4 = inlined_call_operand.vmem [shape: bf16[256,512], index: 4, kind: input, shape index: {}]   ;;  %s6719_s7 = inlined_call_operand.vmem [shape: f32[1,128], index: 7, kind: input, shape index: {}]   ;;  %s6720_s6 = inlined_call_operand.vmem [shape: bf16[128,128], index: 6, kind: input, shape index: {}]   ;;  %s6721_s5 = inlined_call_operand.vmem [shape: f32[1,512], index: 5, kind: input, shape index: {}]   ;;  %s6722_s8 = inlined_call_operand.vmem [shape: f32[8,8,128], index: 8, kind: output, shape index: {}]  }
   0x1   :  { %v30_v0 = vld [vmem:[%s6714_s1] sm:$0xff]  ;;  %v159_v2 = vld [vmem:[%s6715_s0 + $0x8] sm:$0xff]  ;;  %v4144_v4 = vld [vmem:[%s6716_s2 + $0xec] sm:$0xf0] }
   0x2   :  { %180 = vst [vmem:[#allocation1] ss:$4 sm:$0xff] %v30_v0  ;;  %v158_v1 = vld [vmem:[%s6715_s0] sm:$0xff]  ;;  %v3759_v6 = vld [vmem:[%s6716_s2 + $0xf0] sm:$0xf0]  ;;  %v161_v63 = vld [vmem:[%s6715_s0 + $0x18] sm:$0xff] }
   0x3   :  { %v3757_v3 = vld [vmem:[%s6716_s2 + $0xe0] sm:$0xf]  ;;  %v4142_v5 = vld [vmem:[%s6716_s2 + $0xe4] sm:$0xf]  ;;  %v4143_v7 = vld [vmem:[%s6716_s2 + $0xec] sm:$0xf]  ;;  %v166_v22 = vpack.c.bf16 %v159_v2, %v158_v1 }
   0x4   :  { %v3767_v8 = vld [vmem:[%s6716_s2 + $0xf8] sm:$0xf0]  ;;  %v3741_v9 = vld [vmem:[%s6716_s2 + $0xc0] sm:$0xf]  ;;  %v4140_v10 = vld [vmem:[%s6716_s2 + $0xcc] sm:$0xf0]  ;;  %v4575_v11 = vor.u32 %v4144_v4, %v3757_v3  ;;  %v4589_v18 = vor.u32 %v4142_v5, %v3759_v6 }
   0x5   :  { %v4138_v12 = vld [vmem:[%s6716_s2 + $0xc4] sm:$0xf]  ;;  %v3743_v13 = vld [vmem:[%s6716_s2 + $0xd0] sm:$0xf0]  ;;  %v3765_v14 = vld [vmem:[%s6716_s2 + $0xe8] sm:$0xf]  ;;  %v4594_v25 = vor.u32 %v4143_v7, %v3767_v8  ;;  %v4598_v27 = vor.u32 %v4140_v10, %v3741_v9 }
   0x6   :  { %v4145_v15 = vld [vmem:[%s6716_s2 + $0xf4] sm:$0xf0]  ;;  %v4139_v28 = vld [vmem:[%s6716_s2 + $0xcc] sm:$0xf]  ;;  %v3751_v29 = vld [vmem:[%s6716_s2 + $0xd8] sm:$0xf0]  ;;  %v4607_v30 = vor.u32 %v4138_v12, %v3743_v13 }
   0x7   :  { %v4609_v31 = vor.u32 %v4145_v15, %v3765_v14  ;;  %v3725_v32 = vld [vmem:[%s6716_s2 + $0xa0] sm:$0xf]  ;;  %v4136_v33 = vld [vmem:[%s6716_s2 + $0xac] sm:$0xf0]  ;;  %v4134_v34 = vld [vmem:[%s6716_s2 + $0xa4] sm:$0xf]  ;;  %v4633_v38 = vor.u32 %v4139_v28, %v3751_v29 }
   0x8   :  { %v3727_v35 = vld [vmem:[%s6716_s2 + $0xb0] sm:$0xf0]  ;;  %v3749_v36 = vld [vmem:[%s6716_s2 + $0xc8] sm:$0xf]  ;;  %v4141_v37 = vld [vmem:[%s6716_s2 + $0xd4] sm:$0xf0]  ;;  %v4637_v39 = vor.u32 %v4136_v33, %v3725_v32 }
   0x9   :  { %v181_v16 = vld.sshfl [vmem:[#allocation1] sm:$0xff pattern:$0x73625140]  ;;  %v182_v17 = vld.sshfl [vmem:[#allocation1 + $0x8] sm:$0xff pattern:$0x73625140]  ;;  %v4647_v42 = vor.u32 %v4134_v34, %v3727_v35  ;;  %v4649_v43 = vor.u32 %v4141_v37, %v3749_v36 }
   0xa   :  { %v199_v19 = vsel %vm198_vm0, %v181_v16, 0  ;;  %v201_v20 = vsel %vm198_vm0, %v182_v17, 0  ;;  %v183_v21 = vld.sshfl [vmem:[#allocation1 + $0x10] sm:$0xff pattern:$0x73625140] }
   0xb   :  { %214 = vmatpush.bf16.msra.mxu0 %v199_v19  ;;  %243 = vmatpush.bf16.msra.mxu1 %v201_v20  ;;  %v203_v23 = vsel %vm198_vm0, %v183_v21, 0  ;;  %v184_v24 = vld.sshfl [vmem:[#allocation1 + $0x18] sm:$0xff pattern:$0x73625140]  ;;  %v4135_v40 = vld [vmem:[%s6716_s2 + $0xac] sm:$0xf] }
   0xc   :  { %272 = vmatpush.bf16.msra.mxu2 %v203_v23  ;;  %v205_v26 = vsel %vm198_vm0, %v184_v24, 0  ;;  %v3735_v41 = vld [vmem:[%s6716_s2 + $0xb8] sm:$0xf0]  ;;  %v3709_v44 = vld [vmem:[%s6716_s2 + $0x80] sm:$0xf]  ;;  %v160_v62 = vld [vmem:[%s6715_s0 + $0x10] sm:$0xff] }
   0xd   :  { %301 = vmatpush.bf16.msra.mxu3 %v205_v26  ;;  %v4132_v45 = vld [vmem:[%s6716_s2 + $0x8c] sm:$0xf0]  ;;  %v4130_v46 = vld [vmem:[%s6716_s2 + $0x84] sm:$0xf]  ;;  %v3711_v47 = vld [vmem:[%s6716_s2 + $0x90] sm:$0xf0]  ;;  %v4670_v50 = vor.u32 %v4135_v40, %v3735_v41  ;;  %v167_v9 = vpack.c.bf16 %v161_v63, %v160_v62 }
   0xe   :  { %3627 = vmatmul.msk.bf16.vlgmr.msra.gmra.mxu0 %vm185_vm1, %v166_v22  ;;  %3631 = vmatmul.msk.bf16.vlgmr.msra.gmra.mxu1 %vm185_vm1, %v166_v22  ;;  %v3733_v48 = vld [vmem:[%s6716_s2 + $0xa8] sm:$0xf]  ;;  %v4137_v49 = vld [vmem:[%s6716_s2 + $0xb4] sm:$0xf0]  ;;  %v4673_v51 = vor.u32 %v4132_v45, %v3709_v44  ;;  %v4131_v52 = vld [vmem:[%s6716_s2 + $0x8c] sm:$0xf]  ;;  %v4683_v54 = vor.u32 %v4130_v46, %v3711_v47 }
   0xf   :  { %519 = vmatpush.bf16.msrb.mxu0 %v4575_v11  ;;  %532 = vmatpush.bf16.msrb.mxu1 %v4589_v18  ;;  %v3719_v53 = vld [vmem:[%s6716_s2 + $0x98] sm:$0xf0]  ;;  %v4685_v55 = vor.u32 %v4137_v49, %v3733_v48  ;;  %v3693_v56 = vld [vmem:[%s6716_s2 + $0x60] sm:$0xf]  ;;  %v4128_v57 = vld [vmem:[%s6716_s2 + $0x6c] sm:$0xf0] }
  0x10   :  { %3635 = vmatmul.msk.bf16.vlgmr.msra.gmra.mxu2 %vm185_vm1, %v166_v22  ;;  %3639 = vmatmul.msk.bf16.vlgmr.msra.gmra.mxu3 %vm185_vm1, %v166_v22  ;;  %v4126_v58 = vld [vmem:[%s6716_s2 + $0x64] sm:$0xf]  ;;  %v3695_v59 = vld [vmem:[%s6716_s2 + $0x70] sm:$0xf0]  ;;  %v3717_v60 = vld [vmem:[%s6716_s2 + $0x88] sm:$0xf]  ;;  %v4712_v0 = vor.u32 %v4131_v52, %v3719_v53  ;;  %v4715_v1 = vor.u32 %v4128_v57, %v3693_v56 }
  0x11   :  { %558 = vmatpush.bf16.msrb.mxu3 %v4594_v25  ;;  %545 = vmatpush.bf16.msrb.mxu2 %v4609_v31  ;;  %v4133_v61 = vld [vmem:[%s6716_s2 + $0x94] sm:$0xf0]  ;;  %v4127_v2 = vld [vmem:[%s6716_s2 + $0x6c] sm:$0xf]  ;;  %v3703_v3 = vld [vmem:[%s6716_s2 + $0x78] sm:$0xf0]  ;;  %v4725_v4 = vor.u32 %v4126_v58, %v3695_v59 }
  0x12   :  { %v4727_v5 = vor.u32 %v4133_v61, %v3717_v60  ;;  %v3677_v6 = vld [vmem:[%s6716_s2 + $0x40] sm:$0xf]  ;;  %v4124_v7 = vld [vmem:[%s6716_s2 + $0x4c] sm:$0xf0]  ;;  %v4122_v8 = vld [vmem:[%s6716_s2 + $0x44] sm:$0xf]  ;;  %v4748_v14 = vor.u32 %v4127_v2, %v3703_v3 }
  0x13   :  { %520 = vmatpush.bf16.msrb.mxu0 %v4598_v27  ;;  %533 = vmatpush.bf16.msrb.mxu1 %v4607_v30  ;;  %v3679_v10 = vld [vmem:[%s6716_s2 + $0x50] sm:$0xf0]  ;;  %v3701_v12 = vld [vmem:[%s6716_s2 + $0x68] sm:$0xf]  ;;  %v4129_v13 = vld [vmem:[%s6716_s2 + $0x74] sm:$0xf0]  ;;  %v4751_v15 = vor.u32 %v4124_v7, %v3677_v6 }
  0x14   :  { %v4123_v16 = vld [vmem:[%s6716_s2 + $0x4c] sm:$0xf]  ;;  %v3687_v17 = vld [vmem:[%s6716_s2 + $0x58] sm:$0xf0]  ;;  %v4761_v19 = vor.u32 %v4122_v8, %v3679_v10  ;;  %v4763_v20 = vor.u32 %v4129_v13, %v3701_v12  ;;  %v3661_v22 = vld [vmem:[%s6716_s2 + $0x20] sm:$0xf] }
  0x15   :  { %559 = vmatpush.bf16.msrb.mxu3 %v4633_v38  ;;  %546 = vmatpush.bf16.msrb.mxu2 %v4649_v43  ;;  %v4769_v21 = vor.u32 %v4123_v16, %v3687_v17  ;;  %v4120_v23 = vld [vmem:[%s6716_s2 + $0x2c] sm:$0xf0]  ;;  %v4118_v24 = vld [vmem:[%s6716_s2 + $0x24] sm:$0xf]  ;;  %v3663_v28 = vld [vmem:[%s6716_s2 + $0x30] sm:$0xf0] }
  0x16   :  { %v4784_v26 = vor.u32 %v4120_v23, %v3661_v22  ;;  %v3685_v29 = vld [vmem:[%s6716_s2 + $0x48] sm:$0xf]  ;;  %v4125_v32 = vld [vmem:[%s6716_s2 + $0x54] sm:$0xf0]  ;;  %v4795_v33 = vor.u32 %v4118_v24, %v3663_v28  ;;  %v4119_v35 = vld [vmem:[%s6716_s2 + $0x2c] sm:$0xf] }
  0x17   :  { %521 = vmatpush.bf16.msrb.mxu0 %v4637_v39  ;;  %534 = vmatpush.bf16.msrb.mxu1 %v4647_v42  ;;  %v4797_v34 = vor.u32 %v4125_v32, %v3685_v29  ;;  %v3671_v36 = vld [vmem:[%s6716_s2 + $0x38] sm:$0xf0]  ;;  %v3645_v37 = vld [vmem:[%s6716_s2] sm:$0xf]  ;;  %v4116_v41 = vld [vmem:[%s6716_s2 + $0xc] sm:$0xf0] }
  0x18   :  { %v4809_v40 = vor.u32 %v4119_v35, %v3671_v36  ;;  %v4114_v44 = vld [vmem:[%s6716_s2 + $0x4] sm:$0xf]  ;;  %v3647_v45 = vld [vmem:[%s6716_s2 + $0x10] sm:$0xf0]  ;;  %v4821_v46 = vor.u32 %v4116_v41, %v3645_v37  ;;  %v3669_v47 = vld [vmem:[%s6716_s2 + $0x28] sm:$0xf] }
  0x19   :  { %560 = vmatpush.bf16.msrb.mxu3 %v4670_v50  ;;  %547 = vmatpush.bf16.msrb.mxu2 %v4685_v55  ;;  %v4121_v48 = vld [vmem:[%s6716_s2 + $0x34] sm:$0xf0]  ;;  %v4831_v49 = vor.u32 %v4114_v44, %v3647_v45  ;;  %v4115_v53 = vld [vmem:[%s6716_s2 + $0xc] sm:$0xf]  ;;  %v3655_v56 = vld [vmem:[%s6716_s2 + $0x18] sm:$0xf0] }
  0x1a   :  { %v4833_v52 = vor.u32 %v4121_v48, %v3669_v47  ;;  %v3653_v57 = vld [vmem:[%s6716_s2 + $0x8] sm:$0xf]  ;;  %v4117_v58 = vld [vmem:[%s6716_s2 + $0x14] sm:$0xf0]  ;;  %v162_v59 = vld [vmem:[%s6715_s0 + $0x20] sm:$0xff]  ;;  %v4854_v61 = vor.u32 %v4115_v53, %v3655_v56  ;;  %v4495_v7 = vmov 0  }
  0x1b   :  { %522 = vmatpush.bf16.msrb.mxu0 %v4673_v51  ;;  %535 = vmatpush.bf16.msrb.mxu1 %v4683_v54  ;;  %v163_v60 = vld [vmem:[%s6715_s0 + $0x28] sm:$0xff]  ;;  %v4859_v62 = vor.u32 %v4117_v58, %v3653_v57  ;;  %v164_v2 = vld [vmem:[%s6715_s0 + $0x30] sm:$0xff]  ;;  %v165_v3 = vld [vmem:[%s6715_s0 + $0x38] sm:$0xff] }
  0x1c   :  { %v168_v63 = vpack.c.bf16 %v163_v60, %v162_v59  ;;  %v169_v6 = vpack.c.bf16 %v165_v3, %v164_v2  ;;  %v143_v17 = vld [vmem:[%s6717_s3] sm:$0xf] }
  0x1d   :  { %561 = vmatpush.bf16.msrb.mxu3 %v4712_v0  ;;  %548 = vmatpush.bf16.msrb.mxu2 %v4727_v5  ;;  %v4950_v22 = vperm.slane %v143_v17, 0  ;;  %v4954_v24 = vperm.slane %v143_v17, 1  ;;  %v4964_v37 = vperm.slane %v143_v17, 2  ;;  %v4966_v41 = vperm.slane %v143_v17, 3 }
  0x1e   :  { %3628 = vmatmul.msk.bf16.gmra.mxu0 %vm185_vm1, %v167_v9  ;;  %3632 = vmatmul.msk.bf16.gmra.mxu1 %vm185_vm1, %v167_v9 }
  0x1f   :  { %523 = vmatpush.bf16.msrb.mxu0 %v4715_v1  ;;  %536 = vmatpush.bf16.msrb.mxu1 %v4725_v4 }
  0x20   :  { %3636 = vmatmul.msk.bf16.gmra.mxu2 %vm185_vm1, %v167_v9  ;;  %3640 = vmatmul.msk.bf16.gmra.mxu3 %vm185_vm1, %v167_v9 }
  0x21   :  { %562 = vmatpush.bf16.msrb.mxu3 %v4748_v14  ;;  %549 = vmatpush.bf16.msrb.mxu2 %v4763_v20 }
  0x23   :  { %524 = vmatpush.bf16.msrb.mxu0 %v4751_v15  ;;  %537 = vmatpush.bf16.msrb.mxu1 %v4761_v19 }
  0x25   :  { %563 = vmatpush.bf16.msrb.mxu3 %v4769_v21  ;;  %550 = vmatpush.bf16.msrb.mxu2 %v4797_v34 }
  0x27   :  { %525 = vmatpush.bf16.msrb.mxu0 %v4784_v26  ;;  %538 = vmatpush.bf16.msrb.mxu1 %v4795_v33 }
  0x29   :  { %564 = vmatpush.bf16.msrb.mxu3 %v4809_v40  ;;  %551 = vmatpush.bf16.msrb.mxu2 %v4833_v52 }
  0x2b   :  { %526 = vmatpush.bf16.msrb.mxu0 %v4821_v46  ;;  %539 = vmatpush.bf16.msrb.mxu1 %v4831_v49 }
  0x2d   :  { %565 = vmatpush.bf16.msrb.mxu3 %v4854_v61  ;;  %552 = vmatpush.bf16.msrb.mxu2 %v4859_v62 }
  0x2e   :  { %3629 = vmatmul.msk.bf16.gmra.mxu0 %vm185_vm1, %v168_v63  ;;  %3633 = vmatmul.msk.bf16.gmra.mxu1 %vm185_vm1, %v168_v63 }
  0x2f   :  { %644 = vmatpush.bf16.msra.mxu0 %v4575_v11  ;;  %657 = vmatpush.bf16.msra.mxu1 %v4589_v18 }
  0x30   :  { %3637 = vmatmul.msk.bf16.gmra.mxu2 %vm185_vm1, %v168_v63  ;;  %3641 = vmatmul.msk.bf16.gmra.mxu3 %vm185_vm1, %v168_v63 }
  0x31   :  { %683 = vmatpush.bf16.msra.mxu3 %v4594_v25  ;;  %670 = vmatpush.bf16.msra.mxu2 %v4609_v31 }
  0x33   :  { %645 = vmatpush.bf16.msra.mxu0 %v4598_v27  ;;  %658 = vmatpush.bf16.msra.mxu1 %v4607_v30 }
  0x35   :  { %684 = vmatpush.bf16.msra.mxu3 %v4633_v38  ;;  %671 = vmatpush.bf16.msra.mxu2 %v4649_v43 }
  0x37   :  { %646 = vmatpush.bf16.msra.mxu0 %v4637_v39  ;;  %659 = vmatpush.bf16.msra.mxu1 %v4647_v42 }
  0x39   :  { %685 = vmatpush.bf16.msra.mxu3 %v4670_v50  ;;  %672 = vmatpush.bf16.msra.mxu2 %v4685_v55 }
  0x3b   :  { %647 = vmatpush.bf16.msra.mxu0 %v4673_v51  ;;  %660 = vmatpush.bf16.msra.mxu1 %v4683_v54 }
  0x3d   :  { %686 = vmatpush.bf16.msra.mxu3 %v4712_v0  ;;  %673 = vmatpush.bf16.msra.mxu2 %v4727_v5 }
  0x3e   :  { %3630 = vmatmul.msk.bf16.gmra.mxu0 %vm185_vm1, %v169_v6  ;;  %3634 = vmatmul.msk.bf16.gmra.mxu1 %vm185_vm1, %v169_v6 }
  0x3f   :  { %648 = vmatpush.bf16.msra.mxu0 %v4715_v1  ;;  %661 = vmatpush.bf16.msra.mxu1 %v4725_v4 }
  0x40   :  { %3638 = vmatmul.msk.bf16.gmra.mxu2 %vm185_vm1, %v169_v6  ;;  %3642 = vmatmul.msk.bf16.gmra.mxu3 %vm185_vm1, %v169_v6 }
  0x41   :  { %687 = vmatpush.bf16.msra.mxu3 %v4748_v14  ;;  %674 = vmatpush.bf16.msra.mxu2 %v4763_v20 }
  0x43   :  { %649 = vmatpush.bf16.msra.mxu0 %v4751_v15  ;;  %662 = vmatpush.bf16.msra.mxu1 %v4761_v19 }
  0x45   :  { %688 = vmatpush.bf16.msra.mxu3 %v4769_v21  ;;  %675 = vmatpush.bf16.msra.mxu2 %v4797_v34 }
  0x47   :  { %650 = vmatpush.bf16.msra.mxu0 %v4784_v26  ;;  %663 = vmatpush.bf16.msra.mxu1 %v4795_v33 }
  0x49   :  { %689 = vmatpush.bf16.msra.mxu3 %v4809_v40  ;;  %676 = vmatpush.bf16.msra.mxu2 %v4833_v52 }
  0x4b   :  { %651 = vmatpush.bf16.msra.mxu0 %v4821_v46  ;;  %664 = vmatpush.bf16.msra.mxu1 %v4831_v49 }
  0x4d   :  { %690 = vmatpush.bf16.msra.mxu3 %v4854_v61  ;;  %677 = vmatpush.bf16.msra.mxu2 %v4859_v62 }
  0x4e   :  { %527 = vmatmul.bf16.vlgmr.msrb.gmra.mxu0 %v4495_v7  ;;  %540 = vmatmul.bf16.vlgmr.msrb.gmra.mxu1 %v4495_v7 }
  0x4f   :  { %769 = vmatpush.bf16.msrb.mxu0 %v4575_v11  ;;  %782 = vmatpush.bf16.msrb.mxu1 %v4589_v18 }
  0x50   :  { %553 = vmatmul.bf16.vlgmr.msrb.gmra.mxu2 %v4495_v7  ;;  %566 = vmatmul.bf16.vlgmr.msrb.gmra.mxu3 %v4495_v7 }
  0x51   :  { %795 = vmatpush.bf16.msrb.mxu2 %v4609_v31  ;;  %808 = vmatpush.bf16.msrb.mxu3 %v4594_v25 }
  0x53   :  { %770 = vmatpush.bf16.msrb.mxu0 %v4598_v27  ;;  %783 = vmatpush.bf16.msrb.mxu1 %v4607_v30 }
  0x55   :  { %796 = vmatpush.bf16.msrb.mxu2 %v4649_v43  ;;  %809 = vmatpush.bf16.msrb.mxu3 %v4633_v38 }
  0x57   :  { %771 = vmatpush.bf16.msrb.mxu0 %v4637_v39  ;;  %784 = vmatpush.bf16.msrb.mxu1 %v4647_v42 }
  0x59   :  { %797 = vmatpush.bf16.msrb.mxu2 %v4685_v55  ;;  %810 = vmatpush.bf16.msrb.mxu3 %v4670_v50 }
  0x5b   :  { %772 = vmatpush.bf16.msrb.mxu0 %v4673_v51  ;;  %785 = vmatpush.bf16.msrb.mxu1 %v4683_v54 }
  0x5d   :  { %798 = vmatpush.bf16.msrb.mxu2 %v4727_v5  ;;  %811 = vmatpush.bf16.msrb.mxu3 %v4712_v0 }
  0x5f   :  { %773 = vmatpush.bf16.msrb.mxu0 %v4715_v1  ;;  %786 = vmatpush.bf16.msrb.mxu1 %v4725_v4 }
  0x61   :  { %799 = vmatpush.bf16.msrb.mxu2 %v4763_v20  ;;  %812 = vmatpush.bf16.msrb.mxu3 %v4748_v14 }
  0x63   :  { %774 = vmatpush.bf16.msrb.mxu0 %v4751_v15  ;;  %787 = vmatpush.bf16.msrb.mxu1 %v4761_v19 }
  0x65   :  { %800 = vmatpush.bf16.msrb.mxu2 %v4797_v34  ;;  %813 = vmatpush.bf16.msrb.mxu3 %v4769_v21 }
  0x67   :  { %775 = vmatpush.bf16.msrb.mxu0 %v4784_v26  ;;  %788 = vmatpush.bf16.msrb.mxu1 %v4795_v33 }
  0x69   :  { %801 = vmatpush.bf16.msrb.mxu2 %v4833_v52  ;;  %814 = vmatpush.bf16.msrb.mxu3 %v4809_v40 }
  0x6b   :  { %776 = vmatpush.bf16.msrb.mxu0 %v4821_v46  ;;  %789 = vmatpush.bf16.msrb.mxu1 %v4831_v49 }
  0x6d   :  { %802 = vmatpush.bf16.msrb.mxu2 %v4859_v62  ;;  %815 = vmatpush.bf16.msrb.mxu3 %v4854_v61 }
  0x8b   :  { %v216_v8 = vpop.f32.mrf.mxu0  ;;  %v245_v9 = vpop.f32.mrf.mxu1 }
  0x93   :  { %v4941_v10 = vpop.f32.mrf.mxu2  ;;  %v303_v12 = vpop.f32.mrf.mxu3 }
  0x94   :  { %v4943_v13 = vpop.f32.mrf.mxu0  ;;  %v4945_v16 = vpop.f32.mrf.mxu1 }
  0x9b   :  { %v4952_v23 = vpop.f32.mrf.mxu2  ;;  %v4956_v28 = vpop.f32.mrf.mxu3 }
  0x9c   :  { %6845 = vst [vmem:[#allocation4_spill] sm:$0xff] %v4952_v23  ;;  %v221_v29 = vpop.f32.mrf.mxu0  ;;  %v250_v35 = vpop.f32.mrf.mxu1 }
  0x9d   :  { %v4959_v32 = vadd.f32 %v221_v29, %v4950_v22  ;;  %v4962_v36 = vadd.f32 %v250_v35, %v4954_v24 }
  0x9f   :  { %6846 = vst [vmem:[#allocation5_spill] sm:$0xff] %v4959_v32 }
  0xa0   :  { %6847 = vst [vmem:[#allocation6_spill] sm:$0xff] %v4962_v36 }
  0xa3   :  { %v279_v44 = vpop.f32.mrf.mxu2  ;;  %v308_v47 = vpop.f32.mrf.mxu3 }
  0xa4   :  { %v4969_v45 = vadd.f32 %v279_v44, %v4964_v37  ;;  %v4971_v48 = vpop.f32.mrf.mxu0  ;;  %v4974_v53 = vadd.f32 %v308_v47, %v4966_v41  ;;  %v4976_v56 = vpop.f32.mrf.mxu1 }
  0xa5   :  { %6849 = vst [vmem:[#allocation8_spill] sm:$0xff] %v4971_v48 }
  0xa6   :  { %6848 = vst [vmem:[#allocation7_spill] sm:$0xff] %v4969_v45 }
  0xa7   :  { %6850 = vst [vmem:[#allocation9_spill] sm:$0xff] %v4974_v53 }
  0xa8   :  { %6851 = vst [vmem:[#allocation10_spill] sm:$0xff] %v4976_v56 }
  0xab   :  { %v4978_v57 = vpop.f32.mrf.mxu2  ;;  %v4980_v58 = vpop.f32.mrf.mxu3 }
  0xac   :  { %6852 = vst [vmem:[#allocation11_spill] sm:$0xff] %v4978_v57  ;;  %v226_v59 = vpop.f32.mrf.mxu0  ;;  %v255_v63 = vpop.f32.mrf.mxu1 }
  0xad   :  { %6853 = vst [vmem:[#allocation12_spill] sm:$0xff] %v4980_v58  ;;  %v4983_v60 = vadd.f32 %v226_v59, %v4950_v22  ;;  %v4986_v2 = vadd.f32 %v255_v63, %v4954_v24 }
  0xaf   :  { %6854 = vst [vmem:[#allocation13_spill] sm:$0xff] %v4983_v60 }
  0xb0   :  { %6855 = vst [vmem:[#allocation14_spill] sm:$0xff] %v4986_v2 }
  0xb3   :  { %v284_v3 = vpop.f32.mrf.mxu2  ;;  %v313_v7 = vpop.f32.mrf.mxu3 }
  0xb4   :  { %v4989_v6 = vadd.f32 %v284_v3, %v4964_v37  ;;  %v4991_v17 = vpop.f32.mrf.mxu0  ;;  %v4994_v29 = vadd.f32 %v313_v7, %v4966_v41  ;;  %v4996_v35 = vpop.f32.mrf.mxu1 }
  0xb5   :  { %6857 = vst [vmem:[#allocation16_spill] sm:$0xff] %v4991_v17 }
  0xb6   :  { %6856 = vst [vmem:[#allocation15_spill] sm:$0xff] %v4989_v6 }
  0xb7   :  { %6858 = vst [vmem:[#allocation17_spill] sm:$0xff] %v4994_v29 }
  0xb8   :  { %6859 = vst [vmem:[#allocation18_spill] sm:$0xff] %v4996_v35 }
  0xbb   :  { %v4998_v44 = vpop.f32.mrf.mxu2  ;;  %v5000_v47 = vpop.f32.mrf.mxu3 }
  0xbc   :  { %6860 = vst [vmem:[#allocation19_spill] sm:$0xff] %v4998_v44  ;;  %v231_v59 = vpop.f32.mrf.mxu0  ;;  %v260_v2 = vpop.f32.mrf.mxu1 }
  0xbd   :  { %6861 = vst [vmem:[#allocation20_spill] sm:$0xff] %v5000_v47  ;;  %v5003_v63 = vadd.f32 %v231_v59, %v4950_v22  ;;  %v5006_v3 = vadd.f32 %v260_v2, %v4954_v24  ;;  %v217_v47 = vadd.f32 %v216_v8, %v4950_v22 }
  0xbf   :  { %6862 = vst [vmem:[#allocation21_spill] sm:$0xff] %v5003_v63  ;;  %v246_v63 = vadd.f32 %v245_v9, %v4954_v24 }
  0xc0   :  { %6863 = vst [vmem:[#allocation22_spill] sm:$0xff] %v5006_v3 }
  0xc3   :  { %v289_v6 = vpop.f32.mrf.mxu2  ;;  %v318_v7 = vpop.f32.mrf.mxu3 }
  0xc4   :  { %v5009_v17 = vadd.f32 %v289_v6, %v4964_v37  ;;  %v5011_v29 = vpop.f32.mrf.mxu0  ;;  %v5014_v35 = vadd.f32 %v318_v7, %v4966_v41  ;;  %v5016_v44 = vpop.f32.mrf.mxu1  ;;  %v304_v7 = vadd.f32 %v303_v12, %v4966_v41 }
  0xc5   :  { %6865 = vst [vmem:[#allocation24_spill] sm:$0xff] %v5011_v29 }
  0xc6   :  { %6864 = vst [vmem:[#allocation23_spill] sm:$0xff] %v5009_v17 }
  0xc7   :  { %6866 = vst [vmem:[#allocation25_spill] sm:$0xff] %v5014_v35 }
  0xc8   :  { %6867 = vst [vmem:[#allocation26_spill] sm:$0xff] %v5016_v44 }
  0xcb   :  { %v5019_v59 = vpop.f32.mrf.mxu2  ;;  %v5022_v2 = vpop.f32.mrf.mxu3 }
  0xcc   :  { %6868 = vst [vmem:[#allocation27_spill] sm:$0xff] %v5019_v59  ;;  %v528_v3 = vpop.f32.mrf.mxu0  ;;  %v541_v6 = vpop.f32.mrf.mxu1 }
  0xcd   :  { %6869 = vst [vmem:[#allocation28_spill] sm:$0xff] %v5022_v2  ;;  %v571_v60 = vadd.f32 %v528_v3, %v217_v47  ;;  %v572_v17 = vadd.f32 %v541_v6, %v246_v63 }
  0xcf   :  { %v3771_v57 = vmul.f32 -1.442695, %v571_v60  ;;  %v3772_v58 = vmul.f32 -1.442695, %v572_v17 }
  0xd1   :  { %4221 = vpow2.f32 %v3771_v57  ;;  %v275_v57 = vadd.f32 %v4941_v10, %v4964_v37 }
  0xd2   :  { %4223 = vpow2.f32 %v3772_v58 }
  0xd3   :  { %v554_v29 = vpop.f32.mrf.mxu2  ;;  %v567_v44 = vpop.f32.mrf.mxu3 }
  0xd4   :  { %v530_v35 = vpop.f32.mrf.mxu0  ;;  %v574_v8 = vadd.f32 %v567_v44, %v304_v7  ;;  %v543_v56 = vpop.f32.mrf.mxu1  ;;  %v573_v17 = vadd.f32 %v554_v29, %v275_v57 }
  0xd6   :  { %v3773_v48 = vmul.f32 -1.442695, %v574_v8 }
  0xd7   :  { %v4222_v59 = vpop.eup %4221 }
  0xd8   :  { %v4224_v9 = vpop.eup %4223  ;;  %v578_v45 = vadd.f32 1.0, %v4222_v59  ;;  %4225 = vpow2.f32 %v3773_v48 }
  0xd9   :  { %v597_v2 = vadd.f32 1.0, %v4224_v9 }
  0xda   :  { %4227 = vrcp.f32 %v578_v45  ;;  %v590_v59 = vand.u32 2147483648, %v578_v45  ;;  %v588_v8 = vand.u32 2147483647, %v578_v45  ;;  %vm584_vm4 = vweird.f32 %v578_v45 }
  0xdb   :  { %4229 = vrcp.f32 %v597_v2  ;;  %v556_v47 = vpop.f32.mrf.mxu2  ;;  %v569_v60 = vpop.f32.mrf.mxu3  ;;  %v609_v48 = vand.u32 2147483648, %v597_v2  ;;  %vm603_vm5 = vweird.f32 %v597_v2 }
  0xdc   :  { %v607_v47 = vand.u32 2147483647, %v597_v2  ;;  %v591_v29 = vor.u32 1.1754944e-38, %v590_v59  ;;  %vm589_vm7 = vcmp.eq.f32.partialorder %v588_v8, 8.507059e+37 }
  0xde   :  { %v4226_v58 = vpop.eup %4225  ;;  %vm608_vm9 = vcmp.eq.f32.partialorder %v607_v47, 8.507059e+37 }
  0xdf   :  { %v617_v63 = vadd.f32 1.0, %v4226_v58  ;;  %v610_v58 = vor.u32 1.1754944e-38, %v609_v48 }
  0xe0   :  { %v4228_v12 = vpop.eup %4227 }
  0xe1   :  { %v4230_v35 = vpop.eup %4229  ;;  %v580_v44 = vmul.f32 %v4228_v12, %v578_v45  ;;  %4231 = vrcp.f32 %v617_v63  ;;  %vm585_vm2 = vweird.f32 %v4228_v12  ;;  %v629_v59 = vand.u32 2147483648, %v617_v63 }
  0xe2   :  { %v599_v56 = vmul.f32 %v4230_v35, %v597_v2  ;;  %4233 = vtanh.f32 %v573_v17  ;;  %vm604_vm3 = vweird.f32 %v4230_v35  ;;  %vm586_vm6 = vmor %vm584_vm4, %vm585_vm2  ;;  %vm623_vm11 = vweird.f32 %v617_v63 }
  0xe3   :  { %v581_v3 = vsub.f32 1.0, %v580_v44  ;;  %vm605_vm8 = vmor %vm603_vm5, %vm604_vm3  ;;  %v630_v8 = vor.u32 1.1754944e-38, %v629_v59 }
  0xe4   :  { %v600_v6 = vsub.f32 1.0, %v599_v56 }
  0xe5   :  { %v582_v7 = vmul.f32 %v4228_v12, %v581_v3 }
  0xe6   :  { %v601_v9 = vmul.f32 %v4230_v35, %v600_v6 }
  0xe7   :  { %v583_v10 = vadd.f32 %v4228_v12, %v582_v7  ;;  %v4232_v60 = vpop.eup %4231 }
  0xe8   :  { %v602_v57 = vadd.f32 %v4230_v35, %v601_v9  ;;  %v619_v44 = vmul.f32 %v4232_v60, %v617_v63  ;;  %v4234_v17 = vpop.eup %4233  ;;  %vm624_vm10 = vweird.f32 %v4232_v60 }
  0xe9   :  { %v587_v53 = vsel %vm586_vm6, %v4228_v12, %v583_v10  ;;  %v627_v12 = vand.u32 2147483647, %v617_v63  ;;  %vm625_vm12 = vmor %vm623_vm11, %vm624_vm10 }
  0xea   :  { %v592_v56 = vsel %vm589_vm7, %v591_v29, %v587_v53  ;;  %v606_v3 = vsel %vm605_vm8, %v4230_v35, %v602_v57  ;;  %v620_v32 = vsub.f32 1.0, %v619_v44 }
  0xeb   :  { %v611_v36 = vsel %vm608_vm9, %v610_v58, %v606_v3  ;;  %v634_v6 = vmul.f32 %v4234_v17, %v592_v56  ;;  %vm628_vm13 = vcmp.eq.f32.partialorder %v627_v12, 8.507059e+37  ;;  %v306_v58 = vadd.f32 %v4956_v28, %v4966_v41 }
  0xec   :  { %v633_v23 = vmul.f32 0.0, %v611_v36  ;;  %v621_v7 = vmul.f32 %v4232_v60, %v620_v32  ;;  %v248_v32 = vadd.f32 %v4945_v16, %v4954_v24 }
  0xee   :  { %v5027_v45 = vadd.f32 %v634_v6, %v633_v23  ;;  %v622_v2 = vadd.f32 %v4232_v60, %v621_v7  ;;  %v219_v23 = vadd.f32 %v4943_v13, %v4950_v22 }
  0xf0   :  { %4235 = vtanh.f32 %v5027_v45  ;;  %v626_v48 = vsel %vm625_vm12, %v4232_v60, %v622_v2 }
  0xf1   :  { %v631_v35 = vsel %vm628_vm13, %v630_v8, %v626_v48 }
  0xf6   :  { %v4236_v53 = vpop.eup %4235 }
  0xf7   :  { %v637_v9 = vmul.f32 %v4236_v53, %v631_v35  ;;  %v6870_v53 = vld [vmem:[#allocation4_spill] sm:$0xff] }
  0xf8   :  { %v277_v28 = vadd.f32 %v6870_v53, %v4964_v37 }
  0xf9   :  { %v643_v47 = vpack.c.bf16 %v637_v9, %v637_v9 }
  0xfb   :  { %652 = vmatmul.bf16.vlgmr.msra.gmra.mxu0 %v643_v47  ;;  %665 = vmatmul.bf16.vlgmr.msra.gmra.mxu1 %v643_v47 }
  0xfc   :  { %678 = vmatmul.bf16.vlgmr.msra.gmra.mxu2 %v643_v47  ;;  %691 = vmatmul.bf16.vlgmr.msra.gmra.mxu3 %v643_v47 }
  0xfd   :  { %894 = vmatpush.bf16.msra.mxu0 %v4575_v11  ;;  %907 = vmatpush.bf16.msra.mxu1 %v4589_v18 }
  0xfe   :  { %920 = vmatpush.bf16.msra.mxu2 %v4609_v31  ;;  %933 = vmatpush.bf16.msra.mxu3 %v4594_v25 }
 0x101   :  { %895 = vmatpush.bf16.msra.mxu0 %v4598_v27  ;;  %908 = vmatpush.bf16.msra.mxu1 %v4607_v30 }
 0x102   :  { %921 = vmatpush.bf16.msra.mxu2 %v4649_v43  ;;  %934 = vmatpush.bf16.msra.mxu3 %v4633_v38 }
 0x105   :  { %896 = vmatpush.bf16.msra.mxu0 %v4637_v39  ;;  %909 = vmatpush.bf16.msra.mxu1 %v4647_v42 }
 0x106   :  { %922 = vmatpush.bf16.msra.mxu2 %v4685_v55  ;;  %935 = vmatpush.bf16.msra.mxu3 %v4670_v50 }
 0x109   :  { %897 = vmatpush.bf16.msra.mxu0 %v4673_v51  ;;  %910 = vmatpush.bf16.msra.mxu1 %v4683_v54 }
 0x10a   :  { %923 = vmatpush.bf16.msra.mxu2 %v4727_v5  ;;  %936 = vmatpush.bf16.msra.mxu3 %v4712_v0 }
 0x10d   :  { %898 = vmatpush.bf16.msra.mxu0 %v4715_v1  ;;  %911 = vmatpush.bf16.msra.mxu1 %v4725_v4 }
 0x10e   :  { %924 = vmatpush.bf16.msra.mxu2 %v4763_v20  ;;  %937 = vmatpush.bf16.msra.mxu3 %v4748_v14 }
 0x111   :  { %899 = vmatpush.bf16.msra.mxu0 %v4751_v15  ;;  %912 = vmatpush.bf16.msra.mxu1 %v4761_v19 }
 0x112   :  { %925 = vmatpush.bf16.msra.mxu2 %v4797_v34  ;;  %938 = vmatpush.bf16.msra.mxu3 %v4769_v21 }
 0x115   :  { %900 = vmatpush.bf16.msra.mxu0 %v4784_v26  ;;  %913 = vmatpush.bf16.msra.mxu1 %v4795_v33 }
 0x116   :  { %926 = vmatpush.bf16.msra.mxu2 %v4833_v52  ;;  %939 = vmatpush.bf16.msra.mxu3 %v4809_v40 }
 0x119   :  { %901 = vmatpush.bf16.msra.mxu0 %v4821_v46  ;;  %914 = vmatpush.bf16.msra.mxu1 %v4831_v49 }
 0x11a   :  { %927 = vmatpush.bf16.msra.mxu2 %v4859_v62  ;;  %940 = vmatpush.bf16.msra.mxu3 %v4854_v61 }
 0x178   :  { %v653_v36 = vpop.f32.mrf.mxu0  ;;  %v666_v63 = vpop.f32.mrf.mxu1 }
 0x179   :  { %v696_v10 = vadd.f32 %v653_v36, %v219_v23  ;;  %v697_v60 = vadd.f32 %v666_v63, %v248_v32 }
 0x17b   :  { %v3774_v29 = vmul.f32 -1.442695, %v696_v10  ;;  %v3775_v57 = vmul.f32 -1.442695, %v697_v60 }
 0x17d   :  { %4237 = vpow2.f32 %v3774_v29 }
 0x17e   :  { %4239 = vpow2.f32 %v3775_v57 }
 0x17f   :  { %v679_v44 = vpop.f32.mrf.mxu2  ;;  %v692_v17 = vpop.f32.mrf.mxu3 }
 0x180   :  { %v699_v56 = vadd.f32 %v692_v17, %v306_v58  ;;  %v655_v3 = vpop.f32.mrf.mxu0  ;;  %v668_v6 = vpop.f32.mrf.mxu1  ;;  %v698_v47 = vadd.f32 %v679_v44, %v277_v28 }
 0x182   :  { %v3776_v13 = vmul.f32 -1.442695, %v699_v56 }
 0x183   :  { %v4238_v7 = vpop.eup %4237 }
 0x184   :  { %v4240_v2 = vpop.eup %4239  ;;  %v703_v16 = vadd.f32 1.0, %v4238_v7  ;;  %4241 = vpow2.f32 %v3776_v13 }
 0x185   :  { %v722_v59 = vadd.f32 1.0, %v4240_v2 }
 0x186   :  { %4243 = vrcp.f32 %v703_v16  ;;  %v715_v60 = vand.u32 2147483648, %v703_v16  ;;  %v713_v58 = vand.u32 2147483647, %v703_v16  ;;  %vm709_vm0 = vweird.f32 %v703_v16 }
 0x187   :  { %4245 = vrcp.f32 %v722_v59  ;;  %v681_v12 = vpop.f32.mrf.mxu2  ;;  %v694_v48 = vpop.f32.mrf.mxu3  ;;  %v734_v29 = vand.u32 2147483648, %v722_v59  ;;  %v732_v56 = vand.u32 2147483647, %v722_v59  ;;  %vm728_vm1 = vweird.f32 %v722_v59 }
 0x188   :  { %v716_v44 = vor.u32 1.1754944e-38, %v715_v60  ;;  %vm714_vm4 = vcmp.eq.f32.partialorder %v713_v58, 8.507059e+37 }
 0x189   :  { %v735_v2 = vor.u32 1.1754944e-38, %v734_v29  ;;  %vm733_vm5 = vcmp.eq.f32.partialorder %v732_v56, 8.507059e+37  ;;  %v6871_v56 = vld [vmem:[#allocation5_spill] sm:$0xff] }
 0x18a   :  { %v4242_v8 = vpop.eup %4241 }
 0x18b   :  { %v742_v35 = vadd.f32 1.0, %v4242_v8 }
 0x18c   :  { %v4244_v9 = vpop.eup %4243 }
 0x18d   :  { %v4246_v23 = vpop.eup %4245  ;;  %v705_v32 = vmul.f32 %v4244_v9, %v703_v16  ;;  %4247 = vrcp.f32 %v742_v35  ;;  %vm710_vm14 = vweird.f32 %v4244_v9  ;;  %vm748_vm7 = vweird.f32 %v742_v35 }
 0x18e   :  { %v724_v36 = vmul.f32 %v4246_v23, %v722_v59  ;;  %4249 = vtanh.f32 %v698_v47  ;;  %vm729_vm15 = vweird.f32 %v4246_v23  ;;  %vm711_vm2 = vmor %vm709_vm0, %vm710_vm14 }
 0x18f   :  { %v706_v63 = vsub.f32 1.0, %v705_v32  ;;  %vm730_vm3 = vmor %vm728_vm1, %vm729_vm15 }
 0x190   :  { %v725_v10 = vsub.f32 1.0, %v724_v36 }
 0x191   :  { %v707_v57 = vmul.f32 %v4244_v9, %v706_v63 }
 0x192   :  { %v726_v17 = vmul.f32 %v4246_v23, %v725_v10  ;;  %v754_v10 = vand.u32 2147483648, %v742_v35 }
 0x193   :  { %v4248_v3 = vpop.eup %4247  ;;  %v708_v6 = vadd.f32 %v4244_v9, %v707_v57 }
 0x194   :  { %v727_v13 = vadd.f32 %v4246_v23, %v726_v17  ;;  %v744_v7 = vmul.f32 %v4248_v3, %v742_v35  ;;  %v4250_v48 = vpop.eup %4249  ;;  %vm749_vm6 = vweird.f32 %v4248_v3  ;;  %v755_v29 = vor.u32 1.1754944e-38, %v754_v10 }
 0x195   :  { %v712_v12 = vsel %vm711_vm2, %v4244_v9, %v708_v6  ;;  %v752_v9 = vand.u32 2147483647, %v742_v35  ;;  %vm750_vm8 = vmor %vm748_vm7, %vm749_vm6  ;;  %v6872_v6 = vld [vmem:[#allocation6_spill] sm:$0xff] }
 0x196   :  { %v717_v8 = vsel %vm714_vm4, %v716_v44, %v712_v12  ;;  %v731_v53 = vsel %vm730_vm3, %v4246_v23, %v727_v13  ;;  %v745_v28 = vsub.f32 1.0, %v744_v7 }
 0x197   :  { %v736_v47 = vsel %vm733_vm5, %v735_v2, %v731_v53  ;;  %v759_v32 = vmul.f32 %v4250_v48, %v717_v8  ;;  %vm753_vm9 = vcmp.eq.f32.partialorder %v752_v9, 8.507059e+37  ;;  %v6873_v48 = vld [vmem:[#allocation9_spill] sm:$0xff] }
 0x198   :  { %v758_v36 = vmul.f32 %v736_v47, %v5027_v45  ;;  %v746_v63 = vmul.f32 %v4248_v3, %v745_v28 }
 0x19a   :  { %v5071_v16 = vadd.f32 %v759_v32, %v758_v36  ;;  %v747_v59 = vadd.f32 %v4248_v3, %v746_v63 }
 0x19c   :  { %4251 = vtanh.f32 %v5071_v16  ;;  %v751_v60 = vsel %vm750_vm8, %v4248_v3, %v747_v59 }
 0x19d   :  { %v756_v57 = vsel %vm753_vm9, %v755_v29, %v751_v60 }
 0x1a2   :  { %v4252_v23 = vpop.eup %4251 }
 0x1a3   :  { %v762_v58 = vmul.f32 %v4252_v23, %v756_v57  ;;  %v6874_v57 = vld [vmem:[#allocation7_spill] sm:$0xff] }
 0x1a5   :  { %v768_v17 = vpack.c.bf16 %v762_v58, %v762_v58 }
 0x1a7   :  { %777 = vmatmul.bf16.vlgmr.msrb.gmra.mxu0 %v768_v17  ;;  %790 = vmatmul.bf16.vlgmr.msrb.gmra.mxu1 %v768_v17 }
 0x1a8   :  { %803 = vmatmul.bf16.vlgmr.msrb.gmra.mxu2 %v768_v17  ;;  %816 = vmatmul.bf16.vlgmr.msrb.gmra.mxu3 %v768_v17 }
 0x1a9   :  { %1019 = vmatpush.bf16.msrb.mxu0 %v4575_v11  ;;  %1032 = vmatpush.bf16.msrb.mxu1 %v4589_v18 }
 0x1aa   :  { %1045 = vmatpush.bf16.msrb.mxu2 %v4609_v31  ;;  %1058 = vmatpush.bf16.msrb.mxu3 %v4594_v25 }
 0x1ad   :  { %1020 = vmatpush.bf16.msrb.mxu0 %v4598_v27  ;;  %1033 = vmatpush.bf16.msrb.mxu1 %v4607_v30 }
 0x1ae   :  { %1046 = vmatpush.bf16.msrb.mxu2 %v4649_v43  ;;  %1059 = vmatpush.bf16.msrb.mxu3 %v4633_v38 }
 0x1b1   :  { %1021 = vmatpush.bf16.msrb.mxu0 %v4637_v39  ;;  %1034 = vmatpush.bf16.msrb.mxu1 %v4647_v42 }
 0x1b2   :  { %1047 = vmatpush.bf16.msrb.mxu2 %v4685_v55  ;;  %1060 = vmatpush.bf16.msrb.mxu3 %v4670_v50 }
 0x1b5   :  { %1022 = vmatpush.bf16.msrb.mxu0 %v4673_v51  ;;  %1035 = vmatpush.bf16.msrb.mxu1 %v4683_v54 }
 0x1b6   :  { %1048 = vmatpush.bf16.msrb.mxu2 %v4727_v5  ;;  %1061 = vmatpush.bf16.msrb.mxu3 %v4712_v0 }
 0x1b9   :  { %1023 = vmatpush.bf16.msrb.mxu0 %v4715_v1  ;;  %1036 = vmatpush.bf16.msrb.mxu1 %v4725_v4 }
 0x1ba   :  { %1049 = vmatpush.bf16.msrb.mxu2 %v4763_v20  ;;  %1062 = vmatpush.bf16.msrb.mxu3 %v4748_v14 }
 0x1bd   :  { %1024 = vmatpush.bf16.msrb.mxu0 %v4751_v15  ;;  %1037 = vmatpush.bf16.msrb.mxu1 %v4761_v19 }
 0x1be   :  { %1050 = vmatpush.bf16.msrb.mxu2 %v4797_v34  ;;  %1063 = vmatpush.bf16.msrb.mxu3 %v4769_v21 }
 0x1c1   :  { %1025 = vmatpush.bf16.msrb.mxu0 %v4784_v26  ;;  %1038 = vmatpush.bf16.msrb.mxu1 %v4795_v33 }
 0x1c2   :  { %1051 = vmatpush.bf16.msrb.mxu2 %v4833_v52  ;;  %1064 = vmatpush.bf16.msrb.mxu3 %v4809_v40 }
 0x1c5   :  { %1026 = vmatpush.bf16.msrb.mxu0 %v4821_v46  ;;  %1039 = vmatpush.bf16.msrb.mxu1 %v4831_v49 }
 0x1c6   :  { %1052 = vmatpush.bf16.msrb.mxu2 %v4859_v62  ;;  %1065 = vmatpush.bf16.msrb.mxu3 %v4854_v61 }
 0x224   :  { %v778_v45 = vpop.f32.mrf.mxu0  ;;  %v791_v35 = vpop.f32.mrf.mxu1 }
 0x225   :  { %v821_v3 = vadd.f32 %v778_v45, %v6871_v56  ;;  %v822_v44 = vadd.f32 %v791_v35, %v6872_v6 }
 0x227   :  { %v3777_v13 = vmul.f32 -1.442695, %v821_v3  ;;  %v3778_v7 = vmul.f32 -1.442695, %v822_v44 }
 0x229   :  { %4253 = vpow2.f32 %v3777_v13 }
 0x22a   :  { %4255 = vpow2.f32 %v3778_v7 }
 0x22b   :  { %v804_v2 = vpop.f32.mrf.mxu2  ;;  %v817_v12 = vpop.f32.mrf.mxu3 }
 0x22c   :  { %v824_v8 = vadd.f32 %v817_v12, %v6873_v48  ;;  %v780_v53 = vpop.f32.mrf.mxu0  ;;  %v793_v28 = vpop.f32.mrf.mxu1  ;;  %v823_v58 = vadd.f32 %v804_v2, %v6874_v57 }
 0x22e   :  { %v3779_v47 = vmul.f32 -1.442695, %v824_v8 }
 0x22f   :  { %v4254_v32 = vpop.eup %4253 }
 0x230   :  { %v4256_v36 = vpop.eup %4255  ;;  %v828_v63 = vadd.f32 1.0, %v4254_v32  ;;  %4257 = vpow2.f32 %v3779_v47 }
 0x231   :  { %v847_v59 = vadd.f32 1.0, %v4256_v36 }
 0x232   :  { %4259 = vrcp.f32 %v828_v63  ;;  %v840_v6 = vand.u32 2147483648, %v828_v63  ;;  %v838_v7 = vand.u32 2147483647, %v828_v63  ;;  %vm834_vm12 = vweird.f32 %v828_v63 }
 0x233   :  { %4261 = vrcp.f32 %v847_v59  ;;  %v806_v10 = vpop.f32.mrf.mxu2  ;;  %v819_v9 = vpop.f32.mrf.mxu3  ;;  %v859_v44 = vand.u32 2147483648, %v847_v59  ;;  %v857_v48 = vand.u32 2147483647, %v847_v59  ;;  %vm853_vm13 = vweird.f32 %v847_v59 }
 0x234   :  { %v841_v2 = vor.u32 1.1754944e-38, %v840_v6  ;;  %vm839_vm0 = vcmp.eq.f32.partialorder %v838_v7, 8.507059e+37 }
 0x235   :  { %v860_v32 = vor.u32 1.1754944e-38, %v859_v44  ;;  %vm858_vm1 = vcmp.eq.f32.partialorder %v857_v48, 8.507059e+37  ;;  %v6876_v48 = vld [vmem:[#allocation10_spill] sm:$0xff] }
 0x236   :  { %v4258_v60 = vpop.eup %4257 }
 0x237   :  { %v867_v29 = vadd.f32 1.0, %v4258_v60 }
 0x238   :  { %v4260_v23 = vpop.eup %4259 }
 0x239   :  { %v4262_v17 = vpop.eup %4261  ;;  %v830_v45 = vmul.f32 %v4260_v23, %v828_v63  ;;  %4263 = vrcp.f32 %v867_v29  ;;  %vm835_vm10 = vweird.f32 %v4260_v23  ;;  %vm873_vm3 = vweird.f32 %v867_v29 }
 0x23a   :  { %v849_v35 = vmul.f32 %v4262_v17, %v847_v59  ;;  %4265 = vtanh.f32 %v823_v58  ;;  %vm854_vm11 = vweird.f32 %v4262_v17  ;;  %vm836_vm14 = vmor %vm834_vm12, %vm835_vm10 }
 0x23b   :  { %v831_v56 = vsub.f32 1.0, %v830_v45  ;;  %vm855_vm15 = vmor %vm853_vm13, %vm854_vm11 }
 0x23c   :  { %v850_v3 = vsub.f32 1.0, %v849_v35 }
 0x23d   :  { %v832_v13 = vmul.f32 %v4260_v23, %v831_v56 }
 0x23e   :  { %v851_v12 = vmul.f32 %v4262_v17, %v850_v3  ;;  %v879_v3 = vand.u32 2147483648, %v867_v29 }
 0x23f   :  { %v4264_v8 = vpop.eup %4263  ;;  %v833_v53 = vadd.f32 %v4260_v23, %v832_v13 }
 0x240   :  { %v852_v28 = vadd.f32 %v4262_v17, %v851_v12  ;;  %v869_v47 = vmul.f32 %v4264_v8, %v867_v29  ;;  %v4266_v10 = vpop.eup %4265  ;;  %vm874_vm2 = vweird.f32 %v4264_v8  ;;  %v880_v44 = vor.u32 1.1754944e-38, %v879_v3 }
 0x241   :  { %v837_v36 = vsel %vm836_vm14, %v4260_v23, %v833_v53  ;;  %v877_v23 = vand.u32 2147483647, %v867_v29  ;;  %vm875_vm4 = vmor %vm873_vm3, %vm874_vm2 }
 0x242   :  { %v842_v9 = vsel %vm839_vm0, %v841_v2, %v837_v36  ;;  %v856_v60 = vsel %vm855_vm15, %v4262_v17, %v852_v28  ;;  %v870_v57 = vsub.f32 1.0, %v869_v47 }
 0x243   :  { %v861_v58 = vsel %vm858_vm1, %v860_v32, %v856_v60  ;;  %v884_v45 = vmul.f32 %v4266_v10, %v842_v9  ;;  %vm878_vm5 = vcmp.eq.f32.partialorder %v877_v23, 8.507059e+37  ;;  %v6877_v10 = vld [vmem:[#allocation12_spill] sm:$0xff] }
 0x244   :  { %v883_v35 = vmul.f32 %v861_v58, %v5071_v16  ;;  %v871_v56 = vmul.f32 %v4264_v8, %v870_v57  ;;  %v6875_v16 = vld [vmem:[#allocation8_spill] sm:$0xff]  ;;  %v311_v9 = vadd.f32 %v6877_v10, %v4966_v41 }
 0x245   :  { %v224_v29 = vadd.f32 %v6875_v16, %v4950_v22 }
 0x246   :  { %v5111_v63 = vadd.f32 %v884_v45, %v883_v35  ;;  %v872_v59 = vadd.f32 %v4264_v8, %v871_v56 }
 0x248   :  { %4267 = vtanh.f32 %v5111_v63  ;;  %v876_v6 = vsel %vm875_vm4, %v4264_v8, %v872_v59  ;;  %v253_v8 = vadd.f32 %v6876_v48, %v4954_v24 }
 0x249   :  { %v881_v13 = vsel %vm878_vm5, %v880_v44, %v876_v6 }
 0x24e   :  { %v4268_v17 = vpop.eup %4267 }
 0x24f   :  { %v887_v7 = vmul.f32 %v4268_v17, %v881_v13 }
 0x251   :  { %v893_v12 = vpack.c.bf16 %v887_v7, %v887_v7  ;;  %v6878_v7 = vld [vmem:[#allocation11_spill] sm:$0xff] }
 0x253   :  { %902 = vmatmul.bf16.vlgmr.msra.gmra.mxu0 %v893_v12  ;;  %915 = vmatmul.bf16.vlgmr.msra.gmra.mxu1 %v893_v12 }
 0x254   :  { %928 = vmatmul.bf16.vlgmr.msra.gmra.mxu2 %v893_v12  ;;  %941 = vmatmul.bf16.vlgmr.msra.gmra.mxu3 %v893_v12  ;;  %v282_v12 = vadd.f32 %v6878_v7, %v4964_v37 }
 0x255   :  { %1144 = vmatpush.bf16.msra.mxu0 %v4575_v11  ;;  %1157 = vmatpush.bf16.msra.mxu1 %v4589_v18 }
 0x256   :  { %1170 = vmatpush.bf16.msra.mxu2 %v4609_v31  ;;  %1183 = vmatpush.bf16.msra.mxu3 %v4594_v25 }
 0x259   :  { %1145 = vmatpush.bf16.msra.mxu0 %v4598_v27  ;;  %1158 = vmatpush.bf16.msra.mxu1 %v4607_v30 }
 0x25a   :  { %1171 = vmatpush.bf16.msra.mxu2 %v4649_v43  ;;  %1184 = vmatpush.bf16.msra.mxu3 %v4633_v38 }
 0x25d   :  { %1146 = vmatpush.bf16.msra.mxu0 %v4637_v39  ;;  %1159 = vmatpush.bf16.msra.mxu1 %v4647_v42 }
 0x25e   :  { %1172 = vmatpush.bf16.msra.mxu2 %v4685_v55  ;;  %1185 = vmatpush.bf16.msra.mxu3 %v4670_v50 }
 0x261   :  { %1147 = vmatpush.bf16.msra.mxu0 %v4673_v51  ;;  %1160 = vmatpush.bf16.msra.mxu1 %v4683_v54 }
 0x262   :  { %1173 = vmatpush.bf16.msra.mxu2 %v4727_v5  ;;  %1186 = vmatpush.bf16.msra.mxu3 %v4712_v0 }
 0x265   :  { %1148 = vmatpush.bf16.msra.mxu0 %v4715_v1  ;;  %1161 = vmatpush.bf16.msra.mxu1 %v4725_v4 }
 0x266   :  { %1174 = vmatpush.bf16.msra.mxu2 %v4763_v20  ;;  %1187 = vmatpush.bf16.msra.mxu3 %v4748_v14 }
 0x269   :  { %1149 = vmatpush.bf16.msra.mxu0 %v4751_v15  ;;  %1162 = vmatpush.bf16.msra.mxu1 %v4761_v19 }
 0x26a   :  { %1175 = vmatpush.bf16.msra.mxu2 %v4797_v34  ;;  %1188 = vmatpush.bf16.msra.mxu3 %v4769_v21 }
 0x26d   :  { %1150 = vmatpush.bf16.msra.mxu0 %v4784_v26  ;;  %1163 = vmatpush.bf16.msra.mxu1 %v4795_v33 }
 0x26e   :  { %1176 = vmatpush.bf16.msra.mxu2 %v4833_v52  ;;  %1189 = vmatpush.bf16.msra.mxu3 %v4809_v40 }
 0x271   :  { %1151 = vmatpush.bf16.msra.mxu0 %v4821_v46  ;;  %1164 = vmatpush.bf16.msra.mxu1 %v4831_v49 }
 0x272   :  { %1177 = vmatpush.bf16.msra.mxu2 %v4859_v62  ;;  %1190 = vmatpush.bf16.msra.mxu3 %v4854_v61 }
 0x2d0   :  { %v903_v53 = vpop.f32.mrf.mxu0  ;;  %v916_v2 = vpop.f32.mrf.mxu1 }
 0x2d1   :  { %v946_v28 = vadd.f32 %v903_v53, %v224_v29  ;;  %v947_v47 = vadd.f32 %v916_v2, %v253_v8 }
 0x2d3   :  { %v3780_v32 = vmul.f32 -1.442695, %v946_v28  ;;  %v3781_v36 = vmul.f32 -1.442695, %v947_v47 }
 0x2d5   :  { %4269 = vpow2.f32 %v3780_v32 }
 0x2d6   :  { %4271 = vpow2.f32 %v3781_v36 }
 0x2d7   :  { %v929_v60 = vpop.f32.mrf.mxu2  ;;  %v942_v57 = vpop.f32.mrf.mxu3 }
 0x2d8   :  { %v949_v58 = vadd.f32 %v942_v57, %v311_v9  ;;  %v905_v45 = vpop.f32.mrf.mxu0  ;;  %v918_v35 = vpop.f32.mrf.mxu1  ;;  %v948_v48 = vadd.f32 %v929_v60, %v282_v12 }
 0x2da   :  { %v3782_v56 = vmul.f32 -1.442695, %v949_v58 }
 0x2db   :  { %v4270_v59 = vpop.eup %4269 }
 0x2dc   :  { %v4272_v3 = vpop.eup %4271  ;;  %v953_v23 = vadd.f32 1.0, %v4270_v59  ;;  %4273 = vpow2.f32 %v3782_v56 }
 0x2dd   :  { %v972_v6 = vadd.f32 1.0, %v4272_v3 }
 0x2de   :  { %4275 = vrcp.f32 %v953_v23  ;;  %v965_v32 = vand.u32 2147483648, %v953_v23  ;;  %v963_v9 = vand.u32 2147483647, %v953_v23  ;;  %vm959_vm8 = vweird.f32 %v953_v23 }
 0x2df   :  { %4277 = vrcp.f32 %v972_v6  ;;  %v931_v44 = vpop.f32.mrf.mxu2  ;;  %v944_v17 = vpop.f32.mrf.mxu3  ;;  %v984_v36 = vand.u32 2147483648, %v972_v6  ;;  %v982_v58 = vand.u32 2147483647, %v972_v6  ;;  %vm978_vm9 = vweird.f32 %v972_v6 }
 0x2e0   :  { %v966_v60 = vor.u32 1.1754944e-38, %v965_v32  ;;  %vm964_vm12 = vcmp.eq.f32.partialorder %v963_v9, 8.507059e+37 }
 0x2e1   :  { %v985_v3 = vor.u32 1.1754944e-38, %v984_v36  ;;  %vm983_vm13 = vcmp.eq.f32.partialorder %v982_v58, 8.507059e+37  ;;  %v6879_v58 = vld [vmem:[#allocation13_spill] sm:$0xff] }
 0x2e2   :  { %v4274_v13 = vpop.eup %4273 }
 0x2e3   :  { %v992_v16 = vadd.f32 1.0, %v4274_v13 }
 0x2e4   :  { %v4276_v29 = vpop.eup %4275 }
 0x2e5   :  { %v4278_v8 = vpop.eup %4277  ;;  %v955_v53 = vmul.f32 %v4276_v29, %v953_v23  ;;  %4279 = vrcp.f32 %v992_v16  ;;  %vm960_vm6 = vweird.f32 %v4276_v29  ;;  %vm998_vm15 = vweird.f32 %v992_v16 }
 0x2e6   :  { %v974_v2 = vmul.f32 %v4278_v8, %v972_v6  ;;  %4281 = vtanh.f32 %v948_v48  ;;  %vm979_vm7 = vweird.f32 %v4278_v8  ;;  %vm961_vm10 = vmor %vm959_vm8, %vm960_vm6 }
 0x2e7   :  { %v956_v28 = vsub.f32 1.0, %v955_v53  ;;  %vm980_vm11 = vmor %vm978_vm9, %vm979_vm7 }
 0x2e8   :  { %v975_v47 = vsub.f32 1.0, %v974_v2 }
 0x2e9   :  { %v957_v10 = vmul.f32 %v4276_v29, %v956_v28 }
 0x2ea   :  { %v976_v57 = vmul.f32 %v4278_v8, %v975_v47  ;;  %v1004_v47 = vand.u32 2147483648, %v992_v16 }
 0x2eb   :  { %v4280_v45 = vpop.eup %4279  ;;  %v958_v35 = vadd.f32 %v4276_v29, %v957_v10 }
 0x2ec   :  { %v977_v56 = vadd.f32 %v4278_v8, %v976_v57  ;;  %v994_v59 = vmul.f32 %v4280_v45, %v992_v16  ;;  %v4282_v17 = vpop.eup %4281  ;;  %vm999_vm14 = vweird.f32 %v4280_v45  ;;  %v1005_v36 = vor.u32 1.1754944e-38, %v1004_v47 }
 0x2ed   :  { %v962_v44 = vsel %vm961_vm10, %v4276_v29, %v958_v35  ;;  %v1002_v29 = vand.u32 2147483647, %v992_v16  ;;  %vm1000_vm0 = vmor %vm998_vm15, %vm999_vm14  ;;  %v6880_v35 = vld [vmem:[#allocation14_spill] sm:$0xff] }
 0x2ee   :  { %v967_v13 = vsel %vm964_vm12, %v966_v60, %v962_v44  ;;  %v981_v7 = vsel %vm980_vm11, %v4278_v8, %v977_v56  ;;  %v995_v12 = vsub.f32 1.0, %v994_v59 }
 0x2ef   :  { %v986_v48 = vsel %vm983_vm13, %v985_v3, %v981_v7  ;;  %v1009_v53 = vmul.f32 %v4282_v17, %v967_v13  ;;  %vm1003_vm1 = vcmp.eq.f32.partialorder %v1002_v29, 8.507059e+37  ;;  %v6881_v17 = vld [vmem:[#allocation17_spill] sm:$0xff] }
 0x2f0   :  { %v1008_v2 = vmul.f32 %v986_v48, %v5111_v63  ;;  %v996_v28 = vmul.f32 %v4280_v45, %v995_v12 }
 0x2f2   :  { %v5155_v23 = vadd.f32 %v1009_v53, %v1008_v2  ;;  %v997_v6 = vadd.f32 %v4280_v45, %v996_v28 }
 0x2f4   :  { %4283 = vtanh.f32 %v5155_v23  ;;  %v1001_v32 = vsel %vm1000_vm0, %v4280_v45, %v997_v6 }
 0x2f5   :  { %v1006_v10 = vsel %vm1003_vm1, %v1005_v36, %v1001_v32 }
 0x2fa   :  { %v4284_v8 = vpop.eup %4283 }
 0x2fb   :  { %v1012_v9 = vmul.f32 %v4284_v8, %v1006_v10  ;;  %v6882_v10 = vld [vmem:[#allocation15_spill] sm:$0xff] }
 0x2fd   :  { %v1018_v57 = vpack.c.bf16 %v1012_v9, %v1012_v9 }
 0x2ff   :  { %1027 = vmatmul.bf16.vlgmr.msrb.gmra.mxu0 %v1018_v57  ;;  %1040 = vmatmul.bf16.vlgmr.msrb.gmra.mxu1 %v1018_v57 }
 0x300   :  { %1053 = vmatmul.bf16.vlgmr.msrb.gmra.mxu2 %v1018_v57  ;;  %1066 = vmatmul.bf16.vlgmr.msrb.gmra.mxu3 %v1018_v57 }
 0x301   :  { %1269 = vmatpush.bf16.msrb.mxu0 %v4575_v11  ;;  %1282 = vmatpush.bf16.msrb.mxu1 %v4589_v18 }
 0x302   :  { %1295 = vmatpush.bf16.msrb.mxu2 %v4609_v31  ;;  %1308 = vmatpush.bf16.msrb.mxu3 %v4594_v25 }
 0x305   :  { %1270 = vmatpush.bf16.msrb.mxu0 %v4598_v27  ;;  %1283 = vmatpush.bf16.msrb.mxu1 %v4607_v30 }
 0x306   :  { %1296 = vmatpush.bf16.msrb.mxu2 %v4649_v43  ;;  %1309 = vmatpush.bf16.msrb.mxu3 %v4633_v38 }
 0x309   :  { %1271 = vmatpush.bf16.msrb.mxu0 %v4637_v39  ;;  %1284 = vmatpush.bf16.msrb.mxu1 %v4647_v42 }
 0x30a   :  { %1297 = vmatpush.bf16.msrb.mxu2 %v4685_v55  ;;  %1310 = vmatpush.bf16.msrb.mxu3 %v4670_v50 }
 0x30d   :  { %1272 = vmatpush.bf16.msrb.mxu0 %v4673_v51  ;;  %1285 = vmatpush.bf16.msrb.mxu1 %v4683_v54 }
 0x30e   :  { %1298 = vmatpush.bf16.msrb.mxu2 %v4727_v5  ;;  %1311 = vmatpush.bf16.msrb.mxu3 %v4712_v0 }
 0x311   :  { %1273 = vmatpush.bf16.msrb.mxu0 %v4715_v1  ;;  %1286 = vmatpush.bf16.msrb.mxu1 %v4725_v4 }
 0x312   :  { %1299 = vmatpush.bf16.msrb.mxu2 %v4763_v20  ;;  %1312 = vmatpush.bf16.msrb.mxu3 %v4748_v14 }
 0x315   :  { %1274 = vmatpush.bf16.msrb.mxu0 %v4751_v15  ;;  %1287 = vmatpush.bf16.msrb.mxu1 %v4761_v19 }
 0x316   :  { %1300 = vmatpush.bf16.msrb.mxu2 %v4797_v34  ;;  %1313 = vmatpush.bf16.msrb.mxu3 %v4769_v21 }
 0x319   :  { %1275 = vmatpush.bf16.msrb.mxu0 %v4784_v26  ;;  %1288 = vmatpush.bf16.msrb.mxu1 %v4795_v33 }
 0x31a   :  { %1301 = vmatpush.bf16.msrb.mxu2 %v4833_v52  ;;  %1314 = vmatpush.bf16.msrb.mxu3 %v4809_v40 }
 0x31d   :  { %1276 = vmatpush.bf16.msrb.mxu0 %v4821_v46  ;;  %1289 = vmatpush.bf16.msrb.mxu1 %v4831_v49 }
 0x31e   :  { %1302 = vmatpush.bf16.msrb.mxu2 %v4859_v62  ;;  %1315 = vmatpush.bf16.msrb.mxu3 %v4854_v61 }
 0x37c   :  { %v1028_v63 = vpop.f32.mrf.mxu0  ;;  %v1041_v16 = vpop.f32.mrf.mxu1 }
 0x37d   :  { %v1071_v45 = vadd.f32 %v1028_v63, %v6879_v58  ;;  %v1072_v60 = vadd.f32 %v1041_v16, %v6880_v35 }
 0x37f   :  { %v3783_v56 = vmul.f32 -1.442695, %v1071_v45  ;;  %v3784_v59 = vmul.f32 -1.442695, %v1072_v60 }
 0x381   :  { %4285 = vpow2.f32 %v3783_v56 }
 0x382   :  { %4287 = vpow2.f32 %v3784_v59 }
 0x383   :  { %v1054_v3 = vpop.f32.mrf.mxu2  ;;  %v1067_v44 = vpop.f32.mrf.mxu3 }
 0x384   :  { %v1074_v13 = vadd.f32 %v1067_v44, %v6881_v17  ;;  %v1030_v7 = vpop.f32.mrf.mxu0  ;;  %v1043_v12 = vpop.f32.mrf.mxu1  ;;  %v1073_v9 = vadd.f32 %v1054_v3, %v6882_v10 }
 0x386   :  { %v3785_v48 = vmul.f32 -1.442695, %v1074_v13 }
 0x387   :  { %v4286_v53 = vpop.eup %4285 }
 0x388   :  { %v4288_v2 = vpop.eup %4287  ;;  %v1078_v28 = vadd.f32 1.0, %v4286_v53  ;;  %4289 = vpow2.f32 %v3785_v48 }
 0x389   :  { %v1097_v6 = vadd.f32 1.0, %v4288_v2 }
 0x38a   :  { %4291 = vrcp.f32 %v1078_v28  ;;  %v1090_v35 = vand.u32 2147483648, %v1078_v28  ;;  %v1088_v59 = vand.u32 2147483647, %v1078_v28  ;;  %vm1084_vm4 = vweird.f32 %v1078_v28 }
 0x38b   :  { %4293 = vrcp.f32 %v1097_v6  ;;  %v1056_v47 = vpop.f32.mrf.mxu2  ;;  %v1069_v29 = vpop.f32.mrf.mxu3  ;;  %v1109_v60 = vand.u32 2147483648, %v1097_v6  ;;  %v1107_v17 = vand.u32 2147483647, %v1097_v6  ;;  %vm1103_vm5 = vweird.f32 %v1097_v6 }
 0x38c   :  { %v1091_v3 = vor.u32 1.1754944e-38, %v1090_v35  ;;  %vm1089_vm8 = vcmp.eq.f32.partialorder %v1088_v59, 8.507059e+37 }
 0x38d   :  { %v1110_v53 = vor.u32 1.1754944e-38, %v1109_v60  ;;  %vm1108_vm9 = vcmp.eq.f32.partialorder %v1107_v17, 8.507059e+37 }
 0x38e   :  { %v4290_v32 = vpop.eup %4289 }
 0x38f   :  { %v1117_v36 = vadd.f32 1.0, %v4290_v32 }
 0x390   :  { %v4292_v8 = vpop.eup %4291 }
 0x391   :  { %v4294_v57 = vpop.eup %4293  ;;  %v1080_v63 = vmul.f32 %v4292_v8, %v1078_v28  ;;  %4295 = vrcp.f32 %v1117_v36  ;;  %vm1085_vm2 = vweird.f32 %v4292_v8  ;;  %vm1123_vm11 = vweird.f32 %v1117_v36 }
 0x392   :  { %v1099_v16 = vmul.f32 %v4294_v57, %v1097_v6  ;;  %4297 = vtanh.f32 %v1073_v9  ;;  %vm1104_vm3 = vweird.f32 %v4294_v57  ;;  %vm1086_vm6 = vmor %vm1084_vm4, %vm1085_vm2 }
 0x393   :  { %v1081_v58 = vsub.f32 1.0, %v1080_v63  ;;  %vm1105_vm7 = vmor %vm1103_vm5, %vm1104_vm3 }
 0x394   :  { %v1100_v45 = vsub.f32 1.0, %v1099_v16 }
 0x395   :  { %v1082_v56 = vmul.f32 %v4292_v8, %v1081_v58 }
 0x396   :  { %v1101_v44 = vmul.f32 %v4294_v57, %v1100_v45  ;;  %v1129_v45 = vand.u32 2147483648, %v1117_v36 }
 0x397   :  { %v4296_v13 = vpop.eup %4295  ;;  %v1083_v7 = vadd.f32 %v4292_v8, %v1082_v56 }
 0x398   :  { %v1102_v12 = vadd.f32 %v4294_v57, %v1101_v44  ;;  %v1119_v48 = vmul.f32 %v4296_v13, %v1117_v36  ;;  %v4298_v47 = vpop.eup %4297  ;;  %vm1124_vm10 = vweird.f32 %v4296_v13  ;;  %v1130_v60 = vor.u32 1.1754944e-38, %v1129_v45 }
 0x399   :  { %v1087_v2 = vsel %vm1086_vm6, %v4292_v8, %v1083_v7  ;;  %v1127_v8 = vand.u32 2147483647, %v1117_v36  ;;  %vm1125_vm12 = vmor %vm1123_vm11, %vm1124_vm10 }
 0x39a   :  { %v1092_v29 = vsel %vm1089_vm8, %v1091_v3, %v1087_v2  ;;  %v1106_v32 = vsel %vm1105_vm7, %v4294_v57, %v1102_v12  ;;  %v1120_v10 = vsub.f32 1.0, %v1119_v48 }
 0x39b   :  { %v1111_v9 = vsel %vm1108_vm9, %v1110_v53, %v1106_v32  ;;  %v1134_v63 = vmul.f32 %v4298_v47, %v1092_v29  ;;  %vm1128_vm13 = vcmp.eq.f32.partialorder %v1127_v8, 8.507059e+37 }
 0x39c   :  { %v1133_v16 = vmul.f32 %v1111_v9, %v5155_v23  ;;  %v1121_v58 = vmul.f32 %v4296_v13, %v1120_v10 }
 0x39e   :  { %v5195_v28 = vadd.f32 %v1134_v63, %v1133_v16  ;;  %v1122_v6 = vadd.f32 %v4296_v13, %v1121_v58 }
 0x3a0   :  { %4299 = vtanh.f32 %v5195_v28  ;;  %v1126_v35 = vsel %vm1125_vm12, %v4296_v13, %v1122_v6 }
 0x3a1   :  { %v1131_v56 = vsel %vm1128_vm13, %v1130_v60, %v1126_v35 }
 0x3a6   :  { %v4300_v57 = vpop.eup %4299 }
 0x3a7   :  { %v1137_v59 = vmul.f32 %v4300_v57, %v1131_v56 }
 0x3a9   :  { %v1143_v44 = vpack.c.bf16 %v1137_v59, %v1137_v59 }
 0x3ab   :  { %1152 = vmatmul.bf16.vlgmr.msra.gmra.mxu0 %v1143_v44  ;;  %1165 = vmatmul.bf16.vlgmr.msra.gmra.mxu1 %v1143_v44 }
 0x3ac   :  { %1178 = vmatmul.bf16.vlgmr.msra.gmra.mxu2 %v1143_v44  ;;  %1191 = vmatmul.bf16.vlgmr.msra.gmra.mxu3 %v1143_v44 }
 0x3ad   :  { %1394 = vmatpush.bf16.msra.mxu0 %v4575_v11  ;;  %1407 = vmatpush.bf16.msra.mxu1 %v4589_v18  ;;  %v6883_v11 = vld [vmem:[#allocation16_spill] sm:$0xff] }
 0x3ae   :  { %1420 = vmatpush.bf16.msra.mxu2 %v4609_v31  ;;  %1433 = vmatpush.bf16.msra.mxu3 %v4594_v25  ;;  %v229_v18 = vadd.f32 %v6883_v11, %v4950_v22  ;;  %v6884_v25 = vld [vmem:[#allocation18_spill] sm:$0xff] }
 0x3b1   :  { %1395 = vmatpush.bf16.msra.mxu0 %v4598_v27  ;;  %1408 = vmatpush.bf16.msra.mxu1 %v4607_v30  ;;  %v258_v27 = vadd.f32 %v6884_v25, %v4954_v24 }
 0x3b2   :  { %1421 = vmatpush.bf16.msra.mxu2 %v4649_v43  ;;  %1434 = vmatpush.bf16.msra.mxu3 %v4633_v38 }
 0x3b5   :  { %1396 = vmatpush.bf16.msra.mxu0 %v4637_v39  ;;  %1409 = vmatpush.bf16.msra.mxu1 %v4647_v42 }
 0x3b6   :  { %1422 = vmatpush.bf16.msra.mxu2 %v4685_v55  ;;  %1435 = vmatpush.bf16.msra.mxu3 %v4670_v50  ;;  %v6885_v50 = vld [vmem:[#allocation20_spill] sm:$0xff] }
 0x3b9   :  { %1397 = vmatpush.bf16.msra.mxu0 %v4673_v51  ;;  %1410 = vmatpush.bf16.msra.mxu1 %v4683_v54  ;;  %v316_v51 = vadd.f32 %v6885_v50, %v4966_v41  ;;  %v6888_v50 = vld [vmem:[#allocation22_spill] sm:$0xff] }
 0x3ba   :  { %1423 = vmatpush.bf16.msra.mxu2 %v4727_v5  ;;  %1436 = vmatpush.bf16.msra.mxu3 %v4712_v0 }
 0x3bd   :  { %1398 = vmatpush.bf16.msra.mxu0 %v4715_v1  ;;  %1411 = vmatpush.bf16.msra.mxu1 %v4725_v4 }
 0x3be   :  { %1424 = vmatpush.bf16.msra.mxu2 %v4763_v20  ;;  %1437 = vmatpush.bf16.msra.mxu3 %v4748_v14 }
 0x3c1   :  { %1399 = vmatpush.bf16.msra.mxu0 %v4751_v15  ;;  %1412 = vmatpush.bf16.msra.mxu1 %v4761_v19 }
 0x3c2   :  { %1425 = vmatpush.bf16.msra.mxu2 %v4797_v34  ;;  %1438 = vmatpush.bf16.msra.mxu3 %v4769_v21  ;;  %v6886_v34 = vld [vmem:[#allocation19_spill] sm:$0xff] }
 0x3c5   :  { %1400 = vmatpush.bf16.msra.mxu0 %v4784_v26  ;;  %1413 = vmatpush.bf16.msra.mxu1 %v4795_v33 }
 0x3c6   :  { %1426 = vmatpush.bf16.msra.mxu2 %v4833_v52  ;;  %1439 = vmatpush.bf16.msra.mxu3 %v4809_v40  ;;  %v287_v40 = vadd.f32 %v6886_v34, %v4964_v37 }
 0x3c9   :  { %1401 = vmatpush.bf16.msra.mxu0 %v4821_v46  ;;  %1414 = vmatpush.bf16.msra.mxu1 %v4831_v49 }
 0x3ca   :  { %1427 = vmatpush.bf16.msra.mxu2 %v4859_v62  ;;  %1440 = vmatpush.bf16.msra.mxu3 %v4854_v61 }
 0x428   :  { %v1153_v30 = vpop.f32.mrf.mxu0  ;;  %v1166_v31 = vpop.f32.mrf.mxu1 }
 0x429   :  { %v1196_v38 = vadd.f32 %v1153_v30, %v229_v18  ;;  %v1197_v39 = vadd.f32 %v1166_v31, %v258_v27 }
 0x42b   :  { %v3786_v42 = vmul.f32 -1.442695, %v1196_v38  ;;  %v3787_v43 = vmul.f32 -1.442695, %v1197_v39 }
 0x42d   :  { %4301 = vpow2.f32 %v3786_v42  ;;  %v6887_v42 = vld [vmem:[#allocation21_spill] sm:$0xff] }
 0x42e   :  { %4303 = vpow2.f32 %v3787_v43 }
 0x42f   :  { %v1179_v54 = vpop.f32.mrf.mxu2  ;;  %v1192_v55 = vpop.f32.mrf.mxu3 }
 0x430   :  { %v1199_v0 = vadd.f32 %v1192_v55, %v316_v51  ;;  %v1155_v1 = vpop.f32.mrf.mxu0  ;;  %v1168_v4 = vpop.f32.mrf.mxu1  ;;  %v1198_v52 = vadd.f32 %v1179_v54, %v287_v40 }
 0x431   :  { %v6889_v4 = vld [vmem:[#allocation25_spill] sm:$0xff] }
 0x432   :  { %v3788_v5 = vmul.f32 -1.442695, %v1199_v0 }
 0x433   :  { %v4302_v14 = vpop.eup %4301 }
 0x434   :  { %v4304_v15 = vpop.eup %4303  ;;  %v1203_v19 = vadd.f32 1.0, %v4302_v14  ;;  %4305 = vpow2.f32 %v3788_v5 }
 0x435   :  { %v1222_v20 = vadd.f32 1.0, %v4304_v15 }
 0x436   :  { %4307 = vrcp.f32 %v1203_v19  ;;  %v1215_v13 = vand.u32 2147483648, %v1203_v19  ;;  %v1213_v12 = vand.u32 2147483647, %v1203_v19  ;;  %vm1209_vm0 = vweird.f32 %v1203_v19 }
 0x437   :  { %4309 = vrcp.f32 %v1222_v20  ;;  %v1181_v21 = vpop.f32.mrf.mxu2  ;;  %v1194_v26 = vpop.f32.mrf.mxu3  ;;  %v1234_v7 = vand.u32 2147483648, %v1222_v20  ;;  %v1232_v53 = vand.u32 2147483647, %v1222_v20  ;;  %vm1228_vm1 = vweird.f32 %v1222_v20 }
 0x438   :  { %v1216_v29 = vor.u32 1.1754944e-38, %v1215_v13  ;;  %vm1214_vm4 = vcmp.eq.f32.partialorder %v1213_v12, 8.507059e+37 }
 0x439   :  { %v1235_v9 = vor.u32 1.1754944e-38, %v1234_v7  ;;  %vm1233_vm5 = vcmp.eq.f32.partialorder %v1232_v53, 8.507059e+37  ;;  %v6890_v7 = vld [vmem:[#allocation23_spill] sm:$0xff] }
 0x43a   :  { %v4306_v33 = vpop.eup %4305 }
 0x43b   :  { %v1242_v46 = vadd.f32 1.0, %v4306_v33 }
 0x43c   :  { %v4308_v49 = vpop.eup %4307 }
 0x43d   :  { %v4310_v61 = vpop.eup %4309  ;;  %v1205_v62 = vmul.f32 %v4308_v49, %v1203_v19  ;;  %4311 = vrcp.f32 %v1242_v46  ;;  %vm1210_vm14 = vweird.f32 %v4308_v49  ;;  %v1254_v44 = vand.u32 2147483648, %v1242_v46 }
 0x43e   :  { %v1224_v23 = vmul.f32 %v4310_v61, %v1222_v20  ;;  %4313 = vtanh.f32 %v1198_v52  ;;  %vm1229_vm15 = vweird.f32 %v4310_v61  ;;  %vm1211_vm2 = vmor %vm1209_vm0, %vm1210_vm14  ;;  %vm1248_vm7 = vweird.f32 %v1242_v46 }
 0x43f   :  { %v1206_v36 = vsub.f32 1.0, %v1205_v62  ;;  %vm1230_vm3 = vmor %vm1228_vm1, %vm1229_vm15  ;;  %v1252_v11 = vand.u32 2147483647, %v1242_v46  ;;  %v1255_v25 = vor.u32 1.1754944e-38, %v1254_v44  ;;  %v3895_v62 = vld [vmem:[%s6718_s4 + $0xd0] sm:$0xf0] }
 0x440   :  { %v1225_v17 = vsub.f32 1.0, %v1224_v23 }
 0x441   :  { %v1207_v3 = vmul.f32 %v4308_v49, %v1206_v36  ;;  %vm1253_vm9 = vcmp.eq.f32.partialorder %v1252_v11, 8.507059e+37 }
 0x442   :  { %v1226_v48 = vmul.f32 %v4310_v61, %v1225_v17 }
 0x443   :  { %v4312_v2 = vpop.eup %4311  ;;  %v1208_v47 = vadd.f32 %v4308_v49, %v1207_v3 }
 0x444   :  { %v1227_v32 = vadd.f32 %v4310_v61, %v1226_v48  ;;  %v1244_v10 = vmul.f32 %v4312_v2, %v1242_v46  ;;  %v4314_v16 = vpop.eup %4313  ;;  %vm1249_vm6 = vweird.f32 %v4312_v2  ;;  %v4174_v46 = vld [vmem:[%s6718_s4 + $0xe4] sm:$0xf] }
 0x445   :  { %v1212_v63 = vsel %vm1211_vm2, %v4308_v49, %v1208_v47  ;;  %vm1250_vm8 = vmor %vm1248_vm7, %vm1249_vm6  ;;  %v3911_v49 = vld [vmem:[%s6718_s4 + $0xf0] sm:$0xf0] }
 0x446   :  { %v1217_v58 = vsel %vm1214_vm4, %v1216_v29, %v1212_v63  ;;  %v1231_v6 = vsel %vm1230_vm3, %v4310_v61, %v1227_v32  ;;  %v1245_v45 = vsub.f32 1.0, %v1244_v10  ;;  %v5251_v52 = vor.u32 %v4174_v46, %v3911_v49  ;;  %v4170_v61 = vld [vmem:[%s6718_s4 + $0xc4] sm:$0xf]  ;;  %v4172_v46 = vld [vmem:[%s6718_s4 + $0xcc] sm:$0xf0] }
 0x447   :  { %v1236_v8 = vsel %vm1233_vm5, %v1235_v9, %v1231_v6  ;;  %v1259_v35 = vmul.f32 %v4314_v16, %v1217_v58  ;;  %v5260_v17 = vor.u32 %v4170_v61, %v3895_v62  ;;  %v4162_v49 = vld [vmem:[%s6718_s4 + $0x84] sm:$0xf]  ;;  %v3863_v62 = vld [vmem:[%s6718_s4 + $0x90] sm:$0xf0] }
 0x448   :  { %v1258_v60 = vmul.f32 %v1236_v8, %v5195_v28  ;;  %v1246_v57 = vmul.f32 %v4312_v2, %v1245_v45 }
 0x44a   :  { %v5239_v56 = vadd.f32 %v1259_v35, %v1258_v60  ;;  %v1247_v59 = vadd.f32 %v4312_v2, %v1246_v57 }
 0x44c   :  { %4315 = vtanh.f32 %v5239_v56  ;;  %v1251_v18 = vsel %vm1250_vm8, %v4312_v2, %v1247_v59 }
 0x44d   :  { %v1256_v30 = vsel %vm1253_vm9, %v1255_v25, %v1251_v18 }
 0x452   :  { %v4316_v27 = vpop.eup %4315 }
 0x453   :  { %v1262_v31 = vmul.f32 %v4316_v27, %v1256_v30 }
 0x455   :  { %v1268_v38 = vpack.c.bf16 %v1262_v31, %v1262_v31 }
 0x457   :  { %1277 = vmatmul.bf16.vlgmr.msrb.gmra.mxu0 %v1268_v38  ;;  %1290 = vmatmul.bf16.vlgmr.msrb.gmra.mxu1 %v1268_v38 }
 0x458   :  { %1303 = vmatmul.bf16.vlgmr.msrb.gmra.mxu2 %v1268_v38  ;;  %1316 = vmatmul.bf16.vlgmr.msrb.gmra.mxu3 %v1268_v38 }
 0x459   :  { %1861 = vmatpush.bf16.msrb.mxu2 %v5251_v52 }
 0x45d   :  { %1862 = vmatpush.bf16.msrb.mxu2 %v5260_v17 }
 0x4d4   :  { %v1278_v28 = vpop.f32.mrf.mxu0  ;;  %v1291_v39 = vpop.f32.mrf.mxu1 }
 0x4d5   :  { %v1321_v43 = vadd.f32 %v1278_v28, %v6887_v42  ;;  %v1322_v51 = vadd.f32 %v1291_v39, %v6888_v50 }
 0x4d7   :  { %v3789_v54 = vmul.f32 -1.442695, %v1321_v43  ;;  %v3790_v55 = vmul.f32 -1.442695, %v1322_v51 }
 0x4d9   :  { %4317 = vpow2.f32 %v3789_v54 }
 0x4da   :  { %4319 = vpow2.f32 %v3790_v55 }
 0x4db   :  { %v1304_v0 = vpop.f32.mrf.mxu2  ;;  %v1317_v1 = vpop.f32.mrf.mxu3 }
 0x4dc   :  { %v1324_v5 = vadd.f32 %v1317_v1, %v6889_v4  ;;  %v1280_v14 = vpop.f32.mrf.mxu0  ;;  %v1293_v15 = vpop.f32.mrf.mxu1  ;;  %v1323_v3 = vadd.f32 %v1304_v0, %v6890_v7  ;;  %v4176_v1 = vld [vmem:[%s6718_s4 + $0xec] sm:$0xf0]  ;;  %v4166_v4 = vld [vmem:[%s6718_s4 + $0xa4] sm:$0xf] }
 0x4dd   :  { %v3879_v14 = vld [vmem:[%s6718_s4 + $0xb0] sm:$0xf0]  ;;  %v4202_v7 = vld [vmem:[%s6718_s4 + $0x1c4] sm:$0xf] }
 0x4de   :  { %v3791_v19 = vmul.f32 -1.442695, %v1324_v5  ;;  %v5282_v15 = vor.u32 %v4166_v4, %v3879_v14  ;;  %v3829_v14 = vld [vmem:[%s6718_s4 + $0x40] sm:$0xf] }
 0x4df   :  { %v4318_v20 = vpop.eup %4317 }
 0x4e0   :  { %v4320_v21 = vpop.eup %4319  ;;  %v1328_v26 = vadd.f32 1.0, %v4318_v20  ;;  %4321 = vpow2.f32 %v3791_v19  ;;  %v4037_v19 = vld [vmem:[%s6718_s4 + $0x1e0] sm:$0xf]  ;;  %v4208_v20 = vld [vmem:[%s6718_s4 + $0x1ec] sm:$0xf0]  ;;  %1863 = vmatpush.bf16.msrb.mxu2 %v5282_v15 }
 0x4e1   :  { %v1347_v33 = vadd.f32 1.0, %v4320_v21  ;;  %v4206_v21 = vld [vmem:[%s6718_s4 + $0x1e4] sm:$0xf] }
 0x4e2   :  { %4323 = vrcp.f32 %v1328_v26  ;;  %v1340_v29 = vand.u32 2147483648, %v1328_v26  ;;  %v1338_v9 = vand.u32 2147483647, %v1328_v26  ;;  %vm1334_vm12 = vweird.f32 %v1328_v26 }
 0x4e3   :  { %4325 = vrcp.f32 %v1347_v33  ;;  %v1306_v34 = vpop.f32.mrf.mxu2  ;;  %v1319_v40 = vpop.f32.mrf.mxu3  ;;  %v1359_v32 = vand.u32 2147483648, %v1347_v33  ;;  %v1357_v16 = vand.u32 2147483647, %v1347_v33  ;;  %vm1353_vm13 = vweird.f32 %v1347_v33 }
 0x4e4   :  { %v1341_v45 = vor.u32 1.1754944e-38, %v1340_v29  ;;  %vm1339_vm0 = vcmp.eq.f32.partialorder %v1338_v9, 8.507059e+37  ;;  %v3893_v40 = vld [vmem:[%s6718_s4 + $0xc0] sm:$0xf] }
 0x4e5   :  { %v1360_v60 = vor.u32 1.1754944e-38, %v1359_v32  ;;  %vm1358_vm1 = vcmp.eq.f32.partialorder %v1357_v16, 8.507059e+37  ;;  %v5312_v61 = vor.u32 %v4172_v46, %v3893_v40  ;;  %v3847_v32 = vld [vmem:[%s6718_s4 + $0x70] sm:$0xf0]  ;;  %v4005_v9 = vld [vmem:[%s6718_s4 + $0x1a0] sm:$0xf] }
 0x4e6   :  { %v4322_v23 = vpop.eup %4321  ;;  %v4198_v16 = vld [vmem:[%s6718_s4 + $0x1a4] sm:$0xf]  ;;  %v4175_v40 = vld [vmem:[%s6718_s4 + $0xec] sm:$0xf]  ;;  %v3919_v46 = vld [vmem:[%s6718_s4 + $0xf8] sm:$0xf0] }
 0x4e7   :  { %v1367_v36 = vadd.f32 1.0, %v4322_v23  ;;  %v5318_v23 = vor.u32 %v4162_v49, %v3863_v62  ;;  %v5470_v62 = vor.u32 %v4175_v40, %v3919_v46  ;;  %v4045_v40 = vld [vmem:[%s6718_s4 + $0x1e8] sm:$0xf] }
 0x4e8   :  { %v4324_v13 = vpop.eup %4323  ;;  %v6906_v46 = vld [vmem:[#allocation24_spill] sm:$0xff] }
 0x4e9   :  { %v4326_v12 = vpop.eup %4325  ;;  %v1330_v48 = vmul.f32 %v4324_v13, %v1328_v26  ;;  %4327 = vrcp.f32 %v1367_v36  ;;  %vm1335_vm10 = vweird.f32 %v4324_v13  ;;  %v1379_v39 = vand.u32 2147483648, %v1367_v36  ;;  %1864 = vmatpush.bf16.msrb.mxu2 %v5318_v23 }
 0x4ea   :  { %v1349_v53 = vmul.f32 %v4326_v12, %v1347_v33  ;;  %4329 = vtanh.f32 %v1323_v3  ;;  %vm1354_vm11 = vweird.f32 %v4326_v12  ;;  %vm1336_vm14 = vmor %vm1334_vm12, %vm1335_vm10  ;;  %vm1373_vm3 = vweird.f32 %v1367_v36  ;;  %v4039_v33 = vld [vmem:[%s6718_s4 + $0x1f0] sm:$0xf0] }
 0x4eb   :  { %v1331_v2 = vsub.f32 1.0, %v1330_v48  ;;  %vm1355_vm15 = vmor %vm1353_vm13, %vm1354_vm11  ;;  %v1377_v42 = vand.u32 2147483647, %v1367_v36  ;;  %v1380_v50 = vor.u32 1.1754944e-38, %v1379_v39  ;;  %v5294_v26 = vor.u32 %v4208_v20, %v4037_v19  ;;  %v4160_v39 = vld [vmem:[%s6718_s4 + $0x6c] sm:$0xf0] }
 0x4ec   :  { %v1350_v47 = vsub.f32 1.0, %v1349_v53  ;;  %v5300_v34 = vor.u32 %v4206_v21, %v4039_v33  ;;  %v3877_v53 = vld [vmem:[%s6718_s4 + $0xa0] sm:$0xf]  ;;  %v4156_v19 = vld [vmem:[%s6718_s4 + $0x4c] sm:$0xf0] }
 0x4ed   :  { %v1332_v10 = vmul.f32 %v4324_v13, %v1331_v2  ;;  %vm1378_vm5 = vcmp.eq.f32.partialorder %v1377_v42, 8.507059e+37  ;;  %6891 = vst [vmem:[#allocation4_spill] sm:$0xff] %v5294_v26  ;;  %1848 = vmatpush.bf16.msrb.mxu1 %v5294_v26  ;;  %v4168_v2 = vld [vmem:[%s6718_s4 + $0xac] sm:$0xf0]  ;;  %v4150_v42 = vld [vmem:[%s6718_s4 + $0x24] sm:$0xf]  ;;  %v5456_v21 = vor.u32 %v4156_v19, %v3829_v14 }
 0x4ee   :  { %v1351_v63 = vmul.f32 %v4326_v12, %v1350_v47  ;;  %6892 = vst [vmem:[#allocation5_spill] sm:$0xff] %v5300_v34  ;;  %1874 = vmatpush.bf16.msrb.mxu3 %v5300_v34  ;;  %v4158_v47 = vld [vmem:[%s6718_s4 + $0x64] sm:$0xf]  ;;  %v5348_v29 = vor.u32 %v4168_v2, %v3877_v53  ;;  %v3799_v33 = vld [vmem:[%s6718_s4 + $0x10] sm:$0xf0] }
 0x4ef   :  { %v4328_v58 = vpop.eup %4327  ;;  %v1333_v6 = vadd.f32 %v4324_v13, %v1332_v10  ;;  %v5354_v10 = vor.u32 %v4158_v47, %v3847_v32  ;;  %v4146_v20 = vld [vmem:[%s6718_s4 + $0x4] sm:$0xf]  ;;  %v3959_v53 = vld [vmem:[%s6718_s4 + $0x150] sm:$0xf0]  ;;  %v3813_v47 = vld [vmem:[%s6718_s4 + $0x20] sm:$0xf] }
 0x4f0   :  { %v1352_v8 = vadd.f32 %v4326_v12, %v1351_v63  ;;  %v1369_v35 = vmul.f32 %v4328_v58, %v1367_v36  ;;  %v4330_v59 = vpop.eup %4329  ;;  %vm1374_vm2 = vweird.f32 %v4328_v58  ;;  %v4021_v36 = vld [vmem:[%s6718_s4 + $0x1c0] sm:$0xf]  ;;  %v4200_v63 = vld [vmem:[%s6718_s4 + $0x1ac] sm:$0xf0]  ;;  %v5468_v49 = vor.u32 %v4146_v20, %v3799_v33  ;;  %v4178_v20 = vld [vmem:[%s6718_s4 + $0x104] sm:$0xf] }
 0x4f1   :  { %v1337_v57 = vsel %vm1336_vm14, %v4324_v13, %v1333_v6  ;;  %vm1375_vm4 = vmor %vm1373_vm3, %vm1374_vm2  ;;  %v4204_v13 = vld [vmem:[%s6718_s4 + $0x1cc] sm:$0xf0]  ;;  %v4007_v6 = vld [vmem:[%s6718_s4 + $0x1b0] sm:$0xf0]  ;;  %1865 = vmatpush.bf16.msrb.mxu2 %v5354_v10 }
 0x4f2   :  { %v1342_v44 = vsel %vm1339_vm0, %v1341_v45, %v1337_v57  ;;  %v1356_v11 = vsel %vm1355_vm15, %v4326_v12, %v1352_v8  ;;  %v1370_v18 = vsub.f32 1.0, %v1369_v35  ;;  %v5331_v3 = vor.u32 %v4204_v13, %v4021_v36  ;;  %v4023_v12 = vld [vmem:[%s6718_s4 + $0x1d0] sm:$0xf0]  ;;  %v3861_v8 = vld [vmem:[%s6718_s4 + $0x80] sm:$0xf] }
 0x4f3   :  { %v1361_v25 = vsel %vm1358_vm1, %v1360_v60, %v1356_v11  ;;  %v1384_v27 = vmul.f32 %v4330_v59, %v1342_v44  ;;  %v5336_v48 = vor.u32 %v4202_v7, %v4023_v12  ;;  %v5372_v45 = vor.u32 %v4198_v16, %v4007_v6  ;;  %v4164_v35 = vld [vmem:[%s6718_s4 + $0x8c] sm:$0xf0]  ;;  %v4154_v60 = vld [vmem:[%s6718_s4 + $0x44] sm:$0xf]  ;;  %v3831_v59 = vld [vmem:[%s6718_s4 + $0x50] sm:$0xf0] }
 0x4f4   :  { %v1383_v30 = vmul.f32 %v1361_v25, %v5239_v56  ;;  %v1371_v31 = vmul.f32 %v4328_v58, %v1370_v18  ;;  %v3909_v56 = vld [vmem:[%s6718_s4 + $0xe0] sm:$0xf]  ;;  %6893 = vst [vmem:[#allocation6_spill] sm:$0xff] %v5331_v3  ;;  %1849 = vmatpush.bf16.msrb.mxu1 %v5331_v3  ;;  %v5384_v57 = vor.u32 %v4164_v35, %v3861_v8  ;;  %v4196_v18 = vld [vmem:[%s6718_s4 + $0x18c] sm:$0xf0] }
 0x4f5   :  { %v5277_v5 = vor.u32 %v4176_v1, %v3909_v56  ;;  %6894 = vst [vmem:[#allocation9_spill] sm:$0xff] %v5336_v48  ;;  %1875 = vmatpush.bf16.msrb.mxu3 %v5336_v48  ;;  %v5390_v44 = vor.u32 %v4154_v60, %v3831_v59  ;;  %v3989_v11 = vld [vmem:[%s6718_s4 + $0x180] sm:$0xf]  ;;  %v4194_v25 = vld [vmem:[%s6718_s4 + $0x184] sm:$0xf] }
 0x4f6   :  { %v5265_v38 = vadd.f32 %v1384_v27, %v1383_v30  ;;  %v1372_v28 = vadd.f32 %v4328_v58, %v1371_v31  ;;  %6896 = vst [vmem:[#allocation8_spill] sm:$0xff] %v5372_v45  ;;  %v5402_v27 = vor.u32 %v4196_v18, %v3989_v11  ;;  %v3991_v30 = vld [vmem:[%s6718_s4 + $0x190] sm:$0xf0]  ;;  %v3957_v36 = vld [vmem:[%s6718_s4 + $0x140] sm:$0xf] }
 0x4f7   :  { %1835 = vmatpush.bf16.msrb.mxu0 %v5277_v5  ;;  %1866 = vmatpush.bf16.msrb.mxu2 %v5390_v44  ;;  %v5408_v31 = vor.u32 %v4194_v25, %v3991_v30  ;;  %v3975_v1 = vld [vmem:[%s6718_s4 + $0x170] sm:$0xf0]  ;;  %v4188_v13 = vld [vmem:[%s6718_s4 + $0x14c] sm:$0xf0]  ;;  %v4186_v7 = vld [vmem:[%s6718_s4 + $0x144] sm:$0xf] }
 0x4f8   :  { %4331 = vtanh.f32 %v5265_v38  ;;  %v1376_v43 = vsel %vm1375_vm4, %v4328_v58, %v1372_v28  ;;  %v5366_v58 = vor.u32 %v4200_v63, %v4005_v9  ;;  %6897 = vst [vmem:[#allocation10_spill] sm:$0xff] %v5402_v27  ;;  %v3845_v28 = vld [vmem:[%s6718_s4 + $0x60] sm:$0xf]  ;;  %v5482_v12 = vor.u32 %v4188_v13, %v3957_v36  ;;  %v4152_v32 = vld [vmem:[%s6718_s4 + $0x2c] sm:$0xf0]  ;;  %v6907_v13 = vld [vmem:[#allocation26_spill] sm:$0xff] }
 0x4f9   :  { %v1381_v54 = vsel %vm1378_vm5, %v1380_v50, %v1376_v43  ;;  %1876 = vmatpush.bf16.msrb.mxu3 %v5372_v45  ;;  %6898 = vst [vmem:[#allocation12_spill] sm:$0xff] %v5408_v31  ;;  %v5420_v43 = vor.u32 %v4160_v39, %v3845_v28  ;;  %v3815_v50 = vld [vmem:[%s6718_s4 + $0x30] sm:$0xf0]  ;;  %v5488_v2 = vor.u32 %v4186_v7, %v3959_v53  ;;  %v4171_v63 = vld [vmem:[%s6718_s4 + $0xcc] sm:$0xf] }
 0x4fa   :  { %6895 = vst [vmem:[#allocation7_spill] sm:$0xff] %v5366_v58  ;;  %1850 = vmatpush.bf16.msrb.mxu1 %v5366_v58  ;;  %v5498_v9 = vor.u32 %v4152_v32, %v3813_v47  ;;  %v3903_v16 = vld [vmem:[%s6718_s4 + $0xd8] sm:$0xf0]  ;;  %v3941_v8 = vld [vmem:[%s6718_s4 + $0x120] sm:$0xf]  ;;  %v234_v36 = vadd.f32 %v6906_v46, %v4950_v22  ;;  %v263_v7 = vadd.f32 %v6907_v13, %v4954_v24 }
 0x4fb   :  { %1836 = vmatpush.bf16.msrb.mxu0 %v5312_v61  ;;  %6901 = vst [vmem:[#allocation14_spill] sm:$0xff] %v5482_v12  ;;  %v5507_v6 = vor.u32 %v4171_v63, %v3903_v16  ;;  %v4184_v35 = vld [vmem:[%s6718_s4 + $0x12c] sm:$0xf0]  ;;  %v4182_v60 = vld [vmem:[%s6718_s4 + $0x124] sm:$0xf] }
 0x4fc   :  { %6902 = vst [vmem:[#allocation17_spill] sm:$0xff] %v5488_v2  ;;  %v5519_v59 = vor.u32 %v4184_v35, %v3941_v8  ;;  %v3943_v11 = vld [vmem:[%s6718_s4 + $0x130] sm:$0xf0]  ;;  %v3797_v25 = vld [vmem:[%s6718_s4] sm:$0xf] }
 0x4fd   :  { %1877 = vmatpush.bf16.msrb.mxu3 %v5408_v31  ;;  %v5524_v18 = vor.u32 %v4182_v60, %v3943_v11  ;;  %v4148_v30 = vld [vmem:[%s6718_s4 + $0xc] sm:$0xf0]  ;;  %v3917_v39 = vld [vmem:[%s6718_s4 + $0xe8] sm:$0xf]  ;;  %v3927_v33 = vld [vmem:[%s6718_s4 + $0x110] sm:$0xf0] }
 0x4fe   :  { %v4332_v51 = vpop.eup %4331  ;;  %1851 = vmatpush.bf16.msrb.mxu1 %v5402_v27  ;;  %6903 = vst [vmem:[#allocation15_spill] sm:$0xff] %v5519_v59  ;;  %v5534_v28 = vor.u32 %v4148_v30, %v3797_v25  ;;  %v5576_v53 = vor.u32 %v4178_v20, %v3927_v33  ;;  %v4209_v47 = vld [vmem:[%s6718_s4 + $0x1f4] sm:$0xf0]  ;;  %v4207_v32 = vld [vmem:[%s6718_s4 + $0x1ec] sm:$0xf] }
 0x4ff   :  { %v1387_v55 = vmul.f32 %v4332_v51, %v1381_v54  ;;  %1837 = vmatpush.bf16.msrb.mxu0 %v5348_v29  ;;  %v5426_v51 = vor.u32 %v4150_v42, %v3815_v50  ;;  %v3973_v54 = vld [vmem:[%s6718_s4 + $0x160] sm:$0xf]  ;;  %6904 = vst [vmem:[#allocation16_spill] sm:$0xff] %v5524_v18  ;;  %v4177_v42 = vld [vmem:[%s6718_s4 + $0xf4] sm:$0xf0]  ;;  %v5589_v24 = vor.u32 %v4209_v47, %v4045_v40  ;;  %v6723_v47 = vmov 0.0|0.0  }
 0x500   :  { %v4167_v50 = vld [vmem:[%s6718_s4 + $0xac] sm:$0xf]  ;;  %6908 = vst [vmem:[#allocation20_spill] sm:$0xff] %v5576_v53  ;;  %v4047_v63 = vld [vmem:[%s6718_s4 + $0x1f8] sm:$0xf0] }
 0x501   :  { %v1393_v0 = vpack.c.bf16 %v1387_v55, %v1387_v55  ;;  %v4192_v55 = vld [vmem:[%s6718_s4 + $0x16c] sm:$0xf0]  ;;  %1867 = vmatpush.bf16.msrb.mxu2 %v5426_v51  ;;  %6909 = vst [vmem:[#allocation19_spill] sm:$0xff] %v5589_v24  ;;  %v5591_v8 = vor.u32 %v4207_v32, %v4047_v63  ;;  %v3901_v35 = vld [vmem:[%s6718_s4 + $0xc8] sm:$0xf] }
 0x502   :  { %v5438_v56 = vor.u32 %v4192_v55, %v3973_v54  ;;  %v5546_v54 = vor.u32 %v4177_v42, %v3917_v39  ;;  %v3887_v55 = vld [vmem:[%s6718_s4 + $0xb8] sm:$0xf0]  ;;  %v4173_v60 = vld [vmem:[%s6718_s4 + $0xd4] sm:$0xf0]  ;;  %v4163_v11 = vld [vmem:[%s6718_s4 + $0x8c] sm:$0xf] }
 0x503   :  { %1402 = vmatmul.bf16.vlgmr.msra.gmra.mxu0 %v1393_v0  ;;  %1415 = vmatmul.bf16.vlgmr.msra.gmra.mxu1 %v1393_v0  ;;  %v5558_v14 = vor.u32 %v4167_v50, %v3887_v55  ;;  %6910 = vst [vmem:[#allocation21_spill] sm:$0xff] %v5591_v8  ;;  %v5603_v39 = vor.u32 %v4173_v60, %v3901_v35  ;;  %v3871_v42 = vld [vmem:[%s6718_s4 + $0x98] sm:$0xf0]  ;;  %v4029_v55 = vld [vmem:[%s6718_s4 + $0x1c8] sm:$0xf] }
 0x504   :  { %1428 = vmatmul.bf16.vlgmr.msra.gmra.mxu2 %v1393_v0  ;;  %1441 = vmatmul.bf16.vlgmr.msra.gmra.mxu3 %v1393_v0  ;;  %v4190_v0 = vld [vmem:[%s6718_s4 + $0x164] sm:$0xf]  ;;  %6899 = vst [vmem:[#allocation11_spill] sm:$0xff] %v5438_v56  ;;  %v5610_v50 = vor.u32 %v4163_v11, %v3871_v42  ;;  %v4031_v46 = vld [vmem:[%s6718_s4 + $0x1d8] sm:$0xf0]  ;;  %v6913_v35 = vld [vmem:[#allocation28_spill] sm:$0xff] }
 0x505   :  { %1838 = vmatpush.bf16.msrb.mxu0 %v5384_v57  ;;  %v5444_v4 = vor.u32 %v4190_v0, %v3975_v1  ;;  %1852 = vmatpush.bf16.msrb.mxu1 %v5438_v56  ;;  %v3925_v0 = vld [vmem:[%s6718_s4 + $0x100] sm:$0xf]  ;;  %v4180_v1 = vld [vmem:[%s6718_s4 + $0x10c] sm:$0xf0]  ;;  %v3885_v13 = vld [vmem:[%s6718_s4 + $0xa8] sm:$0xf]  ;;  %v321_v60 = vadd.f32 %v6913_v35, %v4966_v41 }
 0x506   :  { %1868 = vmatpush.bf16.msrb.mxu2 %v5468_v49  ;;  %v5560_v19 = vor.u32 %v4180_v1, %v3925_v0  ;;  %v4205_v0 = vld [vmem:[%s6718_s4 + $0x1d4] sm:$0xf0]  ;;  %v4203_v1 = vld [vmem:[%s6718_s4 + $0x1cc] sm:$0xf]  ;;  %v4015_v42 = vld [vmem:[%s6718_s4 + $0x1b8] sm:$0xf0] }
 0x507   :  { %6900 = vst [vmem:[#allocation13_spill] sm:$0xff] %v5444_v4  ;;  %1878 = vmatpush.bf16.msrb.mxu3 %v5444_v4  ;;  %v5622_v40 = vor.u32 %v4205_v0, %v4029_v55  ;;  %v4159_v63 = vld [vmem:[%s6718_s4 + $0x6c] sm:$0xf]  ;;  %v3997_v35 = vld [vmem:[%s6718_s4 + $0x188] sm:$0xf] }
 0x508   :  { %6905 = vst [vmem:[#allocation18_spill] sm:$0xff] %v5560_v19  ;;  %v4183_v31 = vld [vmem:[%s6718_s4 + $0x12c] sm:$0xf]  ;;  %v3951_v45 = vld [vmem:[%s6718_s4 + $0x138] sm:$0xf0] }
 0x509   :  { %1839 = vmatpush.bf16.msrb.mxu0 %v5420_v43  ;;  %1853 = vmatpush.bf16.msrb.mxu1 %v5482_v12  ;;  %6911 = vst [vmem:[#allocation22_spill] sm:$0xff] %v5622_v40 }
 0x50a   :  { %1913 = vmatpush.bf16.msra.mxu2 %v5470_v62 }
 0x50b   :  { %1879 = vmatpush.bf16.msrb.mxu3 %v5488_v2 }
 0x50d   :  { %1840 = vmatpush.bf16.msrb.mxu0 %v5456_v21  ;;  %1854 = vmatpush.bf16.msrb.mxu1 %v5519_v59 }
 0x50e   :  { %1914 = vmatpush.bf16.msra.mxu2 %v5507_v6 }
 0x50f   :  { %1880 = vmatpush.bf16.msrb.mxu3 %v5524_v18 }
 0x511   :  { %1841 = vmatpush.bf16.msrb.mxu0 %v5498_v9  ;;  %1855 = vmatpush.bf16.msrb.mxu1 %v5560_v19 }
 0x512   :  { %1915 = vmatpush.bf16.msra.mxu2 %v5558_v14 }
 0x513   :  { %1881 = vmatpush.bf16.msrb.mxu3 %v5576_v53 }
 0x514   :  { %1869 = vmatmul.bf16.vlgmr.msrb.gmra.mxu2 %v6723_v47 }
 0x515   :  { %1842 = vmatpush.bf16.msrb.mxu0 %v5534_v28  ;;  %1900 = vmatpush.bf16.msra.mxu1 %v5589_v24 }
 0x516   :  { %1916 = vmatpush.bf16.msra.mxu2 %v5610_v50 }
 0x517   :  { %1926 = vmatpush.bf16.msra.mxu3 %v5591_v8  ;;  %v3965_v8 = vld [vmem:[%s6718_s4 + $0x148] sm:$0xf] }
 0x518   :  { %1843 = vmatmul.bf16.vlgmr.msrb.gmra.mxu0 %v6723_v47 }
 0x519   :  { %1887 = vmatpush.bf16.msra.mxu0 %v5546_v54  ;;  %1901 = vmatpush.bf16.msra.mxu1 %v5622_v40 }
 0x51d   :  { %1888 = vmatpush.bf16.msra.mxu0 %v5603_v39 }
 0x580   :  { %v1403_v22 = vpop.f32.mrf.mxu0  ;;  %v1416_v16 = vpop.f32.mrf.mxu1 }
 0x581   :  { %v1446_v25 = vadd.f32 %v1403_v22, %v234_v36  ;;  %v1447_v30 = vadd.f32 %v1416_v16, %v263_v7  ;;  %v5628_v36 = vor.u32 %v4203_v1, %v4031_v46  ;;  %v4169_v7 = vld [vmem:[%s6718_s4 + $0xb4] sm:$0xf0]  ;;  %v3855_v22 = vld [vmem:[%s6718_s4 + $0x78] sm:$0xf0]  ;;  %v4013_v16 = vld [vmem:[%s6718_s4 + $0x1a8] sm:$0xf] }
 0x582   :  { %v5637_v32 = vor.u32 %v4169_v7, %v3885_v13  ;;  %v5653_v11 = vor.u32 %v4159_v63, %v3855_v22  ;;  %v4155_v46 = vld [vmem:[%s6718_s4 + $0x4c] sm:$0xf] }
 0x583   :  { %v3792_v20 = vmul.f32 -1.442695, %v1446_v25  ;;  %v3793_v33 = vmul.f32 -1.442695, %v1447_v30  ;;  %6912 = vst [vmem:[#allocation25_spill] sm:$0xff] %v5628_v36  ;;  %1927 = vmatpush.bf16.msra.mxu3 %v5628_v36 }
 0x584   :  { %6914 = vst [vmem:[#allocation23_spill] sm:$0xff] %v5653_v11  ;;  %v4201_v25 = vld [vmem:[%s6718_s4 + $0x1b4] sm:$0xf0]  ;;  %v4199_v30 = vld [vmem:[%s6718_s4 + $0x1ac] sm:$0xf]  ;;  %1889 = vmatpush.bf16.msra.mxu0 %v5637_v32  ;;  %1917 = vmatpush.bf16.msra.mxu2 %v5653_v11 }
 0x585   :  { %4333 = vpow2.f32 %v3792_v20  ;;  %v5667_v0 = vor.u32 %v4201_v25, %v4013_v16  ;;  %v5669_v1 = vor.u32 %v4199_v30, %v4015_v42  ;;  %v3869_v20 = vld [vmem:[%s6718_s4 + $0x88] sm:$0xf]  ;;  %v3839_v16 = vld [vmem:[%s6718_s4 + $0x58] sm:$0xf0]  ;;  %v4197_v25 = vld [vmem:[%s6718_s4 + $0x194] sm:$0xf0] }
 0x586   :  { %4335 = vpow2.f32 %v3793_v33  ;;  %v4165_v33 = vld [vmem:[%s6718_s4 + $0x94] sm:$0xf0]  ;;  %v5692_v30 = vor.u32 %v4155_v46, %v3839_v16  ;;  %v3999_v42 = vld [vmem:[%s6718_s4 + $0x198] sm:$0xf0] }
 0x587   :  { %v5664_v41 = vpop.f32.mrf.mxu2  ;;  %v1442_v55 = vpop.f32.mrf.mxu3  ;;  %6915 = vst [vmem:[#allocation24_spill] sm:$0xff] %v5667_v0  ;;  %v5681_v22 = vor.u32 %v4165_v33, %v3869_v20  ;;  %1902 = vmatpush.bf16.msra.mxu1 %v5667_v0  ;;  %1928 = vmatpush.bf16.msra.mxu3 %v5669_v1  ;;  %v5705_v33 = vor.u32 %v4197_v25, %v3997_v35  ;;  %v3823_v35 = vld [vmem:[%s6718_s4 + $0x38] sm:$0xf0] }
 0x588   :  { %6916 = vst [vmem:[#allocation26_spill] sm:$0xff] %v5669_v1  ;;  %v1449_v13 = vadd.f32 %v1442_v55, %v321_v60  ;;  %v1405_v7 = vpop.f32.mrf.mxu0  ;;  %v1418_v63 = vpop.f32.mrf.mxu1  ;;  %v4195_v60 = vld [vmem:[%s6718_s4 + $0x18c] sm:$0xf]  ;;  %v3853_v55 = vld [vmem:[%s6718_s4 + $0x68] sm:$0xf]  ;;  %1918 = vmatpush.bf16.msra.mxu2 %v5692_v30 }
 0x589   :  { %6917 = vst [vmem:[#allocation28_spill] sm:$0xff] %v5692_v30  ;;  %v5707_v46 = vor.u32 %v4195_v60, %v3999_v42  ;;  %v4161_v7 = vld [vmem:[%s6718_s4 + $0x74] sm:$0xf0]  ;;  %v4151_v63 = vld [vmem:[%s6718_s4 + $0x2c] sm:$0xf]  ;;  %1890 = vmatpush.bf16.msra.mxu0 %v5681_v22 }
 0x58a   :  { %v3794_v20 = vmul.f32 -1.442695, %v1449_v13  ;;  %6918 = vst [vmem:[#allocation29_spill] sm:$0xff] %v5705_v33  ;;  %v5716_v13 = vor.u32 %v4161_v7, %v3853_v55  ;;  %v5724_v42 = vor.u32 %v4151_v63, %v3823_v35  ;;  %v3981_v55 = vld [vmem:[%s6718_s4 + $0x168] sm:$0xf] }
 0x58b   :  { %6919 = vst [vmem:[#allocation30_spill] sm:$0xff] %v5707_v46  ;;  %v4334_v16 = vpop.eup %4333  ;;  %1903 = vmatpush.bf16.msra.mxu1 %v5705_v33  ;;  %1929 = vmatpush.bf16.msra.mxu3 %v5707_v46  ;;  %v4193_v63 = vld [vmem:[%s6718_s4 + $0x174] sm:$0xf0]  ;;  %v4191_v35 = vld [vmem:[%s6718_s4 + $0x16c] sm:$0xf] }
 0x58c   :  { %6920 = vst [vmem:[#allocation31_spill] sm:$0xff] %v5716_v13  ;;  %v4336_v25 = vpop.eup %4335  ;;  %v5721_v60 = vadd.f32 1.0, %v4334_v16  ;;  %4337 = vpow2.f32 %v3794_v20  ;;  %1919 = vmatpush.bf16.msra.mxu2 %v5724_v42  ;;  %v5740_v16 = vor.u32 %v4193_v63, %v3981_v55  ;;  %v4157_v46 = vld [vmem:[%s6718_s4 + $0x54] sm:$0xf0]  ;;  %v6924_v63 = vld [vmem:[#allocation27_spill] sm:$0xff] }
 0x58d   :  { %6921 = vst [vmem:[#allocation32_spill] sm:$0xff] %v5724_v42  ;;  %v5726_v47 = vadd.f32 1.0, %v4336_v25  ;;  %1891 = vmatpush.bf16.msra.mxu0 %v5716_v13  ;;  %v3983_v25 = vld [vmem:[%s6718_s4 + $0x178] sm:$0xf0]  ;;  %v292_v1 = vadd.f32 %v6924_v63, %v4964_v37  ;;  %v3805_v30 = vld [vmem:[%s6718_s4 + $0x8] sm:$0xf] }
 0x58e   :  { %4339 = vrcp.f32 %v5721_v60  ;;  %6922 = vst [vmem:[#allocation33_spill] sm:$0xff] %v5740_v16  ;;  %v1463_v4 = vand.u32 2147483647, %v5721_v60  ;;  %vm1459_vm8 = vweird.f32 %v5721_v60 }
 0x58f   :  { %4341 = vrcp.f32 %v5726_v47  ;;  %v1431_v7 = vpop.f32.mrf.mxu2  ;;  %v1444_v20 = vpop.f32.mrf.mxu3  ;;  %1904 = vmatpush.bf16.msra.mxu1 %v5740_v16  ;;  %v1448_v18 = vadd.f32 %v5664_v41, %v292_v1  ;;  %v4185_v1 = vld [vmem:[%s6718_s4 + $0x134] sm:$0xf0]  ;;  %v1484_v13 = vand.u32 2147483648, %v5726_v47  ;;  %vm1478_vm9 = vweird.f32 %v5726_v47 }
 0x590   :  { %v5748_v7 = vor.u32 %v4191_v35, %v3983_v25  ;;  %v3837_v20 = vld [vmem:[%s6718_s4 + $0x48] sm:$0xf]  ;;  %v4147_v35 = vld [vmem:[%s6718_s4 + $0xc] sm:$0xf]  ;;  %v3807_v25 = vld [vmem:[%s6718_s4 + $0x18] sm:$0xf0] }
 0x591   :  { %v5759_v36 = vor.u32 %v4157_v46, %v3837_v20  ;;  %v5773_v37 = vor.u32 %v4147_v35, %v3807_v25  ;;  %v4189_v46 = vld [vmem:[%s6718_s4 + $0x154] sm:$0xf0]  ;;  %v4187_v20 = vld [vmem:[%s6718_s4 + $0x14c] sm:$0xf]  ;;  %v3967_v35 = vld [vmem:[%s6718_s4 + $0x158] sm:$0xf0] }
 0x592   :  { %6923 = vst [vmem:[#allocation34_spill] sm:$0xff] %v5748_v7  ;;  %v4338_v55 = vpop.eup %4337  ;;  %1930 = vmatpush.bf16.msra.mxu3 %v5748_v7  ;;  %v3821_v25 = vld [vmem:[%s6718_s4 + $0x28] sm:$0xf]  ;;  %v4153_v7 = vld [vmem:[%s6718_s4 + $0x34] sm:$0xf0]  ;;  %v5819_v34 = vor.u32 %v4187_v20, %v3967_v35  ;;  %v6930_v20 = vmov 0.0|0.0  }
 0x593   :  { %6925 = vst [vmem:[#allocation27_spill] sm:$0xff] %v5759_v36  ;;  %v5770_v53 = vadd.f32 1.0, %v4338_v55  ;;  %1892 = vmatpush.bf16.msra.mxu0 %v5759_v36  ;;  %v5785_v55 = vor.u32 %v4189_v46, %v3965_v8  ;;  %1920 = vmatpush.bf16.msra.mxu2 %v5773_v37  ;;  %v3949_v8 = vld [vmem:[%s6718_s4 + $0x128] sm:$0xf]  ;;  %v4149_v36 = vld [vmem:[%s6718_s4 + $0x14] sm:$0xf0] }
 0x594   :  { %6926 = vst [vmem:[#allocation35_spill] sm:$0xff] %v5773_v37  ;;  %v5781_v63 = vpop.eup %4339  ;;  %v5821_v37 = vor.u32 %v4153_v7, %v3821_v25  ;;  %v5823_v42 = vor.u32 %v4185_v1, %v3949_v8  ;;  %v3933_v7 = vld [vmem:[%s6718_s4 + $0x108] sm:$0xf]  ;;  %v5841_v25 = vor.u32 %v4183_v31, %v3951_v45  ;;  %v4179_v45 = vld [vmem:[%s6718_s4 + $0x10c] sm:$0xf]  ;;  %vm1464_vm12 = vcmp.eq.f32.partialorder %v1463_v4, 8.507059e+37 }
 0x595   :  { %6927 = vst [vmem:[#allocation36_spill] sm:$0xff] %v5785_v55  ;;  %v5796_v2 = vpop.eup %4341  ;;  %v1455_v41 = vmul.f32 %v5781_v63, %v5721_v60  ;;  %4343 = vrcp.f32 %v5770_v53  ;;  %1905 = vmatpush.bf16.msra.mxu1 %v5785_v55  ;;  %vm1460_vm6 = vweird.f32 %v5781_v63  ;;  %v3935_v31 = vld [vmem:[%s6718_s4 + $0x118] sm:$0xf0]  ;;  %vm1498_vm15 = vweird.f32 %v5770_v53 }
 0x596   :  { %v1474_v46 = vmul.f32 %v5796_v2, %v5726_v47  ;;  %6928 = vst [vmem:[#allocation37_spill] sm:$0xff] %v5819_v34  ;;  %4345 = vtanh.f32 %v1448_v18  ;;  %1921 = vmatmul.bf16.vlgmr.msra.gmra.mxu2 %v6930_v20  ;;  %1931 = vmatpush.bf16.msra.mxu3 %v5819_v34  ;;  %v4181_v18 = vld [vmem:[%s6718_s4 + $0x114] sm:$0xf0]  ;;  %vm1479_vm7 = vweird.f32 %v5796_v2  ;;  %vm1461_vm10 = vmor %vm1459_vm8, %vm1460_vm6 }
 0x597   :  { %2079 = vmatpush.bf16.msrb.mxu2 %v5294_v26  ;;  %v1456_v48 = vsub.f32 1.0, %v1455_v41  ;;  %6929 = vst [vmem:[#allocation38_spill] sm:$0xff] %v5823_v42  ;;  %v1465_v26 = vand.u32 2147483648, %v5721_v60  ;;  %1893 = vmatpush.bf16.msra.mxu0 %v5821_v37  ;;  %v5843_v41 = vor.u32 %v4149_v36, %v3805_v30  ;;  %v5852_v1 = vor.u32 %v4181_v18, %v3933_v7  ;;  %vm1480_vm11 = vmor %vm1478_vm9, %vm1479_vm7 }
 0x598   :  { %v1475_v11 = vsub.f32 1.0, %v1474_v46  ;;  %v1485_v18 = vor.u32 1.1754944e-38, %v1484_v13 }
 0x599   :  { %v1457_v35 = vmul.f32 %v5781_v63, %v1456_v48  ;;  %v1482_v48 = vand.u32 2147483647, %v5726_v47  ;;  %1906 = vmatpush.bf16.msra.mxu1 %v5823_v42  ;;  %6931 = vst [vmem:[#allocation39_spill] sm:$0xff] %v5852_v1  ;;  %v1466_v30 = vor.u32 1.1754944e-38, %v1465_v26  ;;  %v5873_v47 = vor.u32 %v4179_v45, %v3935_v31 }
 0x59a   :  { %v1476_v8 = vmul.f32 %v5796_v2, %v1475_v11  ;;  %1932 = vmatpush.bf16.msra.mxu3 %v5841_v25 }
 0x59b   :  { %2080 = vmatpush.bf16.msrb.mxu2 %v5331_v3  ;;  %v4344_v36 = vpop.eup %4343  ;;  %v1458_v11 = vadd.f32 %v5781_v63, %v1457_v35  ;;  %1894 = vmatpush.bf16.msra.mxu0 %v5843_v41  ;;  %vm1483_vm13 = vcmp.eq.f32.partialorder %v1482_v48, 8.507059e+37  ;;  %v1502_v48 = vand.u32 2147483647, %v5770_v53 }
 0x59c   :  { %v1477_v46 = vadd.f32 %v5796_v2, %v1476_v8  ;;  %v1494_v7 = vmul.f32 %v4344_v36, %v5770_v53  ;;  %v4346_v60 = vpop.eup %4345  ;;  %vm1499_vm14 = vweird.f32 %v4344_v36 }
 0x59d   :  { %v1462_v3 = vsel %vm1461_vm10, %v5781_v63, %v1458_v11  ;;  %1907 = vmatpush.bf16.msra.mxu1 %v5852_v1  ;;  %vm1500_vm0 = vmor %vm1498_vm15, %vm1499_vm14  ;;  %vm1503_vm1 = vcmp.eq.f32.partialorder %v1502_v48, 8.507059e+37 }
 0x59e   :  { %v1467_v35 = vsel %vm1464_vm12, %v1466_v30, %v1462_v3  ;;  %v1481_v26 = vsel %vm1480_vm11, %v5796_v2, %v1477_v46  ;;  %v1495_v8 = vsub.f32 1.0, %v1494_v7  ;;  %1895 = vmatmul.bf16.vlgmr.msra.gmra.mxu0 %v6930_v20  ;;  %1933 = vmatpush.bf16.msra.mxu3 %v5873_v47  ;;  %v1504_v2 = vand.u32 2147483648, %v5770_v53  ;;  %v6932_v53 = vld [vmem:[#allocation31_spill] sm:$0xff]  ;;  %v6935_v7 = vld [vmem:[#allocation28_spill] sm:$0xff] }
 0x59f   :  { %2081 = vmatpush.bf16.msrb.mxu2 %v5366_v58  ;;  %v1486_v13 = vsel %vm1483_vm13, %v1485_v18, %v1481_v26  ;;  %v1509_v34 = vmul.f32 %v4346_v60, %v1467_v35  ;;  %v6934_v46 = vld [vmem:[#allocation27_spill] sm:$0xff]  ;;  %v6936_v18 = vld [vmem:[#allocation32_spill] sm:$0xff]  ;;  %v1844_v35 = vpop.f32.mrf.mxu0  ;;  %v1870_v26 = vpop.f32.mrf.mxu2 }
 0x5a0   :  { %v1508_v4 = vmul.f32 %v1486_v13, %v5265_v38  ;;  %v1496_v63 = vmul.f32 %v4344_v36, %v1495_v8  ;;  %v1505_v20 = vor.u32 1.1754944e-38, %v1504_v2  ;;  %v6937_v60 = vld [vmem:[#allocation35_spill] sm:$0xff]  ;;  %v5935_v13 = vld [vmem:[%s6720_s6 + $0x38] sm:$0xff] }
 0x5a1   :  { %6938 = vst [vmem:[#allocation31_spill] sm:$0xff] %v5935_v13  ;;  %2051 = vmatpush.bf16.msrb.mxu0 %v5935_v13  ;;  %v5953_v2 = vld [vmem:[%s6720_s6 + $0x20] sm:$0xff] }
 0x5a2   :  { %v5881_v45 = vadd.f32 %v1509_v34, %v1508_v4  ;;  %v1497_v3 = vadd.f32 %v4344_v36, %v1496_v63  ;;  %v5941_v4 = vld [vmem:[%s6720_s6 + $0x30] sm:$0xff]  ;;  %6941 = vst [vmem:[#allocation28_spill] sm:$0xff] %v5953_v2 }
 0x5a3   :  { %2082 = vmatpush.bf16.msrb.mxu2 %v5402_v27 }
 0x5a4   :  { %4347 = vtanh.f32 %v5881_v45  ;;  %v1501_v38 = vsel %vm1500_vm0, %v4344_v36, %v1497_v3  ;;  %v6933_v36 = vld [vmem:[#allocation23_spill] sm:$0xff]  ;;  %v5947_v3 = vld [vmem:[%s6720_s6 + $0x28] sm:$0xff] }
 0x5a5   :  { %v1506_v31 = vsel %vm1503_vm1, %v1505_v20, %v1501_v38  ;;  %6939 = vst [vmem:[#allocation23_spill] sm:$0xff] %v5941_v4  ;;  %2052 = vmatpush.bf16.msrb.mxu0 %v5941_v4  ;;  %v5959_v38 = vld [vmem:[%s6720_s6 + $0x18] sm:$0xff] }
 0x5a6   :  { %6940 = vst [vmem:[#allocation27_spill] sm:$0xff] %v5947_v3 }
 0x5a7   :  { %2083 = vmatpush.bf16.msrb.mxu2 %v5438_v56  ;;  %v1846_v8 = vpop.f32.mrf.mxu0  ;;  %v1872_v63 = vpop.f32.mrf.mxu2  ;;  %6942 = vst [vmem:[#allocation40_spill] sm:$0xff] %v5959_v38  ;;  %v6957_v56 = vld [vmem:[#allocation20_spill] sm:$0xff] }
 0x5a9   :  { %2053 = vmatpush.bf16.msrb.mxu0 %v5947_v3 }
 0x5aa   :  { %v4348_v34 = vpop.eup %4347 }
 0x5ab   :  { %2084 = vmatpush.bf16.msrb.mxu2 %v5482_v12  ;;  %v1512_v11 = vmul.f32 %v4348_v34, %v1506_v31  ;;  %v5965_v34 = vld [vmem:[%s6720_s6 + $0x10] sm:$0xff]  ;;  %v144_v31 = vld [vmem:[%s6721_s5] sm:$0xf] }
 0x5ac   :  { %6943 = vst [vmem:[#allocation41_spill] sm:$0xff] %v5965_v34  ;;  %v5976_v8 = vperm.slane %v144_v31, 0 }
 0x5ad   :  { %v1514_v30 = vpack.c.bf16 %v1512_v11, %v1512_v11  ;;  %2054 = vmatpush.bf16.msrb.mxu0 %v5953_v2 }
 0x5ae   :  { %6945 = vst [vmem:[#allocation43_spill] sm:$0xff] %v5976_v8 }
 0x5af   :  { %2085 = vmatpush.bf16.msrb.mxu2 %v5519_v59  ;;  %1856 = vmatmul.bf16.vlgmr.msrb.gmra.mxu1 %v1514_v30 }
 0x5b0   :  { %1882 = vmatmul.bf16.vlgmr.msrb.gmra.mxu3 %v1514_v30  ;;  %2066 = vmatpush.bf16.msrb.mxu1 %v5277_v5 }
 0x5b1   :  { %2092 = vmatpush.bf16.msrb.mxu3 %v5251_v52  ;;  %2055 = vmatpush.bf16.msrb.mxu0 %v5959_v38 }
 0x5b3   :  { %2086 = vmatpush.bf16.msrb.mxu2 %v5560_v19  ;;  %v6950_v19 = vld [vmem:[#allocation8_spill] sm:$0xff] }
 0x5b4   :  { %2067 = vmatpush.bf16.msrb.mxu1 %v5312_v61 }
 0x5b5   :  { %2093 = vmatpush.bf16.msrb.mxu3 %v5260_v17  ;;  %2056 = vmatpush.bf16.msrb.mxu0 %v5965_v34 }
 0x5b7   :  { %2131 = vmatpush.bf16.msra.mxu2 %v5589_v24 }
 0x5b8   :  { %2068 = vmatpush.bf16.msrb.mxu1 %v5348_v29 }
 0x5b9   :  { %2094 = vmatpush.bf16.msrb.mxu3 %v5282_v15 }
 0x5bb   :  { %2132 = vmatpush.bf16.msra.mxu2 %v5622_v40 }
 0x5bc   :  { %2069 = vmatpush.bf16.msrb.mxu1 %v5384_v57 }
 0x5bd   :  { %2095 = vmatpush.bf16.msrb.mxu3 %v5318_v23 }
 0x5bf   :  { %2133 = vmatpush.bf16.msra.mxu2 %v5667_v0  ;;  %1908 = vmatmul.bf16.vlgmr.msra.gmra.mxu1 %v1514_v30  ;;  %v6949_v0 = vld [vmem:[#allocation9_spill] sm:$0xff] }
 0x5c0   :  { %1934 = vmatmul.bf16.vlgmr.msra.gmra.mxu3 %v1514_v30  ;;  %2070 = vmatpush.bf16.msrb.mxu1 %v5420_v43  ;;  %v5974_v30 = vld [vmem:[%s6720_s6 + $0x8] sm:$0xff] }
 0x5c1   :  { %2096 = vmatpush.bf16.msrb.mxu3 %v5354_v10  ;;  %6944 = vst [vmem:[#allocation42_spill] sm:$0xff] %v5974_v30  ;;  %2057 = vmatpush.bf16.msrb.mxu0 %v5974_v30 }
 0x5c3   :  { %2134 = vmatpush.bf16.msra.mxu2 %v5705_v33 }
 0x5c4   :  { %2071 = vmatpush.bf16.msrb.mxu1 %v5456_v21 }
 0x5c5   :  { %2097 = vmatpush.bf16.msrb.mxu3 %v5390_v44 }
 0x5c7   :  { %2135 = vmatpush.bf16.msra.mxu2 %v5740_v16 }
 0x5c8   :  { %2072 = vmatpush.bf16.msrb.mxu1 %v5498_v9 }
 0x5c9   :  { %2098 = vmatpush.bf16.msrb.mxu3 %v5426_v51 }
 0x5cb   :  { %2136 = vmatpush.bf16.msra.mxu2 %v5785_v55  ;;  %v5987_v55 = vperm.slane %v144_v31, 1 }
 0x5cc   :  { %2073 = vmatpush.bf16.msrb.mxu1 %v5534_v28 }
 0x5cd   :  { %2099 = vmatpush.bf16.msrb.mxu3 %v5468_v49  ;;  %6948 = vst [vmem:[#allocation45_spill] sm:$0xff] %v5987_v55  ;;  %v1871_v40 = vadd.f32 %v1870_v26, %v5987_v55  ;;  %v6954_v55 = vld [vmem:[#allocation17_spill] sm:$0xff] }
 0x5cf   :  { %2137 = vmatpush.bf16.msra.mxu2 %v5823_v42  ;;  %v1845_v42 = vadd.f32 %v1844_v35, %v5976_v8  ;;  %v6951_v8 = vld [vmem:[#allocation12_spill] sm:$0xff] }
 0x5d0   :  { %2118 = vmatpush.bf16.msra.mxu1 %v5546_v54 }
 0x5d1   :  { %2144 = vmatpush.bf16.msra.mxu3 %v5470_v62 }
 0x5d3   :  { %2138 = vmatpush.bf16.msra.mxu2 %v5852_v1  ;;  %v5982_v1 = vld [vmem:[%s6720_s6] sm:$0xff] }
 0x5d4   :  { %2119 = vmatpush.bf16.msra.mxu1 %v5603_v39  ;;  %6946 = vst [vmem:[#allocation44_spill] sm:$0xff] %v5982_v1  ;;  %2058 = vmatpush.bf16.msrb.mxu0 %v5982_v1 }
 0x5d5   :  { %2145 = vmatpush.bf16.msra.mxu3 %v5507_v6 }
 0x5d8   :  { %2120 = vmatpush.bf16.msra.mxu1 %v5637_v32 }
 0x5d9   :  { %2146 = vmatpush.bf16.msra.mxu3 %v5558_v14 }
 0x5dc   :  { %2121 = vmatpush.bf16.msra.mxu1 %v5681_v22 }
 0x5dd   :  { %2147 = vmatpush.bf16.msra.mxu3 %v5610_v50 }
 0x5e0   :  { %2122 = vmatpush.bf16.msra.mxu1 %v6932_v53 }
 0x5e1   :  { %2148 = vmatpush.bf16.msra.mxu3 %v6933_v36 }
 0x5e4   :  { %2123 = vmatpush.bf16.msra.mxu1 %v6934_v46 }
 0x5e5   :  { %2149 = vmatpush.bf16.msra.mxu3 %v6935_v7 }
 0x5e8   :  { %2124 = vmatpush.bf16.msra.mxu1 %v5821_v37 }
 0x5e9   :  { %2150 = vmatpush.bf16.msra.mxu3 %v6936_v18 }
 0x5ec   :  { %2125 = vmatpush.bf16.msra.mxu1 %v5843_v41 }
 0x5ed   :  { %2151 = vmatpush.bf16.msra.mxu3 %v6937_v60 }
 0x619   :  { %v1922_v48 = vpop.f32.mrf.mxu2 }
 0x61b   :  { %v1896_v20 = vpop.f32.mrf.mxu0 }
 0x621   :  { %v1924_v11 = vpop.f32.mrf.mxu2 }
 0x622   :  { %v6947_v11 = vld [vmem:[#allocation5_spill] sm:$0xff] }
 0x623   :  { %v1898_v63 = vpop.f32.mrf.mxu0  ;;  %2105 = vmatpush.bf16.msra.mxu0 %v6947_v11 }
 0x627   :  { %2106 = vmatpush.bf16.msra.mxu0 %v6949_v0 }
 0x62b   :  { %2107 = vmatpush.bf16.msra.mxu0 %v6950_v19 }
 0x62c   :  { %v1857_v16 = vpop.f32.mrf.mxu1 }
 0x62d   :  { %v1858_v33 = vadd.f32 %v1857_v16, %v1845_v42  ;;  %v6952_v42 = vld [vmem:[#allocation13_spill] sm:$0xff]  ;;  %v5994_v16 = vperm.slane %v144_v31, 3 }
 0x62f   :  { %v4051_v63 = vmul.f32 -1.442695, %v1858_v33  ;;  %2108 = vmatpush.bf16.msra.mxu0 %v6951_v8  ;;  %6953 = vst [vmem:[#allocation46_spill] sm:$0xff] %v5994_v16 }
 0x631   :  { %4349 = vpow2.f32 %v4051_v63 }
 0x633   :  { %v1883_v24 = vpop.f32.mrf.mxu3  ;;  %2109 = vmatpush.bf16.msra.mxu0 %v6952_v42 }
 0x634   :  { %v1884_v59 = vadd.f32 %v1883_v24, %v1871_v40  ;;  %v1859_v30 = vpop.f32.mrf.mxu1  ;;  %v1923_v24 = vadd.f32 %v1922_v48, %v5994_v16 }
 0x635   :  { %v5998_v30 = vperm.slane %v144_v31, 2 }
 0x636   :  { %v4052_v35 = vmul.f32 -1.442695, %v1884_v59 }
 0x637   :  { %v4350_v1 = vpop.eup %4349  ;;  %2110 = vmatpush.bf16.msra.mxu0 %v6954_v55  ;;  %6955 = vst [vmem:[#allocation47_spill] sm:$0xff] %v5998_v30  ;;  %v1897_v19 = vadd.f32 %v1896_v20, %v5998_v30 }
 0x638   :  { %4351 = vpow2.f32 %v4052_v35  ;;  %v1942_v11 = vadd.f32 1.0, %v4350_v1  ;;  %v6956_v1 = vld [vmem:[#allocation16_spill] sm:$0xff] }
 0x63a   :  { %4353 = vrcp.f32 %v1942_v11  ;;  %vm1948_vm4 = vweird.f32 %v1942_v11 }
 0x63b   :  { %v1885_v12 = vpop.f32.mrf.mxu3  ;;  %2111 = vmatpush.bf16.msra.mxu0 %v6956_v1 }
 0x63c   :  { %v1909_v26 = vpop.f32.mrf.mxu1 }
 0x63d   :  { %v1910_v16 = vadd.f32 %v1909_v26, %v1897_v19 }
 0x63e   :  { %v4352_v33 = vpop.eup %4351 }
 0x63f   :  { %v1961_v63 = vadd.f32 1.0, %v4352_v33  ;;  %2112 = vmatpush.bf16.msra.mxu0 %v6957_v56 }
 0x640   :  { %v4354_v40 = vpop.eup %4353 }
 0x641   :  { %4355 = vrcp.f32 %v1961_v63  ;;  %v1944_v59 = vmul.f32 %v4354_v40, %v1942_v11  ;;  %v1973_v38 = vand.u32 2147483648, %v1961_v63  ;;  %vm1949_vm2 = vweird.f32 %v4354_v40 }
 0x642   :  { %vm1967_vm5 = vweird.f32 %v1961_v63  ;;  %vm1950_vm6 = vmor %vm1948_vm4, %vm1949_vm2 }
 0x643   :  { %v1935_v35 = vpop.f32.mrf.mxu3  ;;  %v1945_v12 = vsub.f32 1.0, %v1944_v59  ;;  %v1954_v59 = vand.u32 2147483648, %v1942_v11 }
 0x644   :  { %v1936_v8 = vadd.f32 %v1935_v35, %v1923_v24  ;;  %v1911_v42 = vpop.f32.mrf.mxu1  ;;  %v1971_v24 = vand.u32 2147483647, %v1961_v63  ;;  %v1974_v35 = vor.u32 1.1754944e-38, %v1973_v38 }
 0x645   :  { %v1946_v33 = vmul.f32 %v4354_v40, %v1945_v12  ;;  %v1952_v42 = vand.u32 2147483647, %v1942_v11  ;;  %v1955_v19 = vor.u32 1.1754944e-38, %v1954_v59 }
 0x646   :  { %v4053_v0 = vmul.f32 -1.442695, %v1936_v8  ;;  %vm1972_vm8 = vcmp.eq.f32.partialorder %v1971_v24, 8.507059e+37 }
 0x647   :  { %v4356_v34 = vpop.eup %4355  ;;  %v1947_v31 = vadd.f32 %v4354_v40, %v1946_v33  ;;  %vm1953_vm9 = vcmp.eq.f32.partialorder %v1952_v42, 8.507059e+37 }
 0x648   :  { %v1963_v55 = vmul.f32 %v4356_v34, %v1961_v63  ;;  %4357 = vpow2.f32 %v4053_v0  ;;  %vm1968_vm3 = vweird.f32 %v4356_v34 }
 0x649   :  { %4359 = vtanh.f32 %v1910_v16  ;;  %vm1969_vm7 = vmor %vm1967_vm5, %vm1968_vm3  ;;  %v1951_v0 = vsel %vm1950_vm6, %v4354_v40, %v1947_v31 }
 0x64a   :  { %v1964_v48 = vsub.f32 1.0, %v1963_v55  ;;  %v1956_v12 = vsel %vm1953_vm9, %v1955_v19, %v1951_v0  ;;  %v6959_v0 = vld [vmem:[#allocation25_spill] sm:$0xff]  ;;  %v6962_v19 = vld [vmem:[#allocation34_spill] sm:$0xff] }
 0x64b   :  { %v1937_v27 = vpop.f32.mrf.mxu3 }
 0x64c   :  { %v1965_v2 = vmul.f32 %v4356_v34, %v1964_v48 }
 0x64e   :  { %v4358_v20 = vpop.eup %4357  ;;  %v1966_v8 = vadd.f32 %v4356_v34, %v1965_v2 }
 0x64f   :  { %v1981_v55 = vadd.f32 1.0, %v4358_v20  ;;  %v4360_v48 = vpop.eup %4359 }
 0x650   :  { %v1970_v26 = vsel %vm1969_vm7, %v4356_v34, %v1966_v8  ;;  %v1998_v11 = vmul.f32 %v4360_v48, %v1956_v12 }
 0x651   :  { %v1975_v27 = vsel %vm1972_vm8, %v1974_v35, %v1970_v26  ;;  %4361 = vrcp.f32 %v1981_v55  ;;  %v1993_v38 = vand.u32 2147483648, %v1981_v55  ;;  %v1991_v34 = vand.u32 2147483647, %v1981_v55  ;;  %v6958_v35 = vld [vmem:[#allocation21_spill] sm:$0xff] }
 0x652   :  { %v1997_v33 = vmul.f32 %v1975_v27, %v5881_v45  ;;  %vm1987_vm11 = vweird.f32 %v1981_v55  ;;  %v6963_v26 = vld [vmem:[#allocation37_spill] sm:$0xff]  ;;  %v6050_v27 = vld [vmem:[%s6719_s7] ss:$0 sm:$0xff] }
 0x653   :  { %v1994_v59 = vor.u32 1.1754944e-38, %v1993_v38  ;;  %vm1992_vm13 = vcmp.eq.f32.partialorder %v1991_v34, 8.507059e+37  ;;  %6964 = vst [vmem:[#allocation21_spill] sm:$0xff] %v6050_v27  ;;  %v6966_v38 = vld [vmem:[#allocation6_spill] sm:$0xff] }
 0x654   :  { %v6004_v63 = vadd.f32 %v1998_v11, %v1997_v33 }
 0x656   :  { %4363 = vtanh.f32 %v6004_v63 }
 0x657   :  { %v4362_v30 = vpop.eup %4361 }
 0x658   :  { %v1983_v2 = vmul.f32 %v4362_v30, %v1981_v55  ;;  %vm1988_vm10 = vweird.f32 %v4362_v30  ;;  %v6960_v55 = vld [vmem:[#allocation26_spill] sm:$0xff] }
 0x659   :  { %vm1989_vm12 = vmor %vm1987_vm11, %vm1988_vm10 }
 0x65a   :  { %v1984_v16 = vsub.f32 1.0, %v1983_v2  ;;  %v6965_v2 = vld [vmem:[#allocation4_spill] sm:$0xff] }
 0x65c   :  { %v1985_v40 = vmul.f32 %v4362_v30, %v1984_v16  ;;  %v4364_v45 = vpop.eup %4363 }
 0x65e   :  { %v1986_v31 = vadd.f32 %v4362_v30, %v1985_v40 }
 0x660   :  { %v1990_v24 = vsel %vm1989_vm12, %v4362_v30, %v1986_v31  ;;  %v6961_v30 = vld [vmem:[#allocation30_spill] sm:$0xff]  ;;  %v6967_v31 = vld [vmem:[#allocation28_spill] sm:$0xff] }
 0x661   :  { %v1995_v42 = vsel %vm1992_vm13, %v1994_v59, %v1990_v24  ;;  %v6968_v59 = vld [vmem:[#allocation10_spill] sm:$0xff] }
 0x662   :  { %v2001_v20 = vmul.f32 %v4364_v45, %v1995_v42  ;;  %v6969_v45 = vld [vmem:[#allocation40_spill] sm:$0xff]  ;;  %v6970_v42 = vld [vmem:[#allocation11_spill] sm:$0xff] }
 0x664   :  { %v2002_v8 = vpack.c.bf16 %v2001_v20, %v2001_v20 }
 0x666   :  { %2059 = vmatmul.bf16.vlgmr.msrb.gmra.mxu0 %v2002_v8  ;;  %2087 = vmatmul.bf16.vlgmr.msrb.gmra.mxu2 %v2002_v8 }
 0x667   :  { %2157 = vmatpush.bf16.msrb.mxu0 %v6958_v35  ;;  %2250 = vmatpush.bf16.msrb.mxu2 %v5277_v5 }
 0x66b   :  { %2158 = vmatpush.bf16.msrb.mxu0 %v6959_v0  ;;  %2251 = vmatpush.bf16.msrb.mxu2 %v5312_v61 }
 0x66f   :  { %2159 = vmatpush.bf16.msrb.mxu0 %v6960_v55  ;;  %2252 = vmatpush.bf16.msrb.mxu2 %v5348_v29 }
 0x673   :  { %2160 = vmatpush.bf16.msrb.mxu0 %v6961_v30  ;;  %2253 = vmatpush.bf16.msrb.mxu2 %v5384_v57 }
 0x676   :  { %2113 = vmatmul.bf16.vlgmr.msra.gmra.mxu0 %v2002_v8  ;;  %2139 = vmatmul.bf16.vlgmr.msra.gmra.mxu2 %v2002_v8 }
 0x677   :  { %2161 = vmatpush.bf16.msrb.mxu0 %v6962_v19  ;;  %2254 = vmatpush.bf16.msrb.mxu2 %v5420_v43 }
 0x67b   :  { %2162 = vmatpush.bf16.msrb.mxu0 %v6963_v26  ;;  %2255 = vmatpush.bf16.msrb.mxu2 %v5456_v21 }
 0x67f   :  { %2163 = vmatpush.bf16.msrb.mxu0 %v5841_v25  ;;  %2256 = vmatpush.bf16.msrb.mxu2 %v5498_v9 }
 0x683   :  { %2164 = vmatpush.bf16.msrb.mxu0 %v5873_v47  ;;  %2257 = vmatpush.bf16.msrb.mxu2 %v5534_v28 }
 0x686   :  { %2165 = vmatmul.bf16.vlgmr.msrb.gmra.mxu0 %v2002_v8  ;;  %v6971_v8 = vld [vmem:[#allocation41_spill] sm:$0xff] }
 0x687   :  { %2276 = vmatpush.bf16.msra.mxu0 %v5251_v52  ;;  %2302 = vmatpush.bf16.msra.mxu2 %v5546_v54 }
 0x68b   :  { %2277 = vmatpush.bf16.msra.mxu0 %v5260_v17  ;;  %2303 = vmatpush.bf16.msra.mxu2 %v5603_v39 }
 0x68f   :  { %2278 = vmatpush.bf16.msra.mxu0 %v5282_v15  ;;  %2304 = vmatpush.bf16.msra.mxu2 %v5637_v32 }
 0x693   :  { %2279 = vmatpush.bf16.msra.mxu0 %v5318_v23  ;;  %2305 = vmatpush.bf16.msra.mxu2 %v5681_v22 }
 0x697   :  { %2280 = vmatpush.bf16.msra.mxu0 %v5354_v10  ;;  %2306 = vmatpush.bf16.msra.mxu2 %v6932_v53 }
 0x69b   :  { %2281 = vmatpush.bf16.msra.mxu0 %v5390_v44  ;;  %2307 = vmatpush.bf16.msra.mxu2 %v6934_v46 }
 0x69f   :  { %2282 = vmatpush.bf16.msra.mxu0 %v5426_v51  ;;  %2308 = vmatpush.bf16.msra.mxu2 %v5821_v37 }
 0x6a3   :  { %2283 = vmatpush.bf16.msra.mxu0 %v5468_v49  ;;  %2309 = vmatpush.bf16.msra.mxu2 %v5843_v41 }
 0x6a7   :  { %2328 = vmatpush.bf16.msrb.mxu0 %v5470_v62 }
 0x6ab   :  { %2329 = vmatpush.bf16.msrb.mxu0 %v5507_v6 }
 0x6af   :  { %2330 = vmatpush.bf16.msrb.mxu0 %v5558_v14 }
 0x6b3   :  { %2331 = vmatpush.bf16.msrb.mxu0 %v5610_v50 }
 0x6b7   :  { %2332 = vmatpush.bf16.msrb.mxu0 %v6933_v36 }
 0x6bb   :  { %2333 = vmatpush.bf16.msrb.mxu0 %v6935_v7 }
 0x6bf   :  { %2334 = vmatpush.bf16.msrb.mxu0 %v6936_v18 }
 0x6c3   :  { %2335 = vmatpush.bf16.msrb.mxu0 %v6937_v60 }
 0x6e3   :  { %v2060_v12 = vpop.f32.mrf.mxu0 }
 0x6e4   :  { %v2061_v33 = vadd.f32 %v6050_v27, %v2060_v12  ;;  %v6972_v12 = vld [vmem:[#allocation14_spill] sm:$0xff] }
 0x6e6   :  { %2064 = vst [vmem:[#allocation3] sm:$0xff] %v2061_v33  ;;  %v2065_v48 = vpack.c.bf16 %v2061_v33, %v2061_v33 }
 0x6e8   :  { %2074 = vmatmul.bf16.vlgmr.msrb.gmra.mxu1 %v2065_v48  ;;  %2100 = vmatmul.bf16.vlgmr.msrb.gmra.mxu3 %v2065_v48 }
 0x6e9   :  { %v2088_v11 = vpop.f32.mrf.mxu2  ;;  %2234 = vmatpush.bf16.msrb.mxu1 %v5935_v13  ;;  %2263 = vmatpush.bf16.msrb.mxu3 %v6965_v2 }
 0x6eb   :  { %v2062_v16 = vpop.f32.mrf.mxu0 }
 0x6ec   :  { %v6973_v16 = vld [vmem:[#allocation42_spill] sm:$0xff] }
 0x6ed   :  { %2235 = vmatpush.bf16.msrb.mxu1 %v5941_v4  ;;  %2264 = vmatpush.bf16.msrb.mxu3 %v6966_v38 }
 0x6f1   :  { %v2090_v40 = vpop.f32.mrf.mxu2  ;;  %2236 = vmatpush.bf16.msrb.mxu1 %v5947_v3  ;;  %2265 = vmatpush.bf16.msrb.mxu3 %v5366_v58  ;;  %v6977_v58 = vld [vmem:[#allocation5_spill] sm:$0xff] }
 0x6f2   :  { %v6974_v40 = vld [vmem:[#allocation15_spill] sm:$0xff] }
 0x6f3   :  { %v2114_v34 = vpop.f32.mrf.mxu0 }
 0x6f5   :  { %2237 = vmatpush.bf16.msrb.mxu1 %v6967_v31  ;;  %2266 = vmatpush.bf16.msrb.mxu3 %v6968_v59  ;;  %v6975_v59 = vld [vmem:[#allocation44_spill] sm:$0xff] }
 0x6f8   :  { %2126 = vmatmul.bf16.vlgmr.msra.gmra.mxu1 %v2065_v48  ;;  %2152 = vmatmul.bf16.vlgmr.msra.gmra.mxu3 %v2065_v48  ;;  %v6976_v48 = vld [vmem:[#allocation18_spill] sm:$0xff] }
 0x6f9   :  { %v6061_v24 = vpop.f32.mrf.mxu2  ;;  %2238 = vmatpush.bf16.msrb.mxu1 %v6969_v45  ;;  %2267 = vmatpush.bf16.msrb.mxu3 %v6970_v42  ;;  %v6978_v45 = vld [vmem:[#allocation19_spill] sm:$0xff]  ;;  %v6979_v42 = vld [vmem:[#allocation9_spill] sm:$0xff] }
 0x6fb   :  { %v2116_v20 = vpop.f32.mrf.mxu0 }
 0x6fc   :  { %v6980_v20 = vld [vmem:[#allocation22_spill] sm:$0xff] }
 0x6fd   :  { %2239 = vmatpush.bf16.msrb.mxu1 %v6971_v8  ;;  %2268 = vmatpush.bf16.msrb.mxu3 %v6972_v12  ;;  %v6981_v12 = vld [vmem:[#allocation8_spill] sm:$0xff] }
 0x701   :  { %v2142_v33 = vpop.f32.mrf.mxu2  ;;  %2240 = vmatpush.bf16.msrb.mxu1 %v6973_v16  ;;  %2269 = vmatpush.bf16.msrb.mxu3 %v6974_v40  ;;  %v6983_v16 = vld [vmem:[#allocation12_spill] sm:$0xff]  ;;  %v6984_v40 = vld [vmem:[#allocation29_spill] sm:$0xff] }
 0x702   :  { %v6982_v33 = vld [vmem:[#allocation24_spill] sm:$0xff] }
 0x703   :  { %v2166_v31 = vpop.f32.mrf.mxu0 }
 0x705   :  { %2241 = vmatpush.bf16.msrb.mxu1 %v6975_v59  ;;  %2270 = vmatpush.bf16.msrb.mxu3 %v6976_v48  ;;  %v6985_v59 = vld [vmem:[#allocation13_spill] sm:$0xff] }
 0x706   :  { %v6986_v48 = vld [vmem:[#allocation33_spill] sm:$0xff] }
 0x709   :  { %2289 = vmatpush.bf16.msra.mxu1 %v6977_v58  ;;  %2315 = vmatpush.bf16.msra.mxu3 %v6978_v45  ;;  %v6987_v58 = vld [vmem:[#allocation17_spill] sm:$0xff]  ;;  %v6988_v45 = vld [vmem:[#allocation36_spill] sm:$0xff] }
 0x70b   :  { %v2168_v8 = vpop.f32.mrf.mxu0 }
 0x70c   :  { %v6990_v8 = vld [vmem:[#allocation39_spill] sm:$0xff] }
 0x70d   :  { %2290 = vmatpush.bf16.msra.mxu1 %v6979_v42  ;;  %2316 = vmatpush.bf16.msra.mxu3 %v6980_v20  ;;  %v6989_v20 = vld [vmem:[#allocation38_spill] sm:$0xff] }
 0x711   :  { %2291 = vmatpush.bf16.msra.mxu1 %v6981_v12  ;;  %2317 = vmatpush.bf16.msra.mxu3 %v6982_v33 }
 0x715   :  { %2292 = vmatpush.bf16.msra.mxu1 %v6983_v16  ;;  %2318 = vmatpush.bf16.msra.mxu3 %v6984_v40  ;;  %v6991_v16 = vld [vmem:[#allocation43_spill] sm:$0xff] }
 0x719   :  { %2293 = vmatpush.bf16.msra.mxu1 %v6985_v59  ;;  %2319 = vmatpush.bf16.msra.mxu3 %v6986_v48  ;;  %v6992_v48 = vld [vmem:[#allocation45_spill] sm:$0xff] }
 0x71d   :  { %2294 = vmatpush.bf16.msra.mxu1 %v6987_v58  ;;  %2320 = vmatpush.bf16.msra.mxu3 %v6988_v45 }
 0x721   :  { %2295 = vmatpush.bf16.msra.mxu1 %v6956_v1  ;;  %2321 = vmatpush.bf16.msra.mxu3 %v6989_v20 }
 0x725   :  { %2296 = vmatpush.bf16.msra.mxu1 %v6957_v56  ;;  %2322 = vmatpush.bf16.msra.mxu3 %v6990_v8 }
 0x765   :  { %v2075_v33 = vpop.f32.mrf.mxu1 }
 0x766   :  { %v2076_v12 = vadd.f32 %v2075_v33, %v6991_v16 }
 0x768   :  { %v2089_v40 = vadd.f32 %v2088_v11, %v2076_v12  ;;  %v6993_v12 = vld [vmem:[#allocation46_spill] sm:$0xff] }
 0x76a   :  { %v4086_v42 = vmul.f32 -1.442695, %v2089_v40 }
 0x76b   :  { %v2101_v59 = vpop.f32.mrf.mxu3 }
 0x76c   :  { %4365 = vpow2.f32 %v4086_v42  ;;  %v2102_v3 = vadd.f32 %v2101_v59, %v6992_v48 }
 0x76d   :  { %v2077_v58 = vpop.f32.mrf.mxu1 }
 0x76e   :  { %v2115_v38 = vadd.f32 %v2114_v34, %v2102_v3  ;;  %v6994_v58 = vld [vmem:[#allocation47_spill] sm:$0xff] }
 0x770   :  { %v4087_v45 = vmul.f32 -1.442695, %v2115_v38 }
 0x772   :  { %v4366_v4 = vpop.eup %4365  ;;  %4367 = vpow2.f32 %v4087_v45 }
 0x773   :  { %v2173_v1 = vadd.f32 1.0, %v4366_v4  ;;  %v2103_v20 = vpop.f32.mrf.mxu3 }
 0x775   :  { %4369 = vrcp.f32 %v2173_v1  ;;  %v2127_v56 = vpop.f32.mrf.mxu1  ;;  %vm2179_vm0 = vweird.f32 %v2173_v1 }
 0x776   :  { %v2128_v3 = vadd.f32 %v2127_v56, %v6994_v58 }
 0x778   :  { %v4368_v2 = vpop.eup %4367 }
 0x779   :  { %v2192_v8 = vadd.f32 1.0, %v4368_v2  ;;  %v2141_v2 = vadd.f32 %v6061_v24, %v2128_v3 }
 0x77b   :  { %v4370_v13 = vpop.eup %4369  ;;  %4371 = vrcp.f32 %v2192_v8  ;;  %v2153_v33 = vpop.f32.mrf.mxu3  ;;  %v2204_v27 = vand.u32 2147483648, %v2192_v8  ;;  %vm2198_vm1 = vweird.f32 %v2192_v8 }
 0x77c   :  { %v2175_v11 = vmul.f32 %v4370_v13, %v2173_v1  ;;  %v2154_v40 = vadd.f32 %v2153_v33, %v6993_v12  ;;  %vm2180_vm14 = vweird.f32 %v4370_v13  ;;  %v2185_v33 = vand.u32 2147483648, %v2173_v1 }
 0x77d   :  { %v2129_v42 = vpop.f32.mrf.mxu1  ;;  %vm2181_vm2 = vmor %vm2179_vm0, %vm2180_vm14 }
 0x77e   :  { %v2176_v16 = vsub.f32 1.0, %v2175_v11  ;;  %v2167_v59 = vadd.f32 %v2166_v31, %v2154_v40  ;;  %v2202_v42 = vand.u32 2147483647, %v2192_v8  ;;  %v2183_v31 = vand.u32 2147483647, %v2173_v1 }
 0x780   :  { %v4088_v38 = vmul.f32 -1.442695, %v2167_v59  ;;  %v2177_v45 = vmul.f32 %v4370_v13, %v2176_v16  ;;  %v2205_v16 = vor.u32 1.1754944e-38, %v2204_v27  ;;  %vm2203_vm4 = vcmp.eq.f32.partialorder %v2202_v42, 8.507059e+37 }
 0x781   :  { %v4372_v34 = vpop.eup %4371  ;;  %vm2184_vm5 = vcmp.eq.f32.partialorder %v2183_v31, 8.507059e+37 }
 0x782   :  { %v2194_v4 = vmul.f32 %v4372_v34, %v2192_v8  ;;  %4373 = vpow2.f32 %v4088_v38  ;;  %v2178_v60 = vadd.f32 %v4370_v13, %v2177_v45  ;;  %vm2199_vm15 = vweird.f32 %v4372_v34 }
 0x783   :  { %v2155_v20 = vpop.f32.mrf.mxu3  ;;  %4375 = vtanh.f32 %v2141_v2  ;;  %vm2200_vm3 = vmor %vm2198_vm1, %vm2199_vm15  ;;  %v2186_v38 = vor.u32 1.1754944e-38, %v2185_v33 }
 0x784   :  { %v2195_v48 = vsub.f32 1.0, %v2194_v4  ;;  %v2182_v40 = vsel %vm2181_vm2, %v4370_v13, %v2178_v60 }
 0x786   :  { %v2196_v18 = vmul.f32 %v4372_v34, %v2195_v48  ;;  %v2187_v48 = vsel %vm2184_vm5, %v2186_v38, %v2182_v40  ;;  %v6996_v40 = vld [vmem:[#allocation35_spill] sm:$0xff]  ;;  %v6997_v38 = vld [vmem:[#allocation21_spill] sm:$0xff] }
 0x788   :  { %v4374_v11 = vpop.eup %4373  ;;  %v2197_v56 = vadd.f32 %v4372_v34, %v2196_v18 }
 0x789   :  { %v2212_v59 = vadd.f32 1.0, %v4374_v11  ;;  %v4376_v4 = vpop.eup %4375 }
 0x78a   :  { %v2201_v24 = vsel %vm2200_vm3, %v4372_v34, %v2197_v56  ;;  %v2229_v1 = vmul.f32 %v4376_v4, %v2187_v48  ;;  %v6999_v4 = vld [vmem:[#allocation4_spill] sm:$0xff] }
 0x78b   :  { %v2206_v3 = vsel %vm2203_vm4, %v2205_v16, %v2201_v24  ;;  %4377 = vrcp.f32 %v2212_v59  ;;  %v2224_v60 = vand.u32 2147483648, %v2212_v59  ;;  %v2222_v27 = vand.u32 2147483647, %v2212_v59  ;;  %v6995_v16 = vld [vmem:[#allocation32_spill] sm:$0xff] }
 0x78c   :  { %v2228_v45 = vmul.f32 %v2206_v3, %v6004_v63  ;;  %vm2218_vm7 = vweird.f32 %v2212_v59 }
 0x78d   :  { %v2225_v33 = vor.u32 1.1754944e-38, %v2224_v60  ;;  %vm2223_vm9 = vcmp.eq.f32.partialorder %v2222_v27, 8.507059e+37  ;;  %v7002_v60 = vld [vmem:[#allocation27_spill] sm:$0xff] }
 0x78e   :  { %v6093_v8 = vadd.f32 %v2229_v1, %v2228_v45  ;;  %v6998_v45 = vld [vmem:[#allocation31_spill] sm:$0xff] }
 0x790   :  { %4379 = vtanh.f32 %v6093_v8 }
 0x791   :  { %v4378_v20 = vpop.eup %4377 }
 0x792   :  { %v2214_v18 = vmul.f32 %v4378_v20, %v2212_v59  ;;  %vm2219_vm6 = vweird.f32 %v4378_v20 }
 0x793   :  { %vm2220_vm8 = vmor %vm2218_vm7, %vm2219_vm6 }
 0x794   :  { %v2215_v2 = vsub.f32 1.0, %v2214_v18  ;;  %v7001_v18 = vld [vmem:[#allocation6_spill] sm:$0xff] }
 0x796   :  { %v2216_v13 = vmul.f32 %v4378_v20, %v2215_v2  ;;  %v4380_v63 = vpop.eup %4379 }
 0x798   :  { %v2217_v34 = vadd.f32 %v4378_v20, %v2216_v13  ;;  %v7003_v13 = vld [vmem:[#allocation7_spill] sm:$0xff] }
 0x79a   :  { %v2221_v42 = vsel %vm2220_vm8, %v4378_v20, %v2217_v34  ;;  %v7000_v20 = vld [vmem:[#allocation23_spill] sm:$0xff]  ;;  %v7004_v34 = vld [vmem:[#allocation28_spill] sm:$0xff] }
 0x79b   :  { %v2226_v31 = vsel %vm2223_vm9, %v2225_v33, %v2221_v42  ;;  %v7005_v33 = vld [vmem:[#allocation10_spill] sm:$0xff] }
 0x79c   :  { %v2232_v11 = vmul.f32 %v4380_v63, %v2226_v31  ;;  %v7006_v63 = vld [vmem:[#allocation40_spill] sm:$0xff]  ;;  %v7007_v31 = vld [vmem:[#allocation11_spill] sm:$0xff] }
 0x79e   :  { %v2233_v56 = vpack.c.bf16 %v2232_v11, %v2232_v11 }
 0x7a0   :  { %2242 = vmatmul.bf16.vlgmr.msrb.gmra.mxu1 %v2233_v56  ;;  %2271 = vmatmul.bf16.vlgmr.msrb.gmra.mxu3 %v2233_v56 }
 0x7a1   :  { %2341 = vmatpush.bf16.msrb.mxu1 %v6958_v35  ;;  %2434 = vmatpush.bf16.msrb.mxu3 %v5277_v5 }
 0x7a5   :  { %2342 = vmatpush.bf16.msrb.mxu1 %v6959_v0  ;;  %2435 = vmatpush.bf16.msrb.mxu3 %v5312_v61 }
 0x7a9   :  { %2343 = vmatpush.bf16.msrb.mxu1 %v6960_v55  ;;  %2436 = vmatpush.bf16.msrb.mxu3 %v5348_v29 }
 0x7ad   :  { %2344 = vmatpush.bf16.msrb.mxu1 %v6961_v30  ;;  %2437 = vmatpush.bf16.msrb.mxu3 %v5384_v57 }
 0x7b0   :  { %2297 = vmatmul.bf16.vlgmr.msra.gmra.mxu1 %v2233_v56  ;;  %2323 = vmatmul.bf16.vlgmr.msra.gmra.mxu3 %v2233_v56 }
 0x7b1   :  { %2345 = vmatpush.bf16.msrb.mxu1 %v6962_v19  ;;  %2438 = vmatpush.bf16.msrb.mxu3 %v5420_v43 }
 0x7b5   :  { %2346 = vmatpush.bf16.msrb.mxu1 %v6963_v26  ;;  %2439 = vmatpush.bf16.msrb.mxu3 %v5456_v21 }
 0x7b9   :  { %2347 = vmatpush.bf16.msrb.mxu1 %v5841_v25  ;;  %2440 = vmatpush.bf16.msrb.mxu3 %v5498_v9 }
 0x7bd   :  { %2348 = vmatpush.bf16.msrb.mxu1 %v5873_v47  ;;  %2441 = vmatpush.bf16.msrb.mxu3 %v5534_v28 }
 0x7c0   :  { %2349 = vmatmul.bf16.vlgmr.msrb.gmra.mxu1 %v2233_v56  ;;  %v7008_v56 = vld [vmem:[#allocation41_spill] sm:$0xff] }
 0x7c1   :  { %2460 = vmatpush.bf16.msra.mxu1 %v5251_v52  ;;  %2486 = vmatpush.bf16.msra.mxu3 %v5546_v54 }
 0x7c5   :  { %2461 = vmatpush.bf16.msra.mxu1 %v5260_v17  ;;  %2487 = vmatpush.bf16.msra.mxu3 %v5603_v39 }
 0x7c9   :  { %2462 = vmatpush.bf16.msra.mxu1 %v5282_v15  ;;  %2488 = vmatpush.bf16.msra.mxu3 %v5637_v32 }
 0x7cd   :  { %2463 = vmatpush.bf16.msra.mxu1 %v5318_v23  ;;  %2489 = vmatpush.bf16.msra.mxu3 %v5681_v22 }
 0x7d1   :  { %2464 = vmatpush.bf16.msra.mxu1 %v5354_v10  ;;  %2490 = vmatpush.bf16.msra.mxu3 %v6932_v53 }
 0x7d5   :  { %2465 = vmatpush.bf16.msra.mxu1 %v5390_v44  ;;  %2491 = vmatpush.bf16.msra.mxu3 %v6934_v46 }
 0x7d9   :  { %2466 = vmatpush.bf16.msra.mxu1 %v5426_v51  ;;  %2492 = vmatpush.bf16.msra.mxu3 %v5821_v37 }
 0x7dd   :  { %2467 = vmatpush.bf16.msra.mxu1 %v5468_v49  ;;  %2493 = vmatpush.bf16.msra.mxu3 %v5843_v41 }
 0x7e1   :  { %2512 = vmatpush.bf16.msrb.mxu1 %v5470_v62 }
 0x7e5   :  { %2513 = vmatpush.bf16.msrb.mxu1 %v5507_v6 }
 0x7e9   :  { %2514 = vmatpush.bf16.msrb.mxu1 %v5558_v14 }
 0x7ed   :  { %2515 = vmatpush.bf16.msrb.mxu1 %v5610_v50 }
 0x7f1   :  { %2516 = vmatpush.bf16.msrb.mxu1 %v6933_v36 }
 0x7f5   :  { %2517 = vmatpush.bf16.msrb.mxu1 %v6935_v7 }
 0x7f9   :  { %2518 = vmatpush.bf16.msrb.mxu1 %v6995_v16 }
 0x7fd   :  { %2519 = vmatpush.bf16.msrb.mxu1 %v6996_v40 }
 0x81d   :  { %v2243_v59 = vpop.f32.mrf.mxu1 }
 0x81e   :  { %v2244_v24 = vadd.f32 %v6997_v38, %v2243_v59  ;;  %v7009_v59 = vld [vmem:[#allocation14_spill] sm:$0xff] }
 0x820   :  { %2248 = vst [vmem:[#allocation3 + $0x8] sm:$0xff] %v2244_v24  ;;  %v2249_v3 = vpack.c.bf16 %v2244_v24, %v2244_v24 }
 0x822   :  { %2258 = vmatmul.bf16.vlgmr.msrb.gmra.mxu2 %v2249_v3  ;;  %2284 = vmatmul.bf16.vlgmr.msra.gmra.mxu0 %v2249_v3 }
 0x823   :  { %v2272_v48 = vpop.f32.mrf.mxu3  ;;  %2418 = vmatpush.bf16.msrb.mxu2 %v6998_v45  ;;  %2447 = vmatpush.bf16.msra.mxu0 %v6999_v4  ;;  %v7010_v45 = vld [vmem:[#allocation42_spill] sm:$0xff] }
 0x825   :  { %v2245_v1 = vpop.f32.mrf.mxu1 }
 0x826   :  { %v7011_v1 = vld [vmem:[#allocation15_spill] sm:$0xff] }
 0x827   :  { %2419 = vmatpush.bf16.msrb.mxu2 %v7000_v20  ;;  %2448 = vmatpush.bf16.msra.mxu0 %v7001_v18 }
 0x82b   :  { %v2274_v2 = vpop.f32.mrf.mxu3  ;;  %2420 = vmatpush.bf16.msrb.mxu2 %v7002_v60  ;;  %2449 = vmatpush.bf16.msra.mxu0 %v7003_v13  ;;  %v7013_v60 = vld [vmem:[#allocation18_spill] sm:$0xff] }
 0x82c   :  { %v7012_v2 = vld [vmem:[#allocation44_spill] sm:$0xff] }
 0x82d   :  { %v2298_v27 = vpop.f32.mrf.mxu1 }
 0x82f   :  { %2421 = vmatpush.bf16.msrb.mxu2 %v7004_v34  ;;  %2450 = vmatpush.bf16.msra.mxu0 %v7005_v33  ;;  %v7015_v34 = vld [vmem:[#allocation19_spill] sm:$0xff] }
 0x832   :  { %2310 = vmatmul.bf16.vlgmr.msra.gmra.mxu2 %v2249_v3  ;;  %2336 = vmatmul.bf16.vlgmr.msrb.gmra.mxu0 %v2249_v3  ;;  %v7014_v3 = vld [vmem:[#allocation5_spill] sm:$0xff] }
 0x833   :  { %v2324_v42 = vpop.f32.mrf.mxu3  ;;  %2422 = vmatpush.bf16.msrb.mxu2 %v7006_v63  ;;  %2451 = vmatpush.bf16.msra.mxu0 %v7007_v31  ;;  %v7016_v63 = vld [vmem:[#allocation9_spill] sm:$0xff] }
 0x835   :  { %v2300_v11 = vpop.f32.mrf.mxu1 }
 0x836   :  { %v7017_v11 = vld [vmem:[#allocation22_spill] sm:$0xff] }
 0x837   :  { %2423 = vmatpush.bf16.msrb.mxu2 %v7008_v56  ;;  %2452 = vmatpush.bf16.msra.mxu0 %v7009_v59  ;;  %v7018_v59 = vld [vmem:[#allocation8_spill] sm:$0xff] }
 0x83b   :  { %v2326_v24 = vpop.f32.mrf.mxu3  ;;  %2424 = vmatpush.bf16.msrb.mxu2 %v7010_v45  ;;  %2453 = vmatpush.bf16.msra.mxu0 %v7011_v1  ;;  %v7020_v45 = vld [vmem:[#allocation12_spill] sm:$0xff]  ;;  %v7021_v1 = vld [vmem:[#allocation29_spill] sm:$0xff] }
 0x83c   :  { %v7019_v24 = vld [vmem:[#allocation24_spill] sm:$0xff] }
 0x83d   :  { %v2350_v20 = vpop.f32.mrf.mxu1 }
 0x83f   :  { %2425 = vmatpush.bf16.msrb.mxu2 %v7012_v2  ;;  %2454 = vmatpush.bf16.msra.mxu0 %v7013_v60  ;;  %v7022_v2 = vld [vmem:[#allocation13_spill] sm:$0xff] }
 0x840   :  { %v7023_v60 = vld [vmem:[#allocation33_spill] sm:$0xff] }
 0x843   :  { %2473 = vmatpush.bf16.msra.mxu2 %v7014_v3  ;;  %2499 = vmatpush.bf16.msrb.mxu0 %v7015_v34  ;;  %v7024_v3 = vld [vmem:[#allocation17_spill] sm:$0xff]  ;;  %v7025_v34 = vld [vmem:[#allocation36_spill] sm:$0xff] }
 0x845   :  { %v2352_v56 = vpop.f32.mrf.mxu1 }
 0x846   :  { %v7028_v56 = vld [vmem:[#allocation20_spill] sm:$0xff] }
 0x847   :  { %2474 = vmatpush.bf16.msra.mxu2 %v7016_v63  ;;  %2500 = vmatpush.bf16.msrb.mxu0 %v7017_v11  ;;  %v7026_v63 = vld [vmem:[#allocation16_spill] sm:$0xff]  ;;  %v7027_v11 = vld [vmem:[#allocation38_spill] sm:$0xff] }
 0x84b   :  { %2475 = vmatpush.bf16.msra.mxu2 %v7018_v59  ;;  %2501 = vmatpush.bf16.msrb.mxu0 %v7019_v24  ;;  %v7029_v59 = vld [vmem:[#allocation39_spill] sm:$0xff] }
 0x84f   :  { %2476 = vmatpush.bf16.msra.mxu2 %v7020_v45  ;;  %2502 = vmatpush.bf16.msrb.mxu0 %v7021_v1  ;;  %v7030_v45 = vld [vmem:[#allocation45_spill] sm:$0xff] }
 0x853   :  { %2477 = vmatpush.bf16.msra.mxu2 %v7022_v2  ;;  %2503 = vmatpush.bf16.msrb.mxu0 %v7023_v60  ;;  %v7031_v60 = vld [vmem:[#allocation43_spill] sm:$0xff] }
 0x857   :  { %2478 = vmatpush.bf16.msra.mxu2 %v7024_v3  ;;  %2504 = vmatpush.bf16.msrb.mxu0 %v7025_v34 }
 0x85b   :  { %2479 = vmatpush.bf16.msra.mxu2 %v7026_v63  ;;  %2505 = vmatpush.bf16.msrb.mxu0 %v7027_v11 }
 0x85f   :  { %2480 = vmatpush.bf16.msra.mxu2 %v7028_v56  ;;  %2506 = vmatpush.bf16.msrb.mxu0 %v7029_v59 }
 0x89f   :  { %v2285_v24 = vpop.f32.mrf.mxu0 }
 0x8a0   :  { %v2286_v31 = vadd.f32 %v2285_v24, %v7030_v45 }
 0x8a2   :  { %v2299_v1 = vadd.f32 %v2298_v27, %v2286_v31 }
 0x8a4   :  { %v4090_v33 = vmul.f32 -1.442695, %v2299_v1 }
 0x8a5   :  { %v2259_v2 = vpop.f32.mrf.mxu2 }
 0x8a6   :  { %4381 = vpow2.f32 %v4090_v33  ;;  %v2260_v13 = vadd.f32 %v2259_v2, %v7031_v60 }
 0x8a7   :  { %v2287_v3 = vpop.f32.mrf.mxu0 }
 0x8a8   :  { %v2273_v18 = vadd.f32 %v2272_v48, %v2260_v13 }
 0x8aa   :  { %v4089_v34 = vmul.f32 -1.442695, %v2273_v18 }
 0x8ac   :  { %v4382_v4 = vpop.eup %4381  ;;  %4383 = vpow2.f32 %v4089_v34 }
 0x8ad   :  { %v2376_v63 = vadd.f32 1.0, %v4382_v4  ;;  %v2261_v11 = vpop.f32.mrf.mxu2 }
 0x8af   :  { %4385 = vrcp.f32 %v2376_v63  ;;  %v2337_v56 = vpop.f32.mrf.mxu0  ;;  %vm2382_vm11 = vweird.f32 %v2376_v63 }
 0x8b0   :  { %v2338_v59 = vadd.f32 %v2337_v56, %v6993_v12  ;;  %v2388_v12 = vand.u32 2147483648, %v2376_v63 }
 0x8b2   :  { %v4384_v38 = vpop.eup %4383  ;;  %v2351_v40 = vadd.f32 %v2350_v20, %v2338_v59  ;;  %v2386_v20 = vand.u32 2147483647, %v2376_v63 }
 0x8b3   :  { %v2357_v24 = vadd.f32 1.0, %v4384_v38 }
 0x8b4   :  { %v4091_v27 = vmul.f32 -1.442695, %v2351_v40  ;;  %vm2387_vm15 = vcmp.eq.f32.partialorder %v2386_v20, 8.507059e+37 }
 0x8b5   :  { %v4386_v31 = vpop.eup %4385  ;;  %4387 = vrcp.f32 %v2357_v24  ;;  %v2311_v33 = vpop.f32.mrf.mxu2  ;;  %vm2363_vm14 = vweird.f32 %v2357_v24 }
 0x8b6   :  { %v2378_v1 = vmul.f32 %v4386_v31, %v2376_v63  ;;  %4389 = vpow2.f32 %v4091_v27  ;;  %v2312_v48 = vadd.f32 %v2311_v33, %v6994_v58  ;;  %vm2383_vm10 = vweird.f32 %v4386_v31 }
 0x8b7   :  { %v2339_v18 = vpop.f32.mrf.mxu0  ;;  %vm2384_vm12 = vmor %vm2382_vm11, %vm2383_vm10  ;;  %v2369_v27 = vand.u32 2147483648, %v2357_v24 }
 0x8b8   :  { %v2379_v13 = vsub.f32 1.0, %v2378_v1  ;;  %v2325_v4 = vadd.f32 %v2324_v42, %v2312_v48  ;;  %v2367_v1 = vand.u32 2147483647, %v2357_v24  ;;  %v2389_v42 = vor.u32 1.1754944e-38, %v2388_v12 }
 0x8ba   :  { %v2380_v3 = vmul.f32 %v4386_v31, %v2379_v13  ;;  %4391 = vtanh.f32 %v2325_v4  ;;  %v2370_v13 = vor.u32 1.1754944e-38, %v2369_v27  ;;  %vm2368_vm1 = vcmp.eq.f32.partialorder %v2367_v1, 8.507059e+37 }
 0x8bb   :  { %v4388_v34 = vpop.eup %4387 }
 0x8bc   :  { %v4390_v11 = vpop.eup %4389  ;;  %v2359_v2 = vmul.f32 %v4388_v34, %v2357_v24  ;;  %v2381_v56 = vadd.f32 %v4386_v31, %v2380_v3  ;;  %vm2364_vm13 = vweird.f32 %v4388_v34 }
 0x8bd   :  { %v2396_v59 = vadd.f32 1.0, %v4390_v11  ;;  %v2313_v38 = vpop.f32.mrf.mxu2  ;;  %vm2365_vm0 = vmor %vm2363_vm14, %vm2364_vm13 }
 0x8be   :  { %v2360_v40 = vsub.f32 1.0, %v2359_v2  ;;  %v2385_v18 = vsel %vm2384_vm12, %v4386_v31, %v2381_v56 }
 0x8bf   :  { %4393 = vrcp.f32 %v2396_v59  ;;  %v2390_v3 = vsel %vm2387_vm15, %v2389_v42, %v2385_v18  ;;  %v2408_v31 = vand.u32 2147483648, %v2396_v59  ;;  %v2406_v24 = vand.u32 2147483647, %v2396_v59  ;;  %v7033_v18 = vld [vmem:[#allocation21_spill] sm:$0xff] }
 0x8c0   :  { %v2361_v33 = vmul.f32 %v4388_v34, %v2360_v40  ;;  %v4392_v11 = vpop.eup %4391  ;;  %v2412_v58 = vmul.f32 %v2390_v3, %v6093_v8  ;;  %vm2402_vm3 = vweird.f32 %v2396_v59  ;;  %v6223_v3 = vld [vmem:[%s6720_s6 + $0x38] sm:$0xff] }
 0x8c1   :  { %vm2407_vm5 = vcmp.eq.f32.partialorder %v2406_v24, 8.507059e+37  ;;  %7034 = vst [vmem:[#allocation25_spill] sm:$0xff] %v6223_v3 }
 0x8c2   :  { %v2362_v48 = vadd.f32 %v4388_v34, %v2361_v33 }
 0x8c4   :  { %v2366_v38 = vsel %vm2365_vm0, %v4388_v34, %v2362_v48  ;;  %v2409_v34 = vor.u32 1.1754944e-38, %v2408_v31  ;;  %v7039_v31 = vld [vmem:[#allocation7_spill] sm:$0xff] }
 0x8c5   :  { %v4394_v2 = vpop.eup %4393  ;;  %v2371_v63 = vsel %vm2368_vm1, %v2370_v13, %v2366_v38 }
 0x8c6   :  { %v2398_v4 = vmul.f32 %v4394_v2, %v2396_v59  ;;  %v2413_v60 = vmul.f32 %v4392_v11, %v2371_v63  ;;  %vm2403_vm2 = vweird.f32 %v4394_v2  ;;  %v7035_v11 = vld [vmem:[#allocation4_spill] sm:$0xff]  ;;  %v6232_v63 = vld [vmem:[%s6720_s6 + $0x30] sm:$0xff] }
 0x8c7   :  { %vm2404_vm4 = vmor %vm2402_vm3, %vm2403_vm2  ;;  %7036 = vst [vmem:[#allocation26_spill] sm:$0xff] %v6232_v63 }
 0x8c8   :  { %v2399_v40 = vsub.f32 1.0, %v2398_v4  ;;  %v6174_v45 = vadd.f32 %v2413_v60, %v2412_v58  ;;  %v7032_v58 = vld [vmem:[#allocation35_spill] sm:$0xff]  ;;  %v7037_v4 = vld [vmem:[#allocation6_spill] sm:$0xff] }
 0x8ca   :  { %v2400_v12 = vmul.f32 %v4394_v2, %v2399_v40  ;;  %4395 = vtanh.f32 %v6174_v45  ;;  %v6239_v40 = vld [vmem:[%s6720_s6 + $0x28] sm:$0xff] }
 0x8cb   :  { %7038 = vst [vmem:[#allocation30_spill] sm:$0xff] %v6239_v40 }
 0x8cc   :  { %v2401_v56 = vadd.f32 %v4394_v2, %v2400_v12 }
 0x8ce   :  { %v2405_v20 = vsel %vm2404_vm4, %v4394_v2, %v2401_v56  ;;  %v6246_v56 = vld [vmem:[%s6720_s6 + $0x20] sm:$0xff] }
 0x8cf   :  { %v2410_v27 = vsel %vm2407_vm5, %v2409_v34, %v2405_v20  ;;  %7040 = vst [vmem:[#allocation34_spill] sm:$0xff] %v6246_v56  ;;  %v7041_v34 = vld [vmem:[#allocation10_spill] sm:$0xff] }
 0x8d0   :  { %v4396_v33 = vpop.eup %4395  ;;  %v6253_v20 = vld [vmem:[%s6720_s6 + $0x18] sm:$0xff] }
 0x8d1   :  { %v2416_v1 = vmul.f32 %v4396_v33, %v2410_v27  ;;  %7042 = vst [vmem:[#allocation37_spill] sm:$0xff] %v6253_v20  ;;  %v7043_v27 = vld [vmem:[#allocation11_spill] sm:$0xff] }
 0x8d3   :  { %v2417_v8 = vpack.c.bf16 %v2416_v1, %v2416_v1  ;;  %v6260_v1 = vld [vmem:[%s6720_s6 + $0x10] sm:$0xff] }
 0x8d4   :  { %7044 = vst [vmem:[#allocation31_spill] sm:$0xff] %v6260_v1 }
 0x8d5   :  { %2426 = vmatmul.bf16.vlgmr.msrb.gmra.mxu2 %v2417_v8  ;;  %2455 = vmatmul.bf16.vlgmr.msra.gmra.mxu0 %v2417_v8 }
 0x8d6   :  { %2525 = vmatpush.bf16.msrb.mxu2 %v6958_v35  ;;  %2618 = vmatpush.bf16.msra.mxu0 %v5277_v5 }
 0x8da   :  { %2526 = vmatpush.bf16.msrb.mxu2 %v6959_v0  ;;  %2619 = vmatpush.bf16.msra.mxu0 %v5312_v61 }
 0x8de   :  { %2527 = vmatpush.bf16.msrb.mxu2 %v6960_v55  ;;  %2620 = vmatpush.bf16.msra.mxu0 %v5348_v29 }
 0x8e2   :  { %2528 = vmatpush.bf16.msrb.mxu2 %v6961_v30  ;;  %2621 = vmatpush.bf16.msra.mxu0 %v5384_v57 }
 0x8e5   :  { %2481 = vmatmul.bf16.vlgmr.msra.gmra.mxu2 %v2417_v8  ;;  %2507 = vmatmul.bf16.vlgmr.msrb.gmra.mxu0 %v2417_v8 }
 0x8e6   :  { %2529 = vmatpush.bf16.msrb.mxu2 %v6962_v19  ;;  %2622 = vmatpush.bf16.msra.mxu0 %v5420_v43 }
 0x8ea   :  { %2530 = vmatpush.bf16.msrb.mxu2 %v6963_v26  ;;  %2623 = vmatpush.bf16.msra.mxu0 %v5456_v21 }
 0x8ee   :  { %2531 = vmatpush.bf16.msrb.mxu2 %v5841_v25  ;;  %2624 = vmatpush.bf16.msra.mxu0 %v5498_v9 }
 0x8f2   :  { %2532 = vmatpush.bf16.msrb.mxu2 %v5873_v47  ;;  %2625 = vmatpush.bf16.msra.mxu0 %v5534_v28 }
 0x8f5   :  { %2533 = vmatmul.bf16.vlgmr.msrb.gmra.mxu2 %v2417_v8  ;;  %v7045_v8 = vld [vmem:[#allocation14_spill] sm:$0xff] }
 0x8f6   :  { %2644 = vmatpush.bf16.msra.mxu2 %v5251_v52  ;;  %2670 = vmatpush.bf16.msrb.mxu0 %v5546_v54 }
 0x8fa   :  { %2645 = vmatpush.bf16.msra.mxu2 %v5260_v17  ;;  %2671 = vmatpush.bf16.msrb.mxu0 %v5603_v39 }
 0x8fe   :  { %2646 = vmatpush.bf16.msra.mxu2 %v5282_v15  ;;  %2672 = vmatpush.bf16.msrb.mxu0 %v5637_v32 }
 0x902   :  { %2647 = vmatpush.bf16.msra.mxu2 %v5318_v23  ;;  %2673 = vmatpush.bf16.msrb.mxu0 %v5681_v22 }
 0x906   :  { %2648 = vmatpush.bf16.msra.mxu2 %v5354_v10  ;;  %2674 = vmatpush.bf16.msrb.mxu0 %v6932_v53 }
 0x90a   :  { %2649 = vmatpush.bf16.msra.mxu2 %v5390_v44  ;;  %2675 = vmatpush.bf16.msrb.mxu0 %v6934_v46 }
 0x90e   :  { %2650 = vmatpush.bf16.msra.mxu2 %v5426_v51  ;;  %2676 = vmatpush.bf16.msrb.mxu0 %v5821_v37 }
 0x912   :  { %2651 = vmatpush.bf16.msra.mxu2 %v5468_v49  ;;  %2677 = vmatpush.bf16.msrb.mxu0 %v5843_v41 }
 0x916   :  { %2696 = vmatpush.bf16.msrb.mxu2 %v5470_v62 }
 0x91a   :  { %2697 = vmatpush.bf16.msrb.mxu2 %v5507_v6 }
 0x91e   :  { %2698 = vmatpush.bf16.msrb.mxu2 %v5558_v14 }
 0x922   :  { %2699 = vmatpush.bf16.msrb.mxu2 %v5610_v50 }
 0x926   :  { %2700 = vmatpush.bf16.msrb.mxu2 %v6933_v36 }
 0x92a   :  { %2701 = vmatpush.bf16.msrb.mxu2 %v6935_v7 }
 0x92e   :  { %2702 = vmatpush.bf16.msrb.mxu2 %v6995_v16 }
 0x932   :  { %2703 = vmatpush.bf16.msrb.mxu2 %v7032_v58 }
 0x952   :  { %v6217_v60 = vpop.f32.mrf.mxu0 }
 0x958   :  { %v2427_v59 = vpop.f32.mrf.mxu2 }
 0x959   :  { %v2428_v42 = vadd.f32 %v7033_v18, %v2427_v59  ;;  %v6267_v59 = vld [vmem:[%s6720_s6 + $0x8] sm:$0xff]  ;;  %v7047_v18 = vld [vmem:[#allocation15_spill] sm:$0xff] }
 0x95a   :  { %v2458_v48 = vpop.f32.mrf.mxu0  ;;  %7046 = vst [vmem:[#allocation23_spill] sm:$0xff] %v6267_v59 }
 0x95b   :  { %2432 = vst [vmem:[#allocation3 + $0x10] sm:$0xff] %v2428_v42  ;;  %v2433_v13 = vpack.c.bf16 %v2428_v42, %v2428_v42  ;;  %v6274_v48 = vld [vmem:[%s6720_s6] sm:$0xff] }
 0x95c   :  { %7048 = vst [vmem:[#allocation27_spill] sm:$0xff] %v6274_v48 }
 0x95d   :  { %2442 = vmatmul.bf16.vlgmr.msrb.gmra.mxu3 %v2433_v13  ;;  %2468 = vmatmul.bf16.vlgmr.msra.gmra.mxu1 %v2433_v13 }
 0x95e   :  { %2602 = vmatpush.bf16.msrb.mxu3 %v6223_v3  ;;  %2631 = vmatpush.bf16.msra.mxu1 %v7035_v11 }
 0x960   :  { %v2429_v38 = vpop.f32.mrf.mxu2 }
 0x961   :  { %v7050_v38 = vld [vmem:[#allocation5_spill] sm:$0xff] }
 0x962   :  { %v6227_v2 = vpop.f32.mrf.mxu0  ;;  %2603 = vmatpush.bf16.msrb.mxu3 %v6232_v63  ;;  %2632 = vmatpush.bf16.msra.mxu1 %v7037_v4 }
 0x966   :  { %2604 = vmatpush.bf16.msrb.mxu3 %v6239_v40  ;;  %2633 = vmatpush.bf16.msra.mxu1 %v7039_v31 }
 0x968   :  { %v2482_v12 = vpop.f32.mrf.mxu2 }
 0x96a   :  { %v2510_v24 = vpop.f32.mrf.mxu0  ;;  %2605 = vmatpush.bf16.msrb.mxu3 %v6246_v56  ;;  %2634 = vmatpush.bf16.msra.mxu1 %v7041_v34 }
 0x96b   :  { %v7051_v24 = vld [vmem:[#allocation19_spill] sm:$0xff] }
 0x96d   :  { %2494 = vmatmul.bf16.vlgmr.msra.gmra.mxu3 %v2433_v13  ;;  %2520 = vmatmul.bf16.vlgmr.msrb.gmra.mxu1 %v2433_v13  ;;  %v7049_v13 = vld [vmem:[#allocation18_spill] sm:$0xff] }
 0x96e   :  { %2606 = vmatpush.bf16.msrb.mxu3 %v6253_v20  ;;  %2635 = vmatpush.bf16.msra.mxu1 %v7043_v27  ;;  %v7056_v27 = vld [vmem:[#allocation12_spill] sm:$0xff]  ;;  %v7057_v20 = vld [vmem:[#allocation29_spill] sm:$0xff] }
 0x970   :  { %v2484_v33 = vpop.f32.mrf.mxu2 }
 0x971   :  { %v7052_v33 = vld [vmem:[#allocation9_spill] sm:$0xff] }
 0x972   :  { %2607 = vmatpush.bf16.msrb.mxu3 %v6260_v1  ;;  %2636 = vmatpush.bf16.msra.mxu1 %v7045_v8  ;;  %v7053_v8 = vld [vmem:[#allocation22_spill] sm:$0xff]  ;;  %v7055_v1 = vld [vmem:[#allocation24_spill] sm:$0xff] }
 0x976   :  { %2608 = vmatpush.bf16.msrb.mxu3 %v6267_v59  ;;  %2637 = vmatpush.bf16.msra.mxu1 %v7047_v18  ;;  %v7054_v18 = vld [vmem:[#allocation8_spill] sm:$0xff] }
 0x978   :  { %v2534_v42 = vpop.f32.mrf.mxu2 }
 0x97a   :  { %2609 = vmatpush.bf16.msrb.mxu3 %v6274_v48  ;;  %2638 = vmatpush.bf16.msra.mxu1 %v7049_v13  ;;  %v7058_v48 = vld [vmem:[#allocation13_spill] sm:$0xff] }
 0x97b   :  { %v7059_v13 = vld [vmem:[#allocation33_spill] sm:$0xff] }
 0x97e   :  { %2657 = vmatpush.bf16.msra.mxu3 %v7050_v38  ;;  %2683 = vmatpush.bf16.msrb.mxu1 %v7051_v24  ;;  %v7060_v38 = vld [vmem:[#allocation17_spill] sm:$0xff]  ;;  %v7061_v24 = vld [vmem:[#allocation36_spill] sm:$0xff] }
 0x980   :  { %v2536_v59 = vpop.f32.mrf.mxu2 }
 0x981   :  { %v7064_v59 = vld [vmem:[#allocation20_spill] sm:$0xff] }
 0x982   :  { %2658 = vmatpush.bf16.msra.mxu3 %v7052_v33  ;;  %2684 = vmatpush.bf16.msrb.mxu1 %v7053_v8  ;;  %v7062_v33 = vld [vmem:[#allocation16_spill] sm:$0xff]  ;;  %v7063_v8 = vld [vmem:[#allocation38_spill] sm:$0xff] }
 0x986   :  { %2659 = vmatpush.bf16.msra.mxu3 %v7054_v18  ;;  %2685 = vmatpush.bf16.msrb.mxu1 %v7055_v1  ;;  %v7065_v18 = vld [vmem:[#allocation39_spill] sm:$0xff] }
 0x98a   :  { %2660 = vmatpush.bf16.msra.mxu3 %v7056_v27  ;;  %2686 = vmatpush.bf16.msrb.mxu1 %v7057_v20  ;;  %v7066_v27 = vld [vmem:[#allocation45_spill] sm:$0xff] }
 0x98e   :  { %2661 = vmatpush.bf16.msra.mxu3 %v7058_v48  ;;  %2687 = vmatpush.bf16.msrb.mxu1 %v7059_v13  ;;  %v7067_v13 = vld [vmem:[#allocation43_spill] sm:$0xff] }
 0x992   :  { %2662 = vmatpush.bf16.msra.mxu3 %v7060_v38  ;;  %2688 = vmatpush.bf16.msrb.mxu1 %v7061_v24 }
 0x996   :  { %2663 = vmatpush.bf16.msra.mxu3 %v7062_v33  ;;  %2689 = vmatpush.bf16.msrb.mxu1 %v7063_v8 }
 0x99a   :  { %2664 = vmatpush.bf16.msra.mxu3 %v7064_v59  ;;  %2690 = vmatpush.bf16.msrb.mxu1 %v7065_v18  ;;  %v7068_v18 = vld [vmem:[#allocation46_spill] sm:$0xff] }
 0x9da   :  { %v2469_v1 = vpop.f32.mrf.mxu1 }
 0x9db   :  { %v2470_v34 = vadd.f32 %v2469_v1, %v7066_v27 }
 0x9dd   :  { %v2483_v20 = vadd.f32 %v2482_v12, %v2470_v34 }
 0x9df   :  { %v4093_v56 = vmul.f32 -1.442695, %v2483_v20 }
 0x9e0   :  { %v2443_v48 = vpop.f32.mrf.mxu3 }
 0x9e1   :  { %4397 = vpow2.f32 %v4093_v56  ;;  %v2444_v31 = vadd.f32 %v2443_v48, %v7067_v13 }
 0x9e2   :  { %v2471_v38 = vpop.f32.mrf.mxu1 }
 0x9e3   :  { %v2457_v24 = vadd.f32 %v6217_v60, %v2444_v31  ;;  %v7069_v38 = vld [vmem:[#allocation47_spill] sm:$0xff] }
 0x9e5   :  { %v4092_v40 = vmul.f32 -1.442695, %v2457_v24 }
 0x9e7   :  { %v4398_v33 = vpop.eup %4397  ;;  %4399 = vpow2.f32 %v4092_v40 }
 0x9e8   :  { %v2560_v8 = vadd.f32 1.0, %v4398_v33  ;;  %v2445_v4 = vpop.f32.mrf.mxu3 }
 0x9ea   :  { %4401 = vrcp.f32 %v2560_v8  ;;  %v2521_v59 = vpop.f32.mrf.mxu1  ;;  %vm2566_vm7 = vweird.f32 %v2560_v8  ;;  %v2570_v13 = vand.u32 2147483647, %v2560_v8 }
 0x9eb   :  { %v2522_v63 = vadd.f32 %v2521_v59, %v7068_v18 }
 0x9ec   :  { %vm2571_vm11 = vcmp.eq.f32.partialorder %v2570_v13, 8.507059e+37 }
 0x9ed   :  { %v4400_v11 = vpop.eup %4399  ;;  %v2535_v1 = vadd.f32 %v2534_v42, %v2522_v63  ;;  %v2572_v63 = vand.u32 2147483648, %v2560_v8 }
 0x9ee   :  { %v2541_v12 = vadd.f32 1.0, %v4400_v11 }
 0x9ef   :  { %v4094_v34 = vmul.f32 -1.442695, %v2535_v1 }
 0x9f0   :  { %v4402_v20 = vpop.eup %4401  ;;  %4403 = vrcp.f32 %v2541_v12  ;;  %v2495_v56 = vpop.f32.mrf.mxu3  ;;  %vm2547_vm10 = vweird.f32 %v2541_v12 }
 0x9f1   :  { %v2562_v48 = vmul.f32 %v4402_v20, %v2560_v8  ;;  %4405 = vpow2.f32 %v4094_v34  ;;  %v2496_v60 = vadd.f32 %v2495_v56, %v7069_v38  ;;  %vm2567_vm6 = vweird.f32 %v4402_v20 }
 0x9f2   :  { %v2523_v31 = vpop.f32.mrf.mxu1  ;;  %vm2568_vm8 = vmor %vm2566_vm7, %vm2567_vm6  ;;  %v2553_v34 = vand.u32 2147483648, %v2541_v12 }
 0x9f3   :  { %v2563_v24 = vsub.f32 1.0, %v2562_v48  ;;  %v2509_v4 = vadd.f32 %v6227_v2, %v2496_v60  ;;  %v2551_v48 = vand.u32 2147483647, %v2541_v12  ;;  %v2573_v2 = vor.u32 1.1754944e-38, %v2572_v63 }
 0x9f5   :  { %v2564_v40 = vmul.f32 %v4402_v20, %v2563_v24  ;;  %4407 = vtanh.f32 %v2509_v4  ;;  %v2554_v24 = vor.u32 1.1754944e-38, %v2553_v34  ;;  %vm2552_vm13 = vcmp.eq.f32.partialorder %v2551_v48, 8.507059e+37 }
 0x9f6   :  { %v4404_v33 = vpop.eup %4403 }
 0x9f7   :  { %v4406_v27 = vpop.eup %4405  ;;  %v2543_v59 = vmul.f32 %v4404_v33, %v2541_v12  ;;  %v2565_v18 = vadd.f32 %v4402_v20, %v2564_v40  ;;  %vm2548_vm9 = vweird.f32 %v4404_v33 }
 0x9f8   :  { %v2580_v11 = vadd.f32 1.0, %v4406_v27  ;;  %v2497_v42 = vpop.f32.mrf.mxu3  ;;  %vm2549_vm12 = vmor %vm2547_vm10, %vm2548_vm9 }
 0x9f9   :  { %v2544_v1 = vsub.f32 1.0, %v2543_v59  ;;  %v2569_v31 = vsel %vm2568_vm8, %v4402_v20, %v2565_v18 }
 0x9fa   :  { %4409 = vrcp.f32 %v2580_v11  ;;  %v2574_v40 = vsel %vm2571_vm11, %v2573_v2, %v2569_v31  ;;  %v2592_v18 = vand.u32 2147483648, %v2580_v11  ;;  %v2590_v13 = vand.u32 2147483647, %v2580_v11  ;;  %v6347_v31 = vld [vmem:[%s6719_s7] ss:$0 sm:$0xff] }
 0x9fb   :  { %v2545_v56 = vmul.f32 %v4404_v33, %v2544_v1  ;;  %v4408_v27 = vpop.eup %4407  ;;  %v2596_v38 = vmul.f32 %v2574_v40, %v6174_v45  ;;  %vm2586_vm15 = vweird.f32 %v2580_v11  ;;  %7071 = vst [vmem:[#allocation28_spill] sm:$0xff] %v6347_v31  ;;  %v7072_v40 = vld [vmem:[#allocation25_spill] sm:$0xff] }
 0x9fc   :  { %vm2591_vm1 = vcmp.eq.f32.partialorder %v2590_v13, 8.507059e+37 }
 0x9fd   :  { %v2546_v60 = vadd.f32 %v4404_v33, %v2545_v56 }
 0x9ff   :  { %v2550_v42 = vsel %vm2549_vm12, %v4404_v33, %v2546_v60  ;;  %v2593_v33 = vor.u32 1.1754944e-38, %v2592_v18  ;;  %v7077_v18 = vld [vmem:[#allocation7_spill] sm:$0xff] }
 0xa00   :  { %v4410_v59 = vpop.eup %4409  ;;  %v2555_v8 = vsel %vm2552_vm13, %v2554_v24, %v2550_v42 }
 0xa01   :  { %v2582_v4 = vmul.f32 %v4410_v59, %v2580_v11  ;;  %v2597_v3 = vmul.f32 %v4408_v27, %v2555_v8  ;;  %vm2587_vm14 = vweird.f32 %v4410_v59  ;;  %v7073_v27 = vld [vmem:[#allocation4_spill] sm:$0xff]  ;;  %v7074_v8 = vld [vmem:[#allocation26_spill] sm:$0xff] }
 0xa02   :  { %vm2588_vm0 = vmor %vm2586_vm15, %vm2587_vm14 }
 0xa03   :  { %v2583_v1 = vsub.f32 1.0, %v2582_v4  ;;  %v6301_v58 = vadd.f32 %v2597_v3, %v2596_v38  ;;  %v7070_v3 = vld [vmem:[#allocation35_spill] sm:$0xff]  ;;  %v7075_v4 = vld [vmem:[#allocation6_spill] sm:$0xff] }
 0xa05   :  { %v2584_v20 = vmul.f32 %v4410_v59, %v2583_v1  ;;  %4411 = vtanh.f32 %v6301_v58  ;;  %v7076_v1 = vld [vmem:[#allocation30_spill] sm:$0xff] }
 0xa07   :  { %v2585_v12 = vadd.f32 %v4410_v59, %v2584_v20 }
 0xa09   :  { %v2589_v63 = vsel %vm2588_vm0, %v4410_v59, %v2585_v12  ;;  %v7078_v12 = vld [vmem:[#allocation34_spill] sm:$0xff] }
 0xa0a   :  { %v2594_v34 = vsel %vm2591_vm1, %v2593_v33, %v2589_v63  ;;  %v7079_v33 = vld [vmem:[#allocation10_spill] sm:$0xff]  ;;  %v7080_v63 = vld [vmem:[#allocation37_spill] sm:$0xff] }
 0xa0b   :  { %v4412_v56 = vpop.eup %4411 }
 0xa0c   :  { %v2600_v48 = vmul.f32 %v4412_v56, %v2594_v34  ;;  %v7081_v34 = vld [vmem:[#allocation11_spill] sm:$0xff] }
 0xa0e   :  { %v2601_v45 = vpack.c.bf16 %v2600_v48, %v2600_v48  ;;  %v7082_v48 = vld [vmem:[#allocation31_spill] sm:$0xff] }
 0xa10   :  { %2610 = vmatmul.bf16.vlgmr.msrb.gmra.mxu3 %v2601_v45  ;;  %2639 = vmatmul.bf16.vlgmr.msra.gmra.mxu1 %v2601_v45 }
 0xa11   :  { %2709 = vmatpush.bf16.msrb.mxu3 %v6958_v35  ;;  %2802 = vmatpush.bf16.msra.mxu1 %v5277_v5 }
 0xa15   :  { %2710 = vmatpush.bf16.msrb.mxu3 %v6959_v0  ;;  %2803 = vmatpush.bf16.msra.mxu1 %v5312_v61 }
 0xa19   :  { %2711 = vmatpush.bf16.msrb.mxu3 %v6960_v55  ;;  %2804 = vmatpush.bf16.msra.mxu1 %v5348_v29 }
 0xa1d   :  { %2712 = vmatpush.bf16.msrb.mxu3 %v6961_v30  ;;  %2805 = vmatpush.bf16.msra.mxu1 %v5384_v57 }
 0xa20   :  { %2665 = vmatmul.bf16.vlgmr.msra.gmra.mxu3 %v2601_v45  ;;  %2691 = vmatmul.bf16.vlgmr.msrb.gmra.mxu1 %v2601_v45 }
 0xa21   :  { %2713 = vmatpush.bf16.msrb.mxu3 %v6962_v19  ;;  %2806 = vmatpush.bf16.msra.mxu1 %v5420_v43 }
 0xa25   :  { %2714 = vmatpush.bf16.msrb.mxu3 %v6963_v26  ;;  %2807 = vmatpush.bf16.msra.mxu1 %v5456_v21 }
 0xa29   :  { %2715 = vmatpush.bf16.msrb.mxu3 %v5841_v25  ;;  %2808 = vmatpush.bf16.msra.mxu1 %v5498_v9 }
 0xa2d   :  { %2716 = vmatpush.bf16.msrb.mxu3 %v5873_v47  ;;  %2809 = vmatpush.bf16.msra.mxu1 %v5534_v28 }
 0xa30   :  { %2717 = vmatmul.bf16.vlgmr.msrb.gmra.mxu3 %v2601_v45  ;;  %v7083_v45 = vld [vmem:[#allocation14_spill] sm:$0xff] }
 0xa31   :  { %2828 = vmatpush.bf16.msra.mxu3 %v5251_v52  ;;  %2854 = vmatpush.bf16.msrb.mxu1 %v5546_v54 }
 0xa35   :  { %2829 = vmatpush.bf16.msra.mxu3 %v5260_v17  ;;  %2855 = vmatpush.bf16.msrb.mxu1 %v5603_v39 }
 0xa39   :  { %2830 = vmatpush.bf16.msra.mxu3 %v5282_v15  ;;  %2856 = vmatpush.bf16.msrb.mxu1 %v5637_v32 }
 0xa3d   :  { %2831 = vmatpush.bf16.msra.mxu3 %v5318_v23  ;;  %2857 = vmatpush.bf16.msrb.mxu1 %v5681_v22 }
 0xa41   :  { %2832 = vmatpush.bf16.msra.mxu3 %v5354_v10  ;;  %2858 = vmatpush.bf16.msrb.mxu1 %v6932_v53 }
 0xa45   :  { %2833 = vmatpush.bf16.msra.mxu3 %v5390_v44  ;;  %2859 = vmatpush.bf16.msrb.mxu1 %v6934_v46 }
 0xa49   :  { %2834 = vmatpush.bf16.msra.mxu3 %v5426_v51  ;;  %2860 = vmatpush.bf16.msrb.mxu1 %v5821_v37 }
 0xa4d   :  { %2835 = vmatpush.bf16.msra.mxu3 %v5468_v49  ;;  %2861 = vmatpush.bf16.msrb.mxu1 %v5843_v41 }
 0xa51   :  { %2880 = vmatpush.bf16.msrb.mxu3 %v5470_v62 }
 0xa55   :  { %2881 = vmatpush.bf16.msrb.mxu3 %v5507_v6 }
 0xa59   :  { %2882 = vmatpush.bf16.msrb.mxu3 %v5558_v14 }
 0xa5d   :  { %2883 = vmatpush.bf16.msrb.mxu3 %v5610_v50 }
 0xa61   :  { %2884 = vmatpush.bf16.msrb.mxu3 %v6933_v36 }
 0xa65   :  { %2885 = vmatpush.bf16.msrb.mxu3 %v6935_v7 }
 0xa69   :  { %2886 = vmatpush.bf16.msrb.mxu3 %v6995_v16 }
 0xa6d   :  { %2887 = vmatpush.bf16.msrb.mxu3 %v7070_v3 }
 0xa8d   :  { %v2640_v38 = vpop.f32.mrf.mxu1 }
 0xa93   :  { %v2611_v11 = vpop.f32.mrf.mxu3 }
 0xa94   :  { %v2612_v2 = vadd.f32 %v6347_v31, %v2611_v11  ;;  %v7084_v11 = vld [vmem:[#allocation23_spill] sm:$0xff] }
 0xa95   :  { %v2642_v60 = vpop.f32.mrf.mxu1 }
 0xa96   :  { %2616 = vst [vmem:[#allocation3 + $0x18] sm:$0xff] %v2612_v2  ;;  %v2617_v24 = vpack.c.bf16 %v2612_v2, %v2612_v2  ;;  %v7085_v2 = vld [vmem:[#allocation15_spill] sm:$0xff] }
 0xa98   :  { %2626 = vmatmul.bf16.vlgmr.msra.gmra.mxu0 %v2617_v24  ;;  %2652 = vmatmul.bf16.vlgmr.msra.gmra.mxu2 %v2617_v24 }
 0xa99   :  { %2786 = vmatpush.bf16.msra.mxu0 %v7072_v40  ;;  %2815 = vmatpush.bf16.msra.mxu2 %v7073_v27 }
 0xa9b   :  { %v2613_v42 = vpop.f32.mrf.mxu3 }
 0xa9c   :  { %v7086_v42 = vld [vmem:[#allocation27_spill] sm:$0xff] }
 0xa9d   :  { %v6352_v59 = vpop.f32.mrf.mxu1  ;;  %2787 = vmatpush.bf16.msra.mxu0 %v7074_v8  ;;  %2816 = vmatpush.bf16.msra.mxu2 %v7075_v4 }
 0xaa1   :  { %2788 = vmatpush.bf16.msra.mxu0 %v7076_v1  ;;  %2817 = vmatpush.bf16.msra.mxu2 %v7077_v18 }
 0xaa3   :  { %v2666_v20 = vpop.f32.mrf.mxu3 }
 0xaa5   :  { %v2694_v13 = vpop.f32.mrf.mxu1  ;;  %2789 = vmatpush.bf16.msra.mxu0 %v7078_v12  ;;  %2818 = vmatpush.bf16.msra.mxu2 %v7079_v33  ;;  %v7088_v33 = vld [vmem:[#allocation5_spill] sm:$0xff] }
 0xaa6   :  { %v7087_v13 = vld [vmem:[#allocation18_spill] sm:$0xff] }
 0xaa8   :  { %2678 = vmatmul.bf16.vlgmr.msrb.gmra.mxu0 %v2617_v24  ;;  %2704 = vmatmul.bf16.vlgmr.msrb.gmra.mxu2 %v2617_v24  ;;  %v7089_v24 = vld [vmem:[#allocation19_spill] sm:$0xff] }
 0xaa9   :  { %2790 = vmatpush.bf16.msra.mxu0 %v7080_v63  ;;  %2819 = vmatpush.bf16.msra.mxu2 %v7081_v34  ;;  %v7090_v63 = vld [vmem:[#allocation9_spill] sm:$0xff]  ;;  %v7092_v34 = vld [vmem:[#allocation8_spill] sm:$0xff] }
 0xaab   :  { %v2668_v56 = vpop.f32.mrf.mxu3 }
 0xaac   :  { %v7091_v56 = vld [vmem:[#allocation22_spill] sm:$0xff] }
 0xaad   :  { %2791 = vmatpush.bf16.msra.mxu0 %v7082_v48  ;;  %2820 = vmatpush.bf16.msra.mxu2 %v7083_v45  ;;  %v7093_v45 = vld [vmem:[#allocation24_spill] sm:$0xff] }
 0xab1   :  { %2792 = vmatpush.bf16.msra.mxu0 %v7084_v11  ;;  %2821 = vmatpush.bf16.msra.mxu2 %v7085_v2  ;;  %v7094_v11 = vld [vmem:[#allocation12_spill] sm:$0xff]  ;;  %v7095_v2 = vld [vmem:[#allocation29_spill] sm:$0xff] }
 0xab3   :  { %v2718_v60 = vpop.f32.mrf.mxu3 }
 0xab5   :  { %2793 = vmatpush.bf16.msra.mxu0 %v7086_v42  ;;  %2822 = vmatpush.bf16.msra.mxu2 %v7087_v13  ;;  %v7096_v42 = vld [vmem:[#allocation13_spill] sm:$0xff] }
 0xab6   :  { %v7097_v13 = vld [vmem:[#allocation33_spill] sm:$0xff] }
 0xab9   :  { %2841 = vmatpush.bf16.msrb.mxu0 %v7088_v33  ;;  %2867 = vmatpush.bf16.msrb.mxu2 %v7089_v24  ;;  %v7098_v33 = vld [vmem:[#allocation17_spill] sm:$0xff]  ;;  %v7099_v24 = vld [vmem:[#allocation36_spill] sm:$0xff] }
 0xabb   :  { %v2720_v48 = vpop.f32.mrf.mxu3 }
 0xabc   :  { %v7102_v48 = vld [vmem:[#allocation20_spill] sm:$0xff] }
 0xabd   :  { %2842 = vmatpush.bf16.msrb.mxu0 %v7090_v63  ;;  %2868 = vmatpush.bf16.msrb.mxu2 %v7091_v56  ;;  %v7100_v63 = vld [vmem:[#allocation16_spill] sm:$0xff]  ;;  %v7101_v56 = vld [vmem:[#allocation38_spill] sm:$0xff] }
 0xac1   :  { %2843 = vmatpush.bf16.msrb.mxu0 %v7092_v34  ;;  %2869 = vmatpush.bf16.msrb.mxu2 %v7093_v45  ;;  %v7103_v34 = vld [vmem:[#allocation39_spill] sm:$0xff] }
 0xac5   :  { %2844 = vmatpush.bf16.msrb.mxu0 %v7094_v11  ;;  %2870 = vmatpush.bf16.msrb.mxu2 %v7095_v2  ;;  %v7104_v11 = vld [vmem:[#allocation43_spill] sm:$0xff] }
 0xac9   :  { %2845 = vmatpush.bf16.msrb.mxu0 %v7096_v42  ;;  %2871 = vmatpush.bf16.msrb.mxu2 %v7097_v13  ;;  %v7105_v13 = vld [vmem:[#allocation45_spill] sm:$0xff] }
 0xacd   :  { %2846 = vmatpush.bf16.msrb.mxu0 %v7098_v33  ;;  %2872 = vmatpush.bf16.msrb.mxu2 %v7099_v24 }
 0xad1   :  { %2847 = vmatpush.bf16.msrb.mxu0 %v7100_v63  ;;  %2873 = vmatpush.bf16.msrb.mxu2 %v7101_v56 }
 0xad5   :  { %2848 = vmatpush.bf16.msrb.mxu0 %v7102_v48  ;;  %2874 = vmatpush.bf16.msrb.mxu2 %v7103_v34 }
 0xb15   :  { %v2627_v45 = vpop.f32.mrf.mxu0 }
 0xb16   :  { %v2628_v12 = vadd.f32 %v2627_v45, %v7104_v11 }
 0xb18   :  { %v2641_v2 = vadd.f32 %v2640_v38, %v2628_v12  ;;  %v7106_v12 = vld [vmem:[#allocation46_spill] sm:$0xff] }
 0xb1a   :  { %v4095_v18 = vmul.f32 -1.442695, %v2641_v2 }
 0xb1b   :  { %v2653_v42 = vpop.f32.mrf.mxu2 }
 0xb1c   :  { %4413 = vpow2.f32 %v4095_v18  ;;  %v2654_v1 = vadd.f32 %v2653_v42, %v7105_v13 }
 0xb1d   :  { %v2629_v33 = vpop.f32.mrf.mxu0 }
 0xb1e   :  { %v2667_v4 = vadd.f32 %v2666_v20, %v2654_v1  ;;  %v7107_v33 = vld [vmem:[#allocation47_spill] sm:$0xff] }
 0xb20   :  { %v4096_v24 = vmul.f32 -1.442695, %v2667_v4 }
 0xb22   :  { %v4414_v8 = vpop.eup %4413  ;;  %4415 = vpow2.f32 %v4096_v24 }
 0xb23   :  { %v2725_v63 = vadd.f32 1.0, %v4414_v8  ;;  %v2655_v56 = vpop.f32.mrf.mxu2 }
 0xb25   :  { %4417 = vrcp.f32 %v2725_v63  ;;  %v2679_v48 = vpop.f32.mrf.mxu0  ;;  %vm2731_vm4 = vweird.f32 %v2725_v63 }
 0xb26   :  { %v2680_v1 = vadd.f32 %v2679_v48, %v7107_v33 }
 0xb28   :  { %v4416_v27 = vpop.eup %4415 }
 0xb29   :  { %v2744_v34 = vadd.f32 1.0, %v4416_v27  ;;  %v2693_v27 = vadd.f32 %v6352_v59, %v2680_v1 }
 0xb2b   :  { %v4418_v40 = vpop.eup %4417  ;;  %4419 = vrcp.f32 %v2744_v34  ;;  %v2705_v45 = vpop.f32.mrf.mxu2  ;;  %v2756_v31 = vand.u32 2147483648, %v2744_v34  ;;  %vm2750_vm5 = vweird.f32 %v2744_v34 }
 0xb2c   :  { %v2727_v38 = vmul.f32 %v4418_v40, %v2725_v63  ;;  %v2706_v2 = vadd.f32 %v2705_v45, %v7106_v12  ;;  %vm2732_vm2 = vweird.f32 %v4418_v40  ;;  %v2737_v45 = vand.u32 2147483648, %v2725_v63 }
 0xb2d   :  { %v2681_v18 = vpop.f32.mrf.mxu0  ;;  %vm2733_vm6 = vmor %vm2731_vm4, %vm2732_vm2 }
 0xb2e   :  { %v2728_v11 = vsub.f32 1.0, %v2727_v38  ;;  %v2719_v42 = vadd.f32 %v2718_v60, %v2706_v2  ;;  %v2754_v18 = vand.u32 2147483647, %v2744_v34  ;;  %v2735_v60 = vand.u32 2147483647, %v2725_v63 }
 0xb30   :  { %v4097_v4 = vmul.f32 -1.442695, %v2719_v42  ;;  %v2729_v24 = vmul.f32 %v4418_v40, %v2728_v11  ;;  %v2757_v11 = vor.u32 1.1754944e-38, %v2756_v31  ;;  %vm2755_vm8 = vcmp.eq.f32.partialorder %v2754_v18, 8.507059e+37 }
 0xb31   :  { %v4420_v20 = vpop.eup %4419  ;;  %vm2736_vm9 = vcmp.eq.f32.partialorder %v2735_v60, 8.507059e+37 }
 0xb32   :  { %v2746_v8 = vmul.f32 %v4420_v20, %v2744_v34  ;;  %4421 = vpow2.f32 %v4097_v4  ;;  %v2730_v3 = vadd.f32 %v4418_v40, %v2729_v24  ;;  %vm2751_vm3 = vweird.f32 %v4420_v20 }
 0xb33   :  { %v2707_v56 = vpop.f32.mrf.mxu2  ;;  %4423 = vtanh.f32 %v2693_v27  ;;  %vm2752_vm7 = vmor %vm2750_vm5, %vm2751_vm3  ;;  %v2738_v4 = vor.u32 1.1754944e-38, %v2737_v45 }
 0xb34   :  { %v2747_v13 = vsub.f32 1.0, %v2746_v8  ;;  %v2734_v2 = vsel %vm2733_vm6, %v4418_v40, %v2730_v3 }
 0xb36   :  { %v2748_v16 = vmul.f32 %v4420_v20, %v2747_v13  ;;  %v2739_v13 = vsel %vm2736_vm9, %v2738_v4, %v2734_v2  ;;  %v7109_v2 = vld [vmem:[#allocation35_spill] sm:$0xff]  ;;  %v7110_v4 = vld [vmem:[#allocation28_spill] sm:$0xff] }
 0xb38   :  { %v4422_v38 = vpop.eup %4421  ;;  %v2749_v48 = vadd.f32 %v4420_v20, %v2748_v16 }
 0xb39   :  { %v2764_v42 = vadd.f32 1.0, %v4422_v38  ;;  %v4424_v8 = vpop.eup %4423 }
 0xb3a   :  { %v2753_v59 = vsel %vm2752_vm7, %v4420_v20, %v2749_v48  ;;  %v2781_v63 = vmul.f32 %v4424_v8, %v2739_v13  ;;  %v7112_v8 = vld [vmem:[#allocation4_spill] sm:$0xff] }
 0xb3b   :  { %v2758_v1 = vsel %vm2755_vm8, %v2757_v11, %v2753_v59  ;;  %4425 = vrcp.f32 %v2764_v42  ;;  %v2776_v3 = vand.u32 2147483648, %v2764_v42  ;;  %v2774_v40 = vand.u32 2147483647, %v2764_v42  ;;  %v7108_v11 = vld [vmem:[#allocation32_spill] sm:$0xff] }
 0xb3c   :  { %v2780_v24 = vmul.f32 %v2758_v1, %v6301_v58  ;;  %vm2770_vm11 = vweird.f32 %v2764_v42 }
 0xb3d   :  { %v2777_v45 = vor.u32 1.1754944e-38, %v2776_v3  ;;  %vm2775_vm13 = vcmp.eq.f32.partialorder %v2774_v40, 8.507059e+37  ;;  %v7115_v3 = vld [vmem:[#allocation30_spill] sm:$0xff] }
 0xb3e   :  { %v6390_v34 = vadd.f32 %v2781_v63, %v2780_v24  ;;  %v7111_v24 = vld [vmem:[#allocation25_spill] sm:$0xff] }
 0xb40   :  { %4427 = vtanh.f32 %v6390_v34 }
 0xb41   :  { %v4426_v56 = vpop.eup %4425 }
 0xb42   :  { %v2766_v16 = vmul.f32 %v4426_v56, %v2764_v42  ;;  %vm2771_vm10 = vweird.f32 %v4426_v56 }
 0xb43   :  { %vm2772_vm12 = vmor %vm2770_vm11, %vm2771_vm10 }
 0xb44   :  { %v2767_v27 = vsub.f32 1.0, %v2766_v16  ;;  %v7114_v16 = vld [vmem:[#allocation6_spill] sm:$0xff] }
 0xb46   :  { %v2768_v31 = vmul.f32 %v4426_v56, %v2767_v27  ;;  %v4428_v58 = vpop.eup %4427 }
 0xb48   :  { %v2769_v20 = vadd.f32 %v4426_v56, %v2768_v31  ;;  %v7116_v31 = vld [vmem:[#allocation7_spill] sm:$0xff] }
 0xb4a   :  { %v2773_v18 = vsel %vm2772_vm12, %v4426_v56, %v2769_v20  ;;  %v7113_v56 = vld [vmem:[#allocation26_spill] sm:$0xff] }
 0xb4b   :  { %v2778_v60 = vsel %vm2775_vm13, %v2777_v45, %v2773_v18  ;;  %v7117_v20 = vld [vmem:[#allocation34_spill] sm:$0xff] }
 0xb4c   :  { %v2784_v38 = vmul.f32 %v4428_v58, %v2778_v60  ;;  %v7118_v45 = vld [vmem:[#allocation10_spill] sm:$0xff]  ;;  %v7119_v58 = vld [vmem:[#allocation37_spill] sm:$0xff]  ;;  %v7120_v60 = vld [vmem:[#allocation11_spill] sm:$0xff] }
 0xb4e   :  { %v2785_v48 = vpack.c.bf16 %v2784_v38, %v2784_v38 }
 0xb50   :  { %2794 = vmatmul.bf16.vlgmr.msra.gmra.mxu0 %v2785_v48  ;;  %2823 = vmatmul.bf16.vlgmr.msra.gmra.mxu2 %v2785_v48 }
 0xb51   :  { %2893 = vmatpush.bf16.msra.mxu0 %v6958_v35  ;;  %2986 = vmatpush.bf16.msra.mxu2 %v5277_v5 }
 0xb55   :  { %2894 = vmatpush.bf16.msra.mxu0 %v6959_v0  ;;  %2987 = vmatpush.bf16.msra.mxu2 %v5312_v61 }
 0xb59   :  { %2895 = vmatpush.bf16.msra.mxu0 %v6960_v55  ;;  %2988 = vmatpush.bf16.msra.mxu2 %v5348_v29 }
 0xb5d   :  { %2896 = vmatpush.bf16.msra.mxu0 %v6961_v30  ;;  %2989 = vmatpush.bf16.msra.mxu2 %v5384_v57 }
 0xb60   :  { %2849 = vmatmul.bf16.vlgmr.msrb.gmra.mxu0 %v2785_v48  ;;  %2875 = vmatmul.bf16.vlgmr.msrb.gmra.mxu2 %v2785_v48 }
 0xb61   :  { %2897 = vmatpush.bf16.msra.mxu0 %v6962_v19  ;;  %2990 = vmatpush.bf16.msra.mxu2 %v5420_v43 }
 0xb65   :  { %2898 = vmatpush.bf16.msra.mxu0 %v6963_v26  ;;  %2991 = vmatpush.bf16.msra.mxu2 %v5456_v21 }
 0xb69   :  { %2899 = vmatpush.bf16.msra.mxu0 %v5841_v25  ;;  %2992 = vmatpush.bf16.msra.mxu2 %v5498_v9 }
 0xb6d   :  { %2900 = vmatpush.bf16.msra.mxu0 %v5873_v47  ;;  %2993 = vmatpush.bf16.msra.mxu2 %v5534_v28 }
 0xb70   :  { %2901 = vmatmul.bf16.vlgmr.msra.gmra.mxu0 %v2785_v48  ;;  %v7121_v48 = vld [vmem:[#allocation31_spill] sm:$0xff] }
 0xb71   :  { %3012 = vmatpush.bf16.msrb.mxu0 %v5251_v52  ;;  %3038 = vmatpush.bf16.msrb.mxu2 %v5546_v54 }
 0xb75   :  { %3013 = vmatpush.bf16.msrb.mxu0 %v5260_v17  ;;  %3039 = vmatpush.bf16.msrb.mxu2 %v5603_v39 }
 0xb79   :  { %3014 = vmatpush.bf16.msrb.mxu0 %v5282_v15  ;;  %3040 = vmatpush.bf16.msrb.mxu2 %v5637_v32 }
 0xb7d   :  { %3015 = vmatpush.bf16.msrb.mxu0 %v5318_v23  ;;  %3041 = vmatpush.bf16.msrb.mxu2 %v5681_v22 }
 0xb81   :  { %3016 = vmatpush.bf16.msrb.mxu0 %v5354_v10  ;;  %3042 = vmatpush.bf16.msrb.mxu2 %v6932_v53 }
 0xb85   :  { %3017 = vmatpush.bf16.msrb.mxu0 %v5390_v44  ;;  %3043 = vmatpush.bf16.msrb.mxu2 %v6934_v46 }
 0xb89   :  { %3018 = vmatpush.bf16.msrb.mxu0 %v5426_v51  ;;  %3044 = vmatpush.bf16.msrb.mxu2 %v5821_v37 }
 0xb8d   :  { %3019 = vmatpush.bf16.msrb.mxu0 %v5468_v49  ;;  %3045 = vmatpush.bf16.msrb.mxu2 %v5843_v41 }
 0xb91   :  { %3064 = vmatpush.bf16.msra.mxu0 %v5470_v62 }
 0xb95   :  { %3065 = vmatpush.bf16.msra.mxu0 %v5507_v6 }
 0xb99   :  { %3066 = vmatpush.bf16.msra.mxu0 %v5558_v14 }
 0xb9d   :  { %3067 = vmatpush.bf16.msra.mxu0 %v5610_v50 }
 0xba1   :  { %3068 = vmatpush.bf16.msra.mxu0 %v6933_v36 }
 0xba5   :  { %3069 = vmatpush.bf16.msra.mxu0 %v6935_v7 }
 0xba9   :  { %3070 = vmatpush.bf16.msra.mxu0 %v7108_v11 }
 0xbad   :  { %3071 = vmatpush.bf16.msra.mxu0 %v7109_v2 }
 0xbcd   :  { %v2795_v42 = vpop.f32.mrf.mxu0 }
 0xbce   :  { %v2796_v59 = vadd.f32 %v7110_v4, %v2795_v42  ;;  %v7122_v42 = vld [vmem:[#allocation14_spill] sm:$0xff] }
 0xbd0   :  { %2800 = vst [vmem:[#allocation3 + $0x20] sm:$0xff] %v2796_v59  ;;  %v2801_v1 = vpack.c.bf16 %v2796_v59, %v2796_v59 }
 0xbd2   :  { %2810 = vmatmul.bf16.vlgmr.msra.gmra.mxu1 %v2801_v1  ;;  %2836 = vmatmul.bf16.vlgmr.msra.gmra.mxu3 %v2801_v1 }
 0xbd3   :  { %v2824_v13 = vpop.f32.mrf.mxu2  ;;  %2970 = vmatpush.bf16.msra.mxu1 %v7111_v24  ;;  %2999 = vmatpush.bf16.msra.mxu3 %v7112_v8  ;;  %v7123_v24 = vld [vmem:[#allocation23_spill] sm:$0xff] }
 0xbd5   :  { %v2797_v63 = vpop.f32.mrf.mxu0 }
 0xbd6   :  { %v7124_v63 = vld [vmem:[#allocation15_spill] sm:$0xff] }
 0xbd7   :  { %2971 = vmatpush.bf16.msra.mxu1 %v7113_v56  ;;  %3000 = vmatpush.bf16.msra.mxu3 %v7114_v16 }
 0xbdb   :  { %v2826_v27 = vpop.f32.mrf.mxu2  ;;  %2972 = vmatpush.bf16.msra.mxu1 %v7115_v3  ;;  %3001 = vmatpush.bf16.msra.mxu3 %v7116_v31  ;;  %v7127_v3 = vld [vmem:[#allocation5_spill] sm:$0xff] }
 0xbdc   :  { %v7125_v27 = vld [vmem:[#allocation27_spill] sm:$0xff] }
 0xbdd   :  { %v2850_v40 = vpop.f32.mrf.mxu0 }
 0xbdf   :  { %2973 = vmatpush.bf16.msra.mxu1 %v7117_v20  ;;  %3002 = vmatpush.bf16.msra.mxu3 %v7118_v45  ;;  %v7128_v20 = vld [vmem:[#allocation19_spill] sm:$0xff] }
 0xbe2   :  { %2862 = vmatmul.bf16.vlgmr.msrb.gmra.mxu1 %v2801_v1  ;;  %2888 = vmatmul.bf16.vlgmr.msrb.gmra.mxu3 %v2801_v1  ;;  %v7126_v1 = vld [vmem:[#allocation18_spill] sm:$0xff] }
 0xbe3   :  { %v6442_v18 = vpop.f32.mrf.mxu2  ;;  %2974 = vmatpush.bf16.msra.mxu1 %v7119_v58  ;;  %3003 = vmatpush.bf16.msra.mxu3 %v7120_v60  ;;  %v7129_v58 = vld [vmem:[#allocation9_spill] sm:$0xff] }
 0xbe5   :  { %v2852_v38 = vpop.f32.mrf.mxu0 }
 0xbe6   :  { %v7130_v38 = vld [vmem:[#allocation22_spill] sm:$0xff] }
 0xbe7   :  { %2975 = vmatpush.bf16.msra.mxu1 %v7121_v48  ;;  %3004 = vmatpush.bf16.msra.mxu3 %v7122_v42  ;;  %v7131_v42 = vld [vmem:[#allocation8_spill] sm:$0xff] }
 0xbeb   :  { %v2878_v59 = vpop.f32.mrf.mxu2  ;;  %2976 = vmatpush.bf16.msra.mxu1 %v7123_v24  ;;  %3005 = vmatpush.bf16.msra.mxu3 %v7124_v63  ;;  %v7133_v24 = vld [vmem:[#allocation12_spill] sm:$0xff]  ;;  %v7134_v63 = vld [vmem:[#allocation29_spill] sm:$0xff] }
 0xbec   :  { %v7132_v59 = vld [vmem:[#allocation24_spill] sm:$0xff] }
 0xbed   :  { %v2902_v56 = vpop.f32.mrf.mxu0 }
 0xbef   :  { %2977 = vmatpush.bf16.msra.mxu1 %v7125_v27  ;;  %3006 = vmatpush.bf16.msra.mxu3 %v7126_v1  ;;  %v7135_v27 = vld [vmem:[#allocation13_spill] sm:$0xff] }
 0xbf0   :  { %v7136_v1 = vld [vmem:[#allocation33_spill] sm:$0xff] }
 0xbf3   :  { %3025 = vmatpush.bf16.msrb.mxu1 %v7127_v3  ;;  %3051 = vmatpush.bf16.msrb.mxu3 %v7128_v20  ;;  %v7137_v3 = vld [vmem:[#allocation17_spill] sm:$0xff]  ;;  %v7138_v20 = vld [vmem:[#allocation36_spill] sm:$0xff] }
 0xbf5   :  { %v2904_v48 = vpop.f32.mrf.mxu0 }
 0xbf6   :  { %v7141_v48 = vld [vmem:[#allocation20_spill] sm:$0xff] }
 0xbf7   :  { %3026 = vmatpush.bf16.msrb.mxu1 %v7129_v58  ;;  %3052 = vmatpush.bf16.msrb.mxu3 %v7130_v38  ;;  %v7139_v58 = vld [vmem:[#allocation16_spill] sm:$0xff]  ;;  %v7140_v38 = vld [vmem:[#allocation38_spill] sm:$0xff] }
 0xbfb   :  { %3027 = vmatpush.bf16.msrb.mxu1 %v7131_v42  ;;  %3053 = vmatpush.bf16.msrb.mxu3 %v7132_v59  ;;  %v7142_v42 = vld [vmem:[#allocation39_spill] sm:$0xff] }
 0xbff   :  { %3028 = vmatpush.bf16.msrb.mxu1 %v7133_v24  ;;  %3054 = vmatpush.bf16.msrb.mxu3 %v7134_v63  ;;  %v7143_v24 = vld [vmem:[#allocation43_spill] sm:$0xff] }
 0xc03   :  { %3029 = vmatpush.bf16.msrb.mxu1 %v7135_v27  ;;  %3055 = vmatpush.bf16.msrb.mxu3 %v7136_v1  ;;  %v7144_v1 = vld [vmem:[#allocation45_spill] sm:$0xff] }
 0xc07   :  { %3030 = vmatpush.bf16.msrb.mxu1 %v7137_v3  ;;  %3056 = vmatpush.bf16.msrb.mxu3 %v7138_v20 }
 0xc0b   :  { %3031 = vmatpush.bf16.msrb.mxu1 %v7139_v58  ;;  %3057 = vmatpush.bf16.msrb.mxu3 %v7140_v38 }
 0xc0f   :  { %3032 = vmatpush.bf16.msrb.mxu1 %v7141_v48  ;;  %3058 = vmatpush.bf16.msrb.mxu3 %v7142_v42 }
 0xc4f   :  { %v2811_v59 = vpop.f32.mrf.mxu1 }
 0xc50   :  { %v2812_v60 = vadd.f32 %v2811_v59, %v7143_v24 }
 0xc52   :  { %v2825_v63 = vadd.f32 %v2824_v13, %v2812_v60 }
 0xc54   :  { %v4098_v45 = vmul.f32 -1.442695, %v2825_v63 }
 0xc55   :  { %v2837_v27 = vpop.f32.mrf.mxu3 }
 0xc56   :  { %4429 = vpow2.f32 %v4098_v45  ;;  %v2838_v31 = vadd.f32 %v2837_v27, %v7144_v1 }
 0xc57   :  { %v2813_v3 = vpop.f32.mrf.mxu1 }
 0xc58   :  { %v2851_v16 = vadd.f32 %v2850_v40, %v2838_v31 }
 0xc5a   :  { %v4099_v20 = vmul.f32 -1.442695, %v2851_v16 }
 0xc5c   :  { %v4430_v8 = vpop.eup %4429  ;;  %4431 = vpow2.f32 %v4099_v20 }
 0xc5d   :  { %v2909_v58 = vadd.f32 1.0, %v4430_v8  ;;  %v2839_v38 = vpop.f32.mrf.mxu3 }
 0xc5f   :  { %4433 = vrcp.f32 %v2909_v58  ;;  %v2863_v48 = vpop.f32.mrf.mxu1  ;;  %vm2915_vm0 = vweird.f32 %v2909_v58 }
 0xc60   :  { %v2864_v31 = vadd.f32 %v2863_v48, %v7107_v33 }
 0xc62   :  { %v4432_v4 = vpop.eup %4431 }
 0xc63   :  { %v2928_v42 = vadd.f32 1.0, %v4432_v4  ;;  %v2877_v4 = vadd.f32 %v6442_v18, %v2864_v31 }
 0xc65   :  { %v4434_v2 = vpop.eup %4433  ;;  %4435 = vrcp.f32 %v2928_v42  ;;  %v2889_v59 = vpop.f32.mrf.mxu3  ;;  %v2940_v24 = vand.u32 2147483648, %v2928_v42  ;;  %vm2934_vm1 = vweird.f32 %v2928_v42 }
 0xc66   :  { %v2911_v13 = vmul.f32 %v4434_v2, %v2909_v58  ;;  %v2890_v60 = vadd.f32 %v2889_v59, %v7106_v12  ;;  %vm2916_vm14 = vweird.f32 %v4434_v2  ;;  %v2921_v59 = vand.u32 2147483648, %v2909_v58 }
 0xc67   :  { %v2865_v45 = vpop.f32.mrf.mxu1  ;;  %vm2917_vm2 = vmor %vm2915_vm0, %vm2916_vm14 }
 0xc68   :  { %v2912_v63 = vsub.f32 1.0, %v2911_v13  ;;  %v2903_v27 = vadd.f32 %v2902_v56, %v2890_v60  ;;  %v2938_v45 = vand.u32 2147483647, %v2928_v42  ;;  %v2919_v56 = vand.u32 2147483647, %v2909_v58 }
 0xc69   :  { %v2941_v60 = vor.u32 1.1754944e-38, %v2940_v24 }
 0xc6a   :  { %v4100_v16 = vmul.f32 -1.442695, %v2903_v27  ;;  %v2913_v3 = vmul.f32 %v4434_v2, %v2912_v63  ;;  %vm2939_vm4 = vcmp.eq.f32.partialorder %v2938_v45, 8.507059e+37  ;;  %vm2920_vm5 = vcmp.eq.f32.partialorder %v2919_v56, 8.507059e+37 }
 0xc6b   :  { %v4436_v40 = vpop.eup %4435 }
 0xc6c   :  { %v2930_v8 = vmul.f32 %v4436_v40, %v2928_v42  ;;  %4437 = vpow2.f32 %v4100_v16  ;;  %v2914_v1 = vadd.f32 %v4434_v2, %v2913_v3  ;;  %vm2935_vm15 = vweird.f32 %v4436_v40 }
 0xc6d   :  { %v2891_v20 = vpop.f32.mrf.mxu3  ;;  %4439 = vtanh.f32 %v2877_v4  ;;  %vm2936_vm3 = vmor %vm2934_vm1, %vm2935_vm15  ;;  %v2922_v16 = vor.u32 1.1754944e-38, %v2921_v59 }
 0xc6e   :  { %v2931_v38 = vsub.f32 1.0, %v2930_v8  ;;  %v2918_v63 = vsel %vm2917_vm2, %v4434_v2, %v2914_v1 }
 0xc6f   :  { %v2923_v3 = vsel %vm2920_vm5, %v2922_v16, %v2918_v63  ;;  %v7157_v63 = vld [vmem:[#allocation19_spill] sm:$0xff]  ;;  %v7159_v16 = vld [vmem:[#allocation22_spill] sm:$0xff] }
 0xc70   :  { %v2932_v11 = vmul.f32 %v4436_v40, %v2931_v38 }
 0xc72   :  { %v4438_v13 = vpop.eup %4437  ;;  %v2933_v48 = vadd.f32 %v4436_v40, %v2932_v11 }
 0xc73   :  { %v2948_v27 = vadd.f32 1.0, %v4438_v13  ;;  %v4440_v20 = vpop.eup %4439 }
 0xc74   :  { %v2937_v18 = vsel %vm2936_vm3, %v4436_v40, %v2933_v48  ;;  %v2965_v58 = vmul.f32 %v4440_v20, %v2923_v3  ;;  %v7161_v3 = vld [vmem:[#allocation24_spill] sm:$0xff]  ;;  %v7163_v20 = vld [vmem:[#allocation29_spill] sm:$0xff] }
 0xc75   :  { %v2942_v31 = vsel %vm2939_vm4, %v2941_v60, %v2937_v18  ;;  %4441 = vrcp.f32 %v2948_v27  ;;  %v2960_v2 = vand.u32 2147483648, %v2948_v27  ;;  %v2958_v24 = vand.u32 2147483647, %v2948_v27  ;;  %v7156_v60 = vld [vmem:[#allocation5_spill] sm:$0xff] }
 0xc76   :  { %v2964_v8 = vmul.f32 %v2942_v31, %v6390_v34  ;;  %vm2954_vm7 = vweird.f32 %v2948_v27  ;;  %v7160_v31 = vld [vmem:[#allocation8_spill] sm:$0xff] }
 0xc77   :  { %v2961_v59 = vor.u32 1.1754944e-38, %v2960_v2  ;;  %vm2959_vm9 = vcmp.eq.f32.partialorder %v2958_v24, 8.507059e+37  ;;  %v7168_v2 = vld [vmem:[#allocation16_spill] sm:$0xff] }
 0xc78   :  { %v6474_v42 = vadd.f32 %v2965_v58, %v2964_v8  ;;  %v7162_v8 = vld [vmem:[#allocation12_spill] sm:$0xff]  ;;  %v7164_v58 = vld [vmem:[#allocation13_spill] sm:$0xff] }
 0xc79   :  { %v7170_v24 = vld [vmem:[#allocation20_spill] sm:$0xff] }
 0xc7a   :  { %4443 = vtanh.f32 %v6474_v42 }
 0xc7b   :  { %v4442_v38 = vpop.eup %4441 }
 0xc7c   :  { %v2950_v11 = vmul.f32 %v4442_v38, %v2948_v27  ;;  %vm2955_vm6 = vweird.f32 %v4442_v38  ;;  %v7158_v27 = vld [vmem:[#allocation9_spill] sm:$0xff] }
 0xc7d   :  { %vm2956_vm8 = vmor %vm2954_vm7, %vm2955_vm6 }
 0xc7e   :  { %v2951_v4 = vsub.f32 1.0, %v2950_v11  ;;  %v7166_v11 = vld [vmem:[#allocation17_spill] sm:$0xff] }
 0xc80   :  { %v2952_v1 = vmul.f32 %v4442_v38, %v2951_v4  ;;  %v4444_v34 = vpop.eup %4443  ;;  %v7167_v4 = vld [vmem:[#allocation36_spill] sm:$0xff] }
 0xc82   :  { %v2953_v40 = vadd.f32 %v4442_v38, %v2952_v1  ;;  %v7169_v1 = vld [vmem:[#allocation38_spill] sm:$0xff] }
 0xc84   :  { %v2957_v45 = vsel %vm2956_vm8, %v4442_v38, %v2953_v40  ;;  %v7165_v38 = vld [vmem:[#allocation33_spill] sm:$0xff]  ;;  %v7171_v40 = vld [vmem:[#allocation39_spill] sm:$0xff] }
 0xc85   :  { %v2962_v56 = vsel %vm2959_vm9, %v2961_v59, %v2957_v45  ;;  %v7172_v45 = vld [vmem:[#allocation45_spill] sm:$0xff] }
 0xc86   :  { %v2968_v13 = vmul.f32 %v4444_v34, %v2962_v56 }
 0xc88   :  { %v2969_v48 = vpack.c.bf16 %v2968_v13, %v2968_v13 }
 0xc8a   :  { %2978 = vmatmul.bf16.vlgmr.msra.gmra.mxu1 %v2969_v48  ;;  %3007 = vmatmul.bf16.vlgmr.msra.gmra.mxu3 %v2969_v48 }
 0xc8b   :  { %3077 = vmatpush.bf16.msra.mxu1 %v6958_v35  ;;  %3170 = vmatpush.bf16.msra.mxu3 %v5277_v5 }
 0xc8f   :  { %3078 = vmatpush.bf16.msra.mxu1 %v6959_v0  ;;  %3171 = vmatpush.bf16.msra.mxu3 %v5312_v61 }
 0xc93   :  { %3079 = vmatpush.bf16.msra.mxu1 %v6960_v55  ;;  %3172 = vmatpush.bf16.msra.mxu3 %v5348_v29 }
 0xc97   :  { %3080 = vmatpush.bf16.msra.mxu1 %v6961_v30  ;;  %3173 = vmatpush.bf16.msra.mxu3 %v5384_v57  ;;  %v7148_v57 = vld [vmem:[#allocation4_spill] sm:$0xff] }
 0xc9a   :  { %3033 = vmatmul.bf16.vlgmr.msrb.gmra.mxu1 %v2969_v48  ;;  %3059 = vmatmul.bf16.vlgmr.msrb.gmra.mxu3 %v2969_v48 }
 0xc9b   :  { %3081 = vmatpush.bf16.msra.mxu1 %v6962_v19  ;;  %3174 = vmatpush.bf16.msra.mxu3 %v5420_v43  ;;  %v6528_v43 = vld [vmem:[%s6720_s6 + $0x30] sm:$0xff] }
 0xc9f   :  { %3082 = vmatpush.bf16.msra.mxu1 %v6963_v26  ;;  %3175 = vmatpush.bf16.msra.mxu3 %v5456_v21 }
 0xca3   :  { %3083 = vmatpush.bf16.msra.mxu1 %v5841_v25  ;;  %3176 = vmatpush.bf16.msra.mxu3 %v5498_v9 }
 0xca7   :  { %3084 = vmatpush.bf16.msra.mxu1 %v5873_v47  ;;  %3177 = vmatpush.bf16.msra.mxu3 %v5534_v28  ;;  %v7151_v28 = vld [vmem:[#allocation10_spill] sm:$0xff] }
 0xcaa   :  { %3085 = vmatmul.bf16.vlgmr.msra.gmra.mxu1 %v2969_v48 }
 0xcab   :  { %3196 = vmatpush.bf16.msrb.mxu1 %v5251_v52  ;;  %3222 = vmatpush.bf16.msrb.mxu3 %v5546_v54  ;;  %v7145_v52 = vld [vmem:[#allocation32_spill] sm:$0xff] }
 0xcaf   :  { %3197 = vmatpush.bf16.msrb.mxu1 %v5260_v17  ;;  %3223 = vmatpush.bf16.msrb.mxu3 %v5603_v39  ;;  %v7146_v17 = vld [vmem:[#allocation35_spill] sm:$0xff] }
 0xcb0   :  { %v7152_v39 = vld [vmem:[#allocation11_spill] sm:$0xff] }
 0xcb3   :  { %3198 = vmatpush.bf16.msrb.mxu1 %v5282_v15  ;;  %3224 = vmatpush.bf16.msrb.mxu3 %v5637_v32  ;;  %v7147_v15 = vld [vmem:[#allocation28_spill] sm:$0xff]  ;;  %v6558_v32 = vld [vmem:[%s6720_s6 + $0x10] sm:$0xff] }
 0xcb7   :  { %3199 = vmatpush.bf16.msrb.mxu1 %v5318_v23  ;;  %3225 = vmatpush.bf16.msrb.mxu3 %v5681_v22  ;;  %v7153_v22 = vld [vmem:[#allocation14_spill] sm:$0xff] }
 0xcbb   :  { %3200 = vmatpush.bf16.msrb.mxu1 %v5354_v10  ;;  %3226 = vmatpush.bf16.msrb.mxu3 %v6932_v53  ;;  %v6521_v10 = vld [vmem:[%s6720_s6 + $0x38] sm:$0xff]  ;;  %v7154_v53 = vld [vmem:[#allocation15_spill] sm:$0xff] }
 0xcbf   :  { %3201 = vmatpush.bf16.msrb.mxu1 %v5390_v44  ;;  %3227 = vmatpush.bf16.msrb.mxu3 %v6934_v46  ;;  %v6572_v46 = vld [vmem:[%s6720_s6] sm:$0xff] }
 0xcc3   :  { %3202 = vmatpush.bf16.msrb.mxu1 %v5426_v51  ;;  %3228 = vmatpush.bf16.msrb.mxu3 %v5821_v37  ;;  %v7149_v51 = vld [vmem:[#allocation6_spill] sm:$0xff] }
 0xcc7   :  { %3203 = vmatpush.bf16.msrb.mxu1 %v5468_v49  ;;  %3229 = vmatpush.bf16.msrb.mxu3 %v5843_v41  ;;  %v6535_v49 = vld [vmem:[%s6720_s6 + $0x28] sm:$0xff] }
 0xcc8   :  { %v6565_v41 = vld [vmem:[%s6720_s6 + $0x8] sm:$0xff] }
 0xccb   :  { %3248 = vmatpush.bf16.msra.mxu1 %v5470_v62  ;;  %v7150_v62 = vld [vmem:[#allocation7_spill] sm:$0xff] }
 0xccf   :  { %3249 = vmatpush.bf16.msra.mxu1 %v5507_v6  ;;  %v6542_v6 = vld [vmem:[%s6720_s6 + $0x20] sm:$0xff] }
 0xcd3   :  { %3250 = vmatpush.bf16.msra.mxu1 %v5558_v14  ;;  %v6551_v14 = vld [vmem:[%s6720_s6 + $0x18] sm:$0xff] }
 0xcd7   :  { %3251 = vmatpush.bf16.msra.mxu1 %v5610_v50 }
 0xcdb   :  { %3252 = vmatpush.bf16.msra.mxu1 %v6933_v36 }
 0xcdf   :  { %3253 = vmatpush.bf16.msra.mxu1 %v6935_v7  ;;  %v7155_v7 = vld [vmem:[#allocation18_spill] sm:$0xff] }
 0xce3   :  { %3254 = vmatpush.bf16.msra.mxu1 %v7145_v52  ;;  %v7173_v52 = vld [vmem:[#allocation43_spill] sm:$0xff] }
 0xce7   :  { %3255 = vmatpush.bf16.msra.mxu1 %v7146_v17 }
 0xd07   :  { %v2979_v5 = vpop.f32.mrf.mxu1 }
 0xd08   :  { %v2980_v61 = vadd.f32 %v7147_v15, %v2979_v5 }
 0xd0a   :  { %2984 = vst [vmem:[#allocation3 + $0x28] sm:$0xff] %v2980_v61  ;;  %v2985_v23 = vpack.c.bf16 %v2980_v61, %v2980_v61 }
 0xd0c   :  { %2994 = vmatmul.bf16.vlgmr.msra.gmra.mxu2 %v2985_v23  ;;  %3020 = vmatmul.bf16.vlgmr.msrb.gmra.mxu0 %v2985_v23 }
 0xd0d   :  { %v3008_v29 = vpop.f32.mrf.mxu3  ;;  %3154 = vmatpush.bf16.msra.mxu2 %v6521_v10  ;;  %3183 = vmatpush.bf16.msrb.mxu0 %v7148_v57 }
 0xd0f   :  { %v2981_v44 = vpop.f32.mrf.mxu1 }
 0xd11   :  { %3155 = vmatpush.bf16.msra.mxu2 %v6528_v43  ;;  %3184 = vmatpush.bf16.msrb.mxu0 %v7149_v51 }
 0xd15   :  { %v3010_v21 = vpop.f32.mrf.mxu3  ;;  %3156 = vmatpush.bf16.msra.mxu2 %v6535_v49  ;;  %3185 = vmatpush.bf16.msrb.mxu0 %v7150_v62 }
 0xd17   :  { %v3034_v9 = vpop.f32.mrf.mxu1 }
 0xd19   :  { %3157 = vmatpush.bf16.msra.mxu2 %v6542_v6  ;;  %3186 = vmatpush.bf16.msrb.mxu0 %v7151_v28 }
 0xd1c   :  { %3046 = vmatmul.bf16.vlgmr.msrb.gmra.mxu2 %v2985_v23  ;;  %3072 = vmatmul.bf16.vlgmr.msra.gmra.mxu0 %v2985_v23 }
 0xd1d   :  { %v6546_v54 = vpop.f32.mrf.mxu3  ;;  %3158 = vmatpush.bf16.msra.mxu2 %v6551_v14  ;;  %3187 = vmatpush.bf16.msrb.mxu0 %v7152_v39 }
 0xd1f   :  { %v3036_v50 = vpop.f32.mrf.mxu1 }
 0xd21   :  { %3159 = vmatpush.bf16.msra.mxu2 %v6558_v32  ;;  %3188 = vmatpush.bf16.msrb.mxu0 %v7153_v22 }
 0xd25   :  { %v3062_v37 = vpop.f32.mrf.mxu3  ;;  %3160 = vmatpush.bf16.msra.mxu2 %v6565_v41  ;;  %3189 = vmatpush.bf16.msrb.mxu0 %v7154_v53 }
 0xd27   :  { %v3086_v36 = vpop.f32.mrf.mxu1 }
 0xd29   :  { %3161 = vmatpush.bf16.msra.mxu2 %v6572_v46  ;;  %3190 = vmatpush.bf16.msrb.mxu0 %v7155_v7 }
 0xd2d   :  { %3209 = vmatpush.bf16.msrb.mxu2 %v7156_v60  ;;  %3235 = vmatpush.bf16.msra.mxu0 %v7157_v63 }
 0xd2f   :  { %v3088_v18 = vpop.f32.mrf.mxu1 }
 0xd31   :  { %3210 = vmatpush.bf16.msrb.mxu2 %v7158_v27  ;;  %3236 = vmatpush.bf16.msra.mxu0 %v7159_v16 }
 0xd35   :  { %3211 = vmatpush.bf16.msrb.mxu2 %v7160_v31  ;;  %3237 = vmatpush.bf16.msra.mxu0 %v7161_v3 }
 0xd39   :  { %3212 = vmatpush.bf16.msrb.mxu2 %v7162_v8  ;;  %3238 = vmatpush.bf16.msra.mxu0 %v7163_v20 }
 0xd3d   :  { %3213 = vmatpush.bf16.msrb.mxu2 %v7164_v58  ;;  %3239 = vmatpush.bf16.msra.mxu0 %v7165_v38 }
 0xd41   :  { %3214 = vmatpush.bf16.msrb.mxu2 %v7166_v11  ;;  %3240 = vmatpush.bf16.msra.mxu0 %v7167_v4 }
 0xd45   :  { %3215 = vmatpush.bf16.msrb.mxu2 %v7168_v2  ;;  %3241 = vmatpush.bf16.msra.mxu0 %v7169_v1 }
 0xd49   :  { %3216 = vmatpush.bf16.msrb.mxu2 %v7170_v24  ;;  %3242 = vmatpush.bf16.msra.mxu0 %v7171_v40 }
 0xd89   :  { %v3021_v59 = vpop.f32.mrf.mxu0 }
 0xd8a   :  { %v3022_v34 = vadd.f32 %v3021_v59, %v7172_v45 }
 0xd8c   :  { %v3035_v56 = vadd.f32 %v3034_v9, %v3022_v34 }
 0xd8e   :  { %v4102_v13 = vmul.f32 -1.442695, %v3035_v56 }
 0xd8f   :  { %v2995_v48 = vpop.f32.mrf.mxu2 }
 0xd90   :  { %4445 = vpow2.f32 %v4102_v13  ;;  %v2996_v17 = vadd.f32 %v2995_v48, %v7173_v52 }
 0xd91   :  { %v3023_v5 = vpop.f32.mrf.mxu0 }
 0xd92   :  { %v3009_v61 = vadd.f32 %v3008_v29, %v2996_v17 }
 0xd94   :  { %v4101_v23 = vmul.f32 -1.442695, %v3009_v61 }
 0xd96   :  { %v4446_v57 = vpop.eup %4445  ;;  %4447 = vpow2.f32 %v4101_v23 }
 0xd97   :  { %v3112_v44 = vadd.f32 1.0, %v4446_v57  ;;  %v2997_v51 = vpop.f32.mrf.mxu2 }
 0xd99   :  { %4449 = vrcp.f32 %v3112_v44  ;;  %v3073_v21 = vpop.f32.mrf.mxu0  ;;  %vm3118_vm11 = vweird.f32 %v3112_v44  ;;  %v3122_v38 = vand.u32 2147483647, %v3112_v44 }
 0xd9a   :  { %v3074_v62 = vadd.f32 %v3073_v21, %v7106_v12 }
 0xd9b   :  { %vm3123_vm15 = vcmp.eq.f32.partialorder %v3122_v38, 8.507059e+37 }
 0xd9c   :  { %v4448_v28 = vpop.eup %4447  ;;  %v3087_v39 = vadd.f32 %v3086_v36, %v3074_v62  ;;  %v3124_v36 = vand.u32 2147483648, %v3112_v44 }
 0xd9d   :  { %v3093_v50 = vadd.f32 1.0, %v4448_v28 }
 0xd9e   :  { %v4103_v9 = vmul.f32 -1.442695, %v3087_v39 }
 0xd9f   :  { %v4450_v22 = vpop.eup %4449  ;;  %4451 = vrcp.f32 %v3093_v50  ;;  %v3047_v37 = vpop.f32.mrf.mxu2  ;;  %v3105_v11 = vand.u32 2147483648, %v3093_v50  ;;  %v3103_v2 = vand.u32 2147483647, %v3093_v50  ;;  %vm3099_vm14 = vweird.f32 %v3093_v50 }
 0xda0   :  { %v3114_v53 = vmul.f32 %v4450_v22, %v3112_v44  ;;  %4453 = vpow2.f32 %v4103_v9  ;;  %v3048_v29 = vadd.f32 %v3047_v37, %v7107_v33  ;;  %vm3119_vm10 = vweird.f32 %v4450_v22 }
 0xda1   :  { %v3075_v7 = vpop.f32.mrf.mxu0  ;;  %vm3120_vm12 = vmor %vm3118_vm11, %vm3119_vm10  ;;  %v3106_v40 = vor.u32 1.1754944e-38, %v3105_v11  ;;  %vm3104_vm1 = vcmp.eq.f32.partialorder %v3103_v2, 8.507059e+37 }
 0xda2   :  { %v3115_v60 = vsub.f32 1.0, %v3114_v53  ;;  %v3061_v27 = vadd.f32 %v6546_v54, %v3048_v29  ;;  %v3125_v54 = vor.u32 1.1754944e-38, %v3124_v36 }
 0xda4   :  { %v3116_v63 = vmul.f32 %v4450_v22, %v3115_v60  ;;  %4455 = vtanh.f32 %v3061_v27 }
 0xda5   :  { %v4452_v16 = vpop.eup %4451 }
 0xda6   :  { %v4454_v18 = vpop.eup %4453  ;;  %v3095_v31 = vmul.f32 %v4452_v16, %v3093_v50  ;;  %v3117_v3 = vadd.f32 %v4450_v22, %v3116_v63  ;;  %vm3100_vm13 = vweird.f32 %v4452_v16 }
 0xda7   :  { %v3132_v8 = vadd.f32 1.0, %v4454_v18  ;;  %v3049_v20 = vpop.f32.mrf.mxu2  ;;  %vm3101_vm0 = vmor %vm3099_vm14, %vm3100_vm13 }
 0xda8   :  { %v3096_v58 = vsub.f32 1.0, %v3095_v31  ;;  %v3121_v1 = vsel %vm3120_vm12, %v4450_v22, %v3117_v3 }
 0xda9   :  { %4457 = vrcp.f32 %v3132_v8  ;;  %v3126_v59 = vsel %vm3123_vm15, %v3125_v54, %v3121_v1  ;;  %v3144_v44 = vand.u32 2147483648, %v3132_v8  ;;  %v3142_v21 = vand.u32 2147483647, %v3132_v8 }
 0xdaa   :  { %v3097_v4 = vmul.f32 %v4452_v16, %v3096_v58  ;;  %v4456_v34 = vpop.eup %4455  ;;  %v3148_v5 = vmul.f32 %v3126_v59, %v6474_v42  ;;  %vm3138_vm3 = vweird.f32 %v3132_v8 }
 0xdab   :  { %v3145_v28 = vor.u32 1.1754944e-38, %v3144_v44  ;;  %vm3143_vm5 = vcmp.eq.f32.partialorder %v3142_v21, 8.507059e+37 }
 0xdac   :  { %v3098_v24 = vadd.f32 %v4452_v16, %v3097_v4 }
 0xdae   :  { %v3102_v56 = vsel %vm3101_vm0, %v4452_v16, %v3098_v24 }
 0xdaf   :  { %v4458_v13 = vpop.eup %4457  ;;  %v3107_v48 = vsel %vm3104_vm1, %v3106_v40, %v3102_v56 }
 0xdb0   :  { %v3134_v17 = vmul.f32 %v4458_v13, %v3132_v8  ;;  %v3149_v61 = vmul.f32 %v4456_v34, %v3107_v48  ;;  %vm3139_vm2 = vweird.f32 %v4458_v13 }
 0xdb1   :  { %vm3140_vm4 = vmor %vm3138_vm3, %vm3139_vm2  ;;  %vm3370_vm2 = vcmask 1041409   ;;  %vm3373_vm3 = vcmask 1042434  }
 0xdb2   :  { %v3135_v23 = vsub.f32 1.0, %v3134_v17  ;;  %v6598_v57 = vadd.f32 %v3149_v61, %v3148_v5 }
 0xdb4   :  { %v3136_v51 = vmul.f32 %v4458_v13, %v3135_v23  ;;  %4459 = vtanh.f32 %v6598_v57 }
 0xdb6   :  { %v3137_v62 = vadd.f32 %v4458_v13, %v3136_v51 }
 0xdb8   :  { %v3141_v39 = vsel %vm3140_vm4, %v4458_v13, %v3137_v62  ;;  %vm3376_vm4 = vcmask 1043459  }
 0xdb9   :  { %v3146_v50 = vsel %vm3143_vm5, %v3145_v28, %v3141_v39  ;;  %vm3379_vm5 = vcmask 1044484  }
 0xdba   :  { %v4460_v9 = vpop.eup %4459 }
 0xdbb   :  { %v3152_v22 = vmul.f32 %v4460_v9, %v3146_v50 }
 0xdbd   :  { %v3153_v42 = vpack.c.bf16 %v3152_v22, %v3152_v22 }
 0xdbf   :  { %3162 = vmatmul.bf16.vlgmr.msra.gmra.mxu2 %v3153_v42  ;;  %3191 = vmatmul.bf16.vlgmr.msrb.gmra.mxu0 %v3153_v42 }
 0xdc0   :  { %3261 = vmatpush.bf16.msra.mxu2 %v6958_v35 }
 0xdc4   :  { %3262 = vmatpush.bf16.msra.mxu2 %v6959_v0 }
 0xdc8   :  { %3263 = vmatpush.bf16.msra.mxu2 %v6960_v55 }
 0xdcc   :  { %3264 = vmatpush.bf16.msra.mxu2 %v6961_v30 }
 0xdcf   :  { %3217 = vmatmul.bf16.vlgmr.msrb.gmra.mxu2 %v3153_v42  ;;  %3243 = vmatmul.bf16.vlgmr.msra.gmra.mxu0 %v3153_v42 }
 0xdd0   :  { %3265 = vmatpush.bf16.msra.mxu2 %v6962_v19 }
 0xdd4   :  { %3266 = vmatpush.bf16.msra.mxu2 %v6963_v26 }
 0xdd8   :  { %3267 = vmatpush.bf16.msra.mxu2 %v5841_v25 }
 0xddc   :  { %3268 = vmatpush.bf16.msra.mxu2 %v5873_v47 }
 0xddf   :  { %3269 = vmatmul.bf16.vlgmr.msra.gmra.mxu2 %v3153_v42 }
 0xe3c   :  { %v3192_v37 = vpop.f32.mrf.mxu0 }
 0xe42   :  { %v3163_v53 = vpop.f32.mrf.mxu2 }
 0xe43   :  { %v3164_v35 = vadd.f32 %v7147_v15, %v3163_v53 }
 0xe44   :  { %v3194_v0 = vpop.f32.mrf.mxu0 }
 0xe45   :  { %3168 = vst [vmem:[#allocation3 + $0x30] sm:$0xff] %v3164_v35  ;;  %v3169_v55 = vpack.c.bf16 %v3164_v35, %v3164_v35 }
 0xe47   :  { %3178 = vmatmul.bf16.vlgmr.msra.gmra.mxu3 %v3169_v55  ;;  %3204 = vmatmul.bf16.vlgmr.msrb.gmra.mxu1 %v3169_v55 }
 0xe48   :  { %3338 = vmatpush.bf16.msra.mxu3 %v6521_v10 }
 0xe4a   :  { %v3165_v30 = vpop.f32.mrf.mxu2 }
 0xe4c   :  { %v3244_v19 = vpop.f32.mrf.mxu0  ;;  %3339 = vmatpush.bf16.msra.mxu3 %v6528_v43 }
 0xe50   :  { %3340 = vmatpush.bf16.msra.mxu3 %v6535_v49 }
 0xe52   :  { %v3218_v25 = vpop.f32.mrf.mxu2 }
 0xe54   :  { %v3246_v47 = vpop.f32.mrf.mxu0  ;;  %3341 = vmatpush.bf16.msra.mxu3 %v6542_v6 }
 0xe57   :  { %3230 = vmatmul.bf16.vlgmr.msrb.gmra.mxu3 %v3169_v55  ;;  %3256 = vmatmul.bf16.vlgmr.msra.gmra.mxu1 %v3169_v55 }
 0xe58   :  { %3342 = vmatpush.bf16.msra.mxu3 %v6551_v14 }
 0xe5a   :  { %v3220_v26 = vpop.f32.mrf.mxu2 }
 0xe5c   :  { %3343 = vmatpush.bf16.msra.mxu3 %v6558_v32 }
 0xe60   :  { %3344 = vmatpush.bf16.msra.mxu3 %v6565_v41 }
 0xe62   :  { %v3270_v15 = vpop.f32.mrf.mxu2 }
 0xe64   :  { %3345 = vmatpush.bf16.msra.mxu3 %v6572_v46 }
 0xe6a   :  { %v3272_v10 = vpop.f32.mrf.mxu2 }
 0xe6b   :  { %v3393_v10 = vld [vmem:[#allocation3 + $0x9] sm:$0x1] }
 0xec4   :  { %v3205_v43 = vpop.f32.mrf.mxu1 }
 0xec5   :  { %v3206_v49 = vadd.f32 %v3205_v43, %v7172_v45  ;;  %v3426_v43 = vld [vmem:[#allocation3 + $0xa] sm:$0x1] }
 0xec7   :  { %v3219_v29 = vadd.f32 %v3218_v25, %v3206_v49  ;;  %v3459_v49 = vld [vmem:[#allocation3 + $0xb] sm:$0x1] }
 0xec9   :  { %v4105_v7 = vmul.f32 -1.442695, %v3219_v29  ;;  %v3492_v29 = vld [vmem:[#allocation3 + $0xc] sm:$0x1] }
 0xeca   :  { %v3179_v60 = vpop.f32.mrf.mxu3 }
 0xecb   :  { %4461 = vpow2.f32 %v4105_v7  ;;  %v3180_v6 = vadd.f32 %v3179_v60, %v7173_v52  ;;  %v3525_v60 = vld [vmem:[#allocation3 + $0xd] sm:$0x1] }
 0xecc   :  { %v3207_v63 = vpop.f32.mrf.mxu1 }
 0xecd   :  { %v3193_v14 = vadd.f32 %v3192_v37, %v3180_v6  ;;  %v3558_v6 = vld [vmem:[#allocation3 + $0xe] sm:$0x1]  ;;  %v3408_v63 = vrot.slane %v3393_v10, 7 }
 0xecf   :  { %v4104_v27 = vmul.f32 -1.442695, %v3193_v14  ;;  %v3441_v14 = vrot.slane %v3426_v43, 7 }
 0xed1   :  { %v4462_v16 = vpop.eup %4461  ;;  %4463 = vpow2.f32 %v4104_v27  ;;  %v3591_v27 = vld [vmem:[#allocation3 + $0xf] sm:$0x1] }
 0xed2   :  { %v3296_v32 = vadd.f32 1.0, %v4462_v16  ;;  %v3181_v41 = vpop.f32.mrf.mxu3  ;;  %v3355_v16 = vld [vmem:[#allocation3 + $0x10] sm:$0x1] }
 0xed3   :  { %v3474_v41 = vrot.slane %v3459_v49, 7 }
 0xed4   :  { %4465 = vrcp.f32 %v3296_v32  ;;  %v3257_v18 = vpop.f32.mrf.mxu1  ;;  %v3308_v40 = vand.u32 2147483648, %v3296_v32  ;;  %vm3302_vm7 = vweird.f32 %v3296_v32  ;;  %v3306_v13 = vand.u32 2147483647, %v3296_v32 }
 0xed5   :  { %v3258_v46 = vadd.f32 %v3257_v18, %v7106_v12  ;;  %v3507_v18 = vrot.slane %v3492_v29, 7  ;;  %v3396_v29 = vld [vmem:[#allocation3 + $0x21] sm:$0x1] }
 0xed6   :  { %v3309_v61 = vor.u32 1.1754944e-38, %v3308_v40  ;;  %vm3307_vm11 = vcmp.eq.f32.partialorder %v3306_v13, 8.507059e+37 }
 0xed7   :  { %v4464_v31 = vpop.eup %4463  ;;  %v3271_v3 = vadd.f32 %v3270_v15, %v3258_v46  ;;  %v3394_v46 = vld [vmem:[#allocation3 + $0x11] sm:$0x1] }
 0xed8   :  { %v3277_v45 = vadd.f32 1.0, %v4464_v31  ;;  %v3427_v31 = vld [vmem:[#allocation3 + $0x12] sm:$0x1] }
 0xed9   :  { %v4106_v36 = vmul.f32 -1.442695, %v3271_v3  ;;  %v3392_v3 = vld [vmem:[#allocation3 + $0x1] sm:$0x1]  ;;  %v3443_v40 = vrot.slane %v3427_v31, 6 }
 0xeda   :  { %v4466_v8 = vpop.eup %4465  ;;  %4467 = vrcp.f32 %v3277_v45  ;;  %v3231_v20 = vpop.f32.mrf.mxu3  ;;  %v3289_v48 = vand.u32 2147483648, %v3277_v45  ;;  %v3287_v17 = vand.u32 2147483647, %v3277_v45  ;;  %vm3283_vm10 = vweird.f32 %v3277_v45  ;;  %v3561_v31 = vld [vmem:[#allocation3 + $0x26] sm:$0x1] }
 0xedb   :  { %v3298_v58 = vmul.f32 %v4466_v8, %v3296_v32  ;;  %4469 = vpow2.f32 %v4106_v36  ;;  %v3232_v52 = vadd.f32 %v3231_v20, %v7107_v33  ;;  %vm3303_vm6 = vweird.f32 %v4466_v8  ;;  %v3353_v32 = vld [vmem:[#allocation3] sm:$0x1]  ;;  %v3460_v20 = vld [vmem:[#allocation3 + $0x13] sm:$0x1] }
 0xedc   :  { %v3259_v38 = vpop.f32.mrf.mxu1  ;;  %vm3304_vm8 = vmor %vm3302_vm7, %vm3303_vm6  ;;  %v3290_v44 = vor.u32 1.1754944e-38, %v3289_v48  ;;  %vm3288_vm13 = vcmp.eq.f32.partialorder %v3287_v17, 8.507059e+37  ;;  %v3540_v36 = vrot.slane %v3525_v60, 7  ;;  %v3476_v48 = vrot.slane %v3460_v20, 6  ;;  %v3592_v17 = vld [vmem:[#allocation3 + $0x17] sm:$0x1] }
 0xedd   :  { %v3299_v11 = vsub.f32 1.0, %v3298_v58  ;;  %v3245_v2 = vadd.f32 %v3244_v19, %v3232_v52  ;;  %v3493_v58 = vld [vmem:[#allocation3 + $0x14] sm:$0x1]  ;;  %v3458_v52 = vld [vmem:[#allocation3 + $0x3] sm:$0x1]  ;;  %vm3382_vm6 = vcmask 1045509  }
 0xede   :  { %v3491_v38 = vld [vmem:[#allocation3 + $0x4] sm:$0x1]  ;;  %v3358_v20 = vld [vmem:[#allocation3 + $0x28] sm:$0x1]  ;;  %vm3385_vm7 = vcmask 1046534  }
 0xedf   :  { %v3300_v4 = vmul.f32 %v4466_v8, %v3299_v11  ;;  %4471 = vtanh.f32 %v3245_v2  ;;  %v3524_v11 = vld [vmem:[#allocation3 + $0x5] sm:$0x1]  ;;  %v3606_v2 = vrot.slane %v3591_v27, 7  ;;  %v3462_v27 = vld [vmem:[#allocation3 + $0x23] sm:$0x1] }
 0xee0   :  { %v4468_v1 = vpop.eup %4467 }
 0xee1   :  { %v4470_v54 = vpop.eup %4469  ;;  %v3279_v24 = vmul.f32 %v4468_v1, %v3277_v45  ;;  %v3301_v12 = vadd.f32 %v4466_v8, %v3300_v4  ;;  %vm3284_vm9 = vweird.f32 %v4468_v1  ;;  %v3425_v45 = vld [vmem:[#allocation3 + $0x2] sm:$0x1]  ;;  %v3557_v4 = vld [vmem:[#allocation3 + $0x6] sm:$0x1] }
 0xee2   :  { %v3316_v59 = vadd.f32 1.0, %v4470_v54  ;;  %v3233_v34 = vpop.f32.mrf.mxu3  ;;  %vm3285_vm12 = vmor %vm3283_vm10, %vm3284_vm9  ;;  %v3590_v54 = vld [vmem:[#allocation3 + $0x7] sm:$0x1]  ;;  %v3442_v13 = vsel %vm3370_vm2, %v3441_v14, %v3425_v45 }
 0xee3   :  { %v3280_v56 = vsub.f32 1.0, %v3279_v24  ;;  %v3305_v5 = vsel %vm3304_vm8, %v4466_v8, %v3301_v12  ;;  %v3573_v8 = vrot.slane %v3558_v6, 7  ;;  %v3410_v12 = vrot.slane %v3394_v46, 6  ;;  %v3559_v34 = vld [vmem:[#allocation3 + $0x16] sm:$0x1] }
 0xee4   :  { %4473 = vrcp.f32 %v3316_v59  ;;  %v3310_v51 = vsel %vm3307_vm11, %v3309_v61, %v3305_v5  ;;  %v3328_v53 = vand.u32 2147483648, %v3316_v59  ;;  %v3326_v0 = vand.u32 2147483647, %v3316_v59  ;;  %v3356_v5 = vld [vmem:[#allocation3 + $0x18] sm:$0x1] }
 0xee5   :  { %v3281_v33 = vmul.f32 %v4468_v1, %v3280_v56  ;;  %v4472_v21 = vpop.eup %4471  ;;  %v3332_v9 = vmul.f32 %v3310_v51, %v6598_v57  ;;  %vm3322_vm15 = vweird.f32 %v3316_v59  ;;  %v3354_v57 = vld [vmem:[#allocation3 + $0x8] sm:$0x1]  ;;  %v3409_v56 = vsel %vm3370_vm2, %v3408_v63, %v3392_v3  ;;  %v3528_v46 = vld [vmem:[#allocation3 + $0x25] sm:$0x1] }
 0xee6   :  { %v3329_v30 = vor.u32 1.1754944e-38, %v3328_v53  ;;  %vm3327_vm1 = vcmp.eq.f32.partialorder %v3326_v0, 8.507059e+37  ;;  %v3369_v7 = vrot.slane %v3354_v57, 7  ;;  %v3475_v61 = vsel %vm3370_vm2, %v3474_v41, %v3458_v52 }
 0xee7   :  { %v3282_v23 = vadd.f32 %v4468_v1, %v3281_v33  ;;  %v3509_v33 = vrot.slane %v3493_v58, 6  ;;  %v3574_v51 = vsel %vm3370_vm2, %v3573_v8, %v3557_v4  ;;  %v3411_v53 = vsel %vm3373_vm3, %v3410_v12, %v3409_v56  ;;  %v3397_v58 = vld [vmem:[#allocation3 + $0x29] sm:$0x1]  ;;  %v4494_v56 = vld [vmem:[%s6719_s7] ss:$0 sm:$0xff] }
 0xee8   :  { %v3371_v24 = vsel %vm3370_vm2, %v3369_v7, %v3353_v32  ;;  %v3608_v0 = vrot.slane %v3592_v17, 6  ;;  %v3477_v57 = vsel %vm3373_vm3, %v3476_v48, %v3475_v61  ;;  %v3429_v7 = vld [vmem:[#allocation3 + $0x22] sm:$0x1]  ;;  %v3546_v12 = vrot.slane %v3528_v46, 4  ;;  %v3529_v61 = vld [vmem:[#allocation3 + $0x2d] sm:$0x1] }
 0xee9   :  { %v3286_v62 = vsel %vm3285_vm12, %v4468_v1, %v3282_v23  ;;  %v3372_v1 = vrot.slane %v3355_v16, 6  ;;  %v3508_v23 = vsel %vm3370_vm2, %v3507_v18, %v3491_v38  ;;  %v3495_v16 = vld [vmem:[#allocation3 + $0x24] sm:$0x1]  ;;  %v3447_v8 = vrot.slane %v3429_v7, 4 }
 0xeea   :  { %v4474_v28 = vpop.eup %4473  ;;  %v3291_v39 = vsel %vm3288_vm13, %v3290_v44, %v3286_v62  ;;  %v3541_v44 = vsel %vm3370_vm2, %v3540_v36, %v3524_v11  ;;  %v3428_v62 = vld [vmem:[#allocation3 + $0x1a] sm:$0x1]  ;;  %v3510_v10 = vsel %vm3373_vm3, %v3509_v33, %v3508_v23  ;;  %v3414_v36 = vrot.slane %v3396_v29, 4  ;;  %v3359_v23 = vld [vmem:[#allocation3 + $0x30] sm:$0x1] }
 0xeeb   :  { %v3318_v50 = vmul.f32 %v4474_v28, %v3316_v59  ;;  %v3333_v22 = vmul.f32 %v4472_v21, %v3291_v39  ;;  %vm3323_vm14 = vweird.f32 %v4474_v28  ;;  %v3526_v59 = vld [vmem:[#allocation3 + $0x15] sm:$0x1]  ;;  %v3395_v21 = vld [vmem:[#allocation3 + $0x19] sm:$0x1]  ;;  %v3607_v39 = vsel %vm3370_vm2, %v3606_v2, %v3590_v54  ;;  %v6644_v2 = vld [vmem:[#allocation3 + $0x27] sm:$0x1] }
 0xeec   :  { %vm3324_vm0 = vmor %vm3322_vm15, %vm3323_vm14  ;;  %v3609_v32 = vsel %vm3373_vm3, %v3608_v0, %v3607_v39  ;;  %v3480_v11 = vrot.slane %v3462_v27, 4  ;;  %v3513_v4 = vrot.slane %v3495_v16, 4  ;;  %v3381_v17 = vrot.slane %v3358_v20, 3  ;;  %v3431_v39 = vld [vmem:[#allocation3 + $0x32] sm:$0x1] }
 0xeed   :  { %v3319_v42 = vsub.f32 1.0, %v3318_v50  ;;  %v3334_v37 = vadd.f32 %v3333_v22, %v3332_v9  ;;  %v3374_v50 = vsel %vm3373_vm3, %v3372_v1, %v3371_v24  ;;  %v3542_v9 = vrot.slane %v3526_v59, 6  ;;  %v3430_v1 = vld [vmem:[#allocation3 + $0x2a] sm:$0x1]  ;;  %v3463_v59 = vld [vmem:[#allocation3 + $0x2b] sm:$0x1] }
 0xeee   :  { %v3575_v22 = vrot.slane %v3559_v34, 6  ;;  %v3496_v34 = vld [vmem:[#allocation3 + $0x2c] sm:$0x1]  ;;  %vm3388_vm8 = vcmask 1047559  }
 0xeef   :  { %v3320_v35 = vmul.f32 %v4474_v28, %v3319_v42  ;;  %4475 = vtanh.f32 %v3334_v37  ;;  %v3494_v42 = vld [vmem:[#allocation3 + $0x1c] sm:$0x1]  ;;  %v3527_v37 = vld [vmem:[#allocation3 + $0x1d] sm:$0x1]  ;;  %v3543_v60 = vsel %vm3373_vm3, %v3542_v9, %v3541_v44  ;;  %v3482_v9 = vrot.slane %v3463_v59, 3 }
 0xef0   :  { %v3511_v43 = vrot.slane %v3494_v42, 5  ;;  %v3544_v49 = vrot.slane %v3527_v37, 5  ;;  %v3576_v6 = vsel %vm3373_vm3, %v3575_v22, %v3574_v51  ;;  %v3515_v22 = vrot.slane %v3496_v34, 3  ;;  %v3562_v42 = vld [vmem:[#allocation3 + $0x2e] sm:$0x1] }
 0xef1   :  { %v3321_v55 = vadd.f32 %v4474_v28, %v3320_v35  ;;  %v3444_v35 = vsel %vm3373_vm3, %v3443_v40, %v3442_v13  ;;  %v3579_v40 = vrot.slane %v3561_v31, 4  ;;  %v3581_v7 = vrot.slane %v3562_v42, 3 }
 0xef2   :  { %v3512_v38 = vsel %vm3376_vm4, %v3511_v43, %v3510_v10  ;;  %v3545_v24 = vsel %vm3376_vm4, %v3544_v49, %v3543_v60 }
 0xef3   :  { %v3325_v19 = vsel %vm3324_vm0, %v4474_v28, %v3321_v55  ;;  %v3461_v28 = vld [vmem:[#allocation3 + $0x1b] sm:$0x1]  ;;  %v3375_v55 = vrot.slane %v3356_v5, 5  ;;  %v3416_v5 = vrot.slane %v3397_v58, 3 }
 0xef4   :  { %v3330_v25 = vsel %vm3327_vm1, %v3329_v30, %v3325_v19  ;;  %v3560_v30 = vld [vmem:[#allocation3 + $0x1e] sm:$0x1]  ;;  %v3593_v19 = vld [vmem:[#allocation3 + $0x1f] sm:$0x1] }
 0xef5   :  { %v4476_v47 = vpop.eup %4475  ;;  %v3577_v63 = vrot.slane %v3560_v30, 5  ;;  %v3610_v14 = vrot.slane %v3593_v19, 5  ;;  %v3377_v41 = vsel %vm3376_vm4, %v3375_v55, %v3374_v50  ;;  %v3612_v50 = vrot.slane %v6644_v2, 4  ;;  %v3595_v55 = vld [vmem:[#allocation3 + $0x2f] sm:$0x1] }
 0xef6   :  { %v3336_v26 = vmul.f32 %v4476_v47, %v3330_v25  ;;  %v3412_v25 = vrot.slane %v3395_v21, 5  ;;  %v3445_v47 = vrot.slane %v3428_v62, 5  ;;  %v3449_v62 = vrot.slane %v3430_v1, 3  ;;  %v3464_v30 = vld [vmem:[#allocation3 + $0x33] sm:$0x1] }
 0xef7   :  { %v3578_v48 = vsel %vm3376_vm4, %v3577_v63, %v3576_v6  ;;  %v6652_v33 = vsel %vm3376_vm4, %v3610_v14, %v3609_v32  ;;  %v3497_v19 = vld [vmem:[#allocation3 + $0x34] sm:$0x1]  ;;  %v3484_v60 = vrot.slane %v3464_v30, 2  ;;  %v3563_v63 = vld [vmem:[#allocation3 + $0x36] sm:$0x1]  ;;  %v3614_v16 = vrot.slane %v3595_v55, 3 }
 0xef8   :  { %v3337_v15 = vpack.c.bf16 %v3336_v26, %v3336_v26  ;;  %v3478_v26 = vrot.slane %v3461_v28, 5  ;;  %v3413_v3 = vsel %vm3376_vm4, %v3412_v25, %v3411_v53  ;;  %v3446_v45 = vsel %vm3376_vm4, %v3445_v47, %v3444_v35  ;;  %v3398_v28 = vld [vmem:[#allocation3 + $0x31] sm:$0x1] }
 0xef9   :  { %v3415_v51 = vsel %vm3379_vm5, %v3414_v36, %v3413_v3  ;;  %v3448_v21 = vsel %vm3379_vm5, %v3447_v8, %v3446_v45  ;;  %v3514_v53 = vsel %vm3379_vm5, %v3513_v4, %v3512_v38  ;;  %v3547_v35 = vsel %vm3379_vm5, %v3546_v12, %v3545_v24 }
 0xefa   :  { %3346 = vmatmul.bf16.vlgmr.msra.gmra.mxu3 %v3337_v15  ;;  %v3357_v15 = vld [vmem:[#allocation3 + $0x20] sm:$0x1]  ;;  %v3479_v52 = vsel %vm3376_vm4, %v3478_v26, %v3477_v57  ;;  %v3580_v0 = vsel %vm3379_vm5, %v3579_v40, %v3578_v48  ;;  %v3548_v25 = vrot.slane %v3529_v61, 3  ;;  %v3384_v47 = vrot.slane %v3359_v23, 2  ;;  %v3530_v57 = vld [vmem:[#allocation3 + $0x35] sm:$0x1] }
 0xefb   :  { %v3378_v18 = vrot.slane %v3357_v15, 4  ;;  %v3481_v37 = vsel %vm3379_vm5, %v3480_v11, %v3479_v52  ;;  %v3418_v26 = vrot.slane %v3398_v28, 2  ;;  %v3451_v15 = vrot.slane %v3431_v39, 2 }
 0xefc   :  { %v3417_v43 = vsel %vm3382_vm6, %v3416_v5, %v3415_v51  ;;  %v3450_v49 = vsel %vm3382_vm6, %v3449_v62, %v3448_v21  ;;  %v3483_v29 = vsel %vm3382_vm6, %v3482_v9, %v3481_v37  ;;  %v3517_v6 = vrot.slane %v3497_v19, 2 }
 0xefd   :  { %v3380_v44 = vsel %vm3379_vm5, %v3378_v18, %v3377_v41  ;;  %v3516_v27 = vsel %vm3382_vm6, %v3515_v22, %v3514_v53  ;;  %v3550_v32 = vrot.slane %v3530_v57, 2  ;;  %v3596_v41 = vld [vmem:[#allocation3 + $0x37] sm:$0x1]  ;;  %v3549_v18 = vsel %vm3382_vm6, %v3548_v25, %v3547_v35 }
 0xefe   :  { %v3383_v10 = vsel %vm3382_vm6, %v3381_v17, %v3380_v44  ;;  %v3419_v31 = vsel %vm3385_vm7, %v3418_v26, %v3417_v43  ;;  %v3452_v3 = vsel %vm3385_vm7, %v3451_v15, %v3450_v49  ;;  %v3583_v20 = vrot.slane %v3563_v63, 2 }
 0xeff   :  { %v3386_v46 = vsel %vm3385_vm7, %v3384_v47, %v3383_v10  ;;  %v3485_v4 = vsel %vm3385_vm7, %v3484_v60, %v3483_v29  ;;  %v3518_v1 = vsel %vm3385_vm7, %v3517_v6, %v3516_v27  ;;  %v3613_v51 = vsel %vm3379_vm5, %v3612_v50, %v6652_v33 }
 0xf00   :  { %v3582_v21 = vsel %vm3382_vm6, %v3581_v7, %v3580_v0  ;;  %v3551_v62 = vsel %vm3385_vm7, %v3550_v32, %v3549_v18  ;;  %v3615_v39 = vsel %vm3382_vm6, %v3614_v16, %v3613_v51 }
 0xf01   :  { %v3584_v9 = vsel %vm3385_vm7, %v3583_v20, %v3582_v21 }
 0xf7d   :  { %v3347_v54 = vpop.f32.mrf.mxu3 }
 0xf7e   :  { %v3348_v13 = vadd.f32 %v4494_v56, %v3347_v54  ;;  %v3616_v54 = vrot.slane %v3596_v41, 2 }
 0xf80   :  { %3352 = vst [vmem:[#allocation3 + $0x38] sm:$0xff] %v3348_v13  ;;  %v3617_v33 = vsel %vm3385_vm7, %v3616_v54, %v3615_v39 }
 0xf85   :  { %v3349_v14 = vpop.f32.mrf.mxu3 }
 0xf87   :  { %v3360_v45 = vld [vmem:[#allocation3 + $0x38] sm:$0x1]  ;;  %v3399_v36 = vld [vmem:[#allocation3 + $0x39] sm:$0x1]  ;;  %v3432_v8 = vld [vmem:[#allocation3 + $0x3a] sm:$0x1] }
 0xf88   :  { %v3387_v58 = vrot.slane %v3360_v45, 1  ;;  %v3420_v52 = vrot.slane %v3399_v36, 1  ;;  %v3453_v38 = vrot.slane %v3432_v8, 1  ;;  %v3465_v11 = vld [vmem:[#allocation3 + $0x3b] sm:$0x1] }
 0xf89   :  { %v3486_v24 = vrot.slane %v3465_v11, 1  ;;  %v3498_v12 = vld [vmem:[#allocation3 + $0x3c] sm:$0x1]  ;;  %v3531_v40 = vld [vmem:[#allocation3 + $0x3d] sm:$0x1] }
 0xf8a   :  { %v3389_v59 = vsel %vm3388_vm8, %v3387_v58, %v3386_v46  ;;  %v3421_v34 = vsel %vm3388_vm8, %v3420_v52, %v3419_v31  ;;  %v3454_v56 = vsel %vm3388_vm8, %v3453_v38, %v3452_v3  ;;  %v3519_v13 = vrot.slane %v3498_v12, 1  ;;  %v3564_v48 = vld [vmem:[#allocation3 + $0x3e] sm:$0x1]  ;;  %v3597_v17 = vld [vmem:[#allocation3 + $0x3f] sm:$0x1] }
 0xf8b   :  { %3391 = vst [vmem:[%s6722_s8] sm:$0xff] %v3389_v59  ;;  %v3487_v5 = vsel %vm3388_vm8, %v3486_v24, %v3485_v4  ;;  %v3552_v61 = vrot.slane %v3531_v40, 1  ;;  %v3585_v23 = vrot.slane %v3564_v48, 1  ;;  %v3618_v44 = vrot.slane %v3597_v17, 1 }
 0xf8c   :  { %4107 = vst [vmem:[%s6722_s8 + $0x8] sm:$0xff] %v3421_v34  ;;  %v3520_v28 = vsel %vm3388_vm8, %v3519_v13, %v3518_v1 }
 0xf8d   :  { %4108 = vst [vmem:[%s6722_s8 + $0x10] sm:$0xff] %v3454_v56  ;;  %v3553_v2 = vsel %vm3388_vm8, %v3552_v61, %v3551_v62  ;;  %v3586_v50 = vsel %vm3388_vm8, %v3585_v23, %v3584_v9  ;;  %v3619_v22 = vsel %vm3388_vm8, %v3618_v44, %v3617_v33 }
 0xf8e   :  { %4109 = vst [vmem:[%s6722_s8 + $0x18] sm:$0xff] %v3487_v5 }
 0xf8f   :  { %4110 = vst [vmem:[%s6722_s8 + $0x20] sm:$0xff] %v3520_v28 }
 0xf90   :  { %4111 = vst [vmem:[%s6722_s8 + $0x28] sm:$0xff] %v3553_v2 }
 0xf91   :  { %4112 = vst [vmem:[%s6722_s8 + $0x30] sm:$0xff] %v3586_v50 }
 0xf92   :  { %4113 = vst [vmem:[%s6722_s8 + $0x38] sm:$0xff] %v3619_v22 }

</bundles_post_ra>
